<compile_context>
chip_gen: v6e
topology: v6e:2x2x1
jax: 0.10.0
libtpu: 0.0.40
codegen_flags: <defaults>
</compile_context>

<pallas_src>
import functools

import numpy as np

import jax
import jax.numpy as jnp
from jax import lax
from jax.experimental import pallas as pl
from jax.experimental.pallas import tpu as pltpu

LN_EPS = 1e-5
BN_EPS = 1e-5
NUM_HEADS = 8


# ------------------------------ small helpers --------------------------------

def _ln_cols(x, g, b):
    """LayerNorm over axis 0 (features on sublanes); g, b are (D, 1)."""
    mu = jnp.mean(x, axis=0, keepdims=True)
    var = jnp.mean((x - mu) ** 2, axis=0, keepdims=True)
    return (x - mu) * lax.rsqrt(var + LN_EPS) * g + b


def _ln_rows(x, g, b):
    """LayerNorm over the last axis (features on lanes); g, b are (1, D)."""
    mu = jnp.mean(x, axis=-1, keepdims=True)
    var = jnp.mean((x - mu) ** 2, axis=-1, keepdims=True)
    return (x - mu) * lax.rsqrt(var + LN_EPS) * g + b


def _vspec(shape):
    return pl.BlockSpec(shape, lambda i: (0,) * len(shape))


# ----------------------------- the fused kernel -------------------------------

def _trans_se_kernel(
        # data
        x_ref, y_ref,
        # spatial MCA (dim = C), column orientation
        s_g_ref, s_b_ref, s_wq_ref, s_wkv_ref, s_hm_ref, s_he_ref,
        s_wt_ref, s_bp_ref,
        # channel block (MCA dim = HW), row orientation
        c1w_ref, c1b_ref, c_g_ref, c_b_ref, c_wqt_ref, c_wkvt_ref,
        c_hr_ref, c_he_ref, c_wb_ref, c_bp_ref,
        # squeeze conv (BN folded) + border masks
        sq_w_ref, sq_b_ref, msk_ref,
        # outputs
        y2_ref, ysq_ref,
        *, B, C, HW, Ww, Co, num_heads):
    f32 = jnp.float32
    scale_s = float((C // num_heads) ** -0.5)
    scale_c = float((HW // num_heads) ** -0.5)
    BHW = B * HW

    x2d = x_ref[...]                                   # (B*C, HW)
    y2d = y_ref[...]                                   # (B*C, HW)

    # ---- spatial self-enhancement: MCA over channels (column layout) --------
    s_g = s_g_ref[...]                                 # (C, 1)
    s_b = s_b_ref[...]
    kv_ln_tiles, q_ln_cols = [], []
    for b in range(B):
        yb = y2d[b * C:(b + 1) * C, :]                 # (C, HW)
        kv_ln_tiles.append(_ln_cols(yb, s_g, s_b))
        # AdaptiveAvgPool2d((1,1)) query = mean over the spatial positions
        q_ln_cols.append(_ln_cols(jnp.mean(yb, axis=1, keepdims=True), s_g, s_b))
    kv_ln = jnp.concatenate(kv_ln_tiles, axis=1)       # (C, B*HW) lane-stacked
    q_ln = jnp.concatenate(q_ln_cols, axis=1)          # (C, B)
    # merged k/v projection and stacked query projection (one MXU op each)
    kv = jnp.dot(s_wkv_ref[...], kv_ln, preferred_element_type=f32)   # (2C, B*HW)
    q = jnp.dot(s_wq_ref[...], q_ln, preferred_element_type=f32)      # (C, B)

    s_hm = s_hm_ref[...]                               # (H, C)  head-reduce
    s_he = s_he_ref[...]                               # (C, H)  head-expand
    head_cols = []
    for b in range(B):
        k_b = kv[:C, b * HW:(b + 1) * HW]              # (C, HW)
        v_b = kv[C:, b * HW:(b + 1) * HW]              # (C, HW)
        s = jnp.dot(s_hm, k_b * q[:, b:b + 1],
                    preferred_element_type=f32) * scale_s              # (H, HW)
        s = s - jnp.max(s, axis=1, keepdims=True)
        p = jnp.exp(s)
        p = p * pl.reciprocal(jnp.sum(p, axis=1, keepdims=True), approx=True)
        pe = jnp.dot(s_he, p, preferred_element_type=f32)              # (C, HW)
        head_cols.append(jnp.sum(pe * v_b, axis=1, keepdims=True))     # (C, 1)
    head_s = jnp.concatenate(head_cols, axis=0)        # (B*C, 1)
    # cross-batch head scramble + proj Linear folded into one matrix
    proj_s = jnp.dot(s_wt_ref[...], head_s,
                     preferred_element_type=f32) + s_bp_ref[...]       # (B*C, 1)
    y1 = y2d * proj_s                                  # (B*C, HW) spatial output

    # ---- channel cross-enhancement: MCA over spatial dim (row layout) -------
    c_g = c_g_ref[...]                                 # (1, HW)
    c_b = c_b_ref[...]
    kv_ln2 = _ln_rows(y1, c_g, c_b)                    # (B*C, HW)
    kv2 = jnp.dot(kv_ln2, c_wkvt_ref[...], preferred_element_type=f32)  # (B*C, 2HW)

    # conv1x1 (C -> 1) query for the whole batch with one block-diagonal matmul
    q2raw = jnp.dot(c1w_ref[...], x2d,
                    preferred_element_type=f32) + c1b_ref[0, 0]        # (B, HW)
    q2 = jnp.dot(_ln_rows(q2raw, c_g, c_b), c_wqt_ref[...],
                 preferred_element_type=f32)                           # (B, HW)

    c_hr = c_hr_ref[...]                               # (HW, H)
    c_he = c_he_ref[...]                               # (H, HW)
    head_rows = []
    for b in range(B):
        k2 = kv2[b * C:(b + 1) * C, :HW]               # (C, HW)
        v2 = kv2[b * C:(b + 1) * C, HW:]               # (C, HW)
        s2 = jnp.dot(k2 * q2[b:b + 1, :], c_hr,
                     preferred_element_type=f32) * scale_c             # (C, H)
        s2 = s2 - jnp.max(s2, axis=0, keepdims=True)
        p2 = jnp.exp(s2)
        p2 = p2 * pl.reciprocal(jnp.sum(p2, axis=0, keepdims=True), approx=True)
        pe2 = jnp.dot(p2, c_he, preferred_element_type=f32)            # (C, HW)
        head_rows.append(jnp.sum(pe2 * v2, axis=0, keepdims=True))     # (1, HW)
    head_c = jnp.concatenate(head_rows, axis=1)        # (1, B*HW)
    proj_c = jnp.dot(head_c, c_wb_ref[...],
                     preferred_element_type=f32) + c_bp_ref[...]       # (1, B*HW)

    # assemble y2 directly in the lane-dense (C, B*HW) output layout
    y2_cb = jnp.concatenate(
        [y1[b * C:(b + 1) * C, :] * proj_c[:, b * HW:(b + 1) * HW]
         for b in range(B)], axis=1)                   # (C, B*HW)
    y2_ref[...] = y2_cb

    # ---- squeeze: conv3x3(pad=1) + BatchNorm(eval, folded) + ReLU -----------
    acc = jnp.zeros((Co, BHW), dtype=f32)
    for di in range(3):
        for dj in range(3):
            t = di * 3 + dj
            off = (di - 1) * Ww + (dj - 1)
            shifted = y2_cb if off == 0 else pltpu.roll(
                y2_cb, shift=(-off) % BHW, axis=1)
            # border mask zeroes both the image padding and any cross-batch
            # wrap introduced by the full-row roll (only border pixels wrap).
            acc = acc + jnp.dot(sq_w_ref[t], shifted * msk_ref[t],
                                preferred_element_type=f32)
    ysq_ref[...] = jnp.maximum(acc + sq_b_ref[...], 0.0)


# --------------------------------- wrapper ------------------------------------

def _fused_call(x2d, y2d, p, *, B, C, HW, Ww, Co):
    BHW = B * HW
    H = NUM_HEADS
    kern = functools.partial(_trans_se_kernel, B=B, C=C, HW=HW, Ww=Ww, Co=Co,
                             num_heads=H)
    vs = _vspec
    smem = pl.BlockSpec(memory_space=pltpu.MemorySpace.SMEM)
    return pl.pallas_call(
        kern,
        out_shape=(jax.ShapeDtypeStruct((C, BHW), jnp.float32),
                   jax.ShapeDtypeStruct((Co, BHW), jnp.float32)),
        grid=(1,),
        in_specs=[
            vs((B * C, HW)), vs((B * C, HW)),
            # spatial MCA
            vs((C, 1)), vs((C, 1)), vs((C, C)), vs((2 * C, C)),
            vs((H, C)), vs((C, H)), vs((B * C, B * C)), vs((B * C, 1)),
            # channel block
            vs((B, B * C)), smem,
            vs((1, HW)), vs((1, HW)), vs((HW, HW)), vs((HW, 2 * HW)),
            vs((HW, H)), vs((H, HW)), vs((BHW, BHW)), vs((1, BHW)),
            # squeeze
            vs((9, Co, C)), vs((Co, 1)), vs((9, 1, BHW)),
        ],
        out_specs=(vs((C, BHW)), vs((Co, BHW))),
        compiler_params=pltpu.CompilerParams(
            dimension_semantics=("arbitrary",),
            vmem_limit_bytes=32 * 1024 * 1024),
    )(x2d, y2d,
      p["s_g"], p["s_b"], p["s_wq"], p["s_wkv"], p["s_hm"], p["s_he"],
      p["s_wt"], p["s_bp"],
      p["c1w"], p["c1b"], p["c_g"], p["c_b"], p["c_wqt"], p["c_wkvt"],
      p["c_hr"], p["c_he"], p["c_wb"], p["c_bp"],
      p["sq_w"], p["sq_b"], p["masks"])


@jax.jit
def trans_se_block(x, y, P):
    B, C, Hh, Ww = y.shape
    HW = Hh * Ww
    Co = P["sq_b"].shape[0]
    y2_cb, ysq_cb = _fused_call(x.reshape(B * C, HW), y.reshape(B * C, HW), P,
                                B=B, C=C, HW=HW, Ww=Ww, Co=Co)
    y2 = jnp.transpose(y2_cb.reshape(C, B, Hh, Ww), (1, 0, 2, 3))
    ysq = jnp.transpose(ysq_cb.reshape(Co, B, Hh, Ww), (1, 0, 2, 3))
    return y2, ysq


# --------------------------- parameter init / prep ----------------------------

def init_params(key, C, HW, Co):
    ks = jax.random.split(key, 10)

    def nrm(k, shape, s=0.05):
        return jax.random.normal(k, shape, jnp.float32) * s

    def mca_params(k, D):
        k1, k2, k3, k4, k5, k6 = jax.random.split(k, 6)
        return {"ln_g": 1.0 + nrm(k1, (D,), 0.1),
                "ln_b": nrm(k2, (D,), 0.1),
                "wq": nrm(k3, (D, D)),          # nn.Linear(D, D, bias=False)
                "wkv": nrm(k4, (2 * D, D)),     # nn.Linear(D, 2D, bias=False)
                "wp": nrm(k5, (D, D)),          # proj weight
                "bp": nrm(k6, (D,), 0.1)}       # proj bias

    return {
        "spatial": mca_params(ks[0], C),
        "channel": {"conv1_w": nrm(ks[1], (C,), 0.1),
                    "conv1_b": nrm(ks[2], (1,), 0.1),
                    "mca": mca_params(ks[3], HW)},
        "squeeze": {"w": nrm(ks[4], (Co, C, 3, 3), 0.1),
                    "b": nrm(ks[5], (Co,), 0.1),
                    "bn_g": 1.0 + nrm(ks[6], (Co,), 0.1),
                    "bn_b": nrm(ks[7], (Co,), 0.1),
                    "bn_rm": nrm(ks[8], (Co,), 0.1),
                    "bn_rv": 1.0 + jnp.abs(nrm(ks[9], (Co,), 0.1))},
    }


def _head_mask(H, D):
    """(H, D) 0/1 matrix: [h, d] = 1 iff feature d belongs to head h."""
    hd = D // H
    m = (np.arange(D)[None, :] // hd == np.arange(H)[:, None]).astype(np.float32)
    return jnp.asarray(m)


def _scramble_perm(B, H, D):
    """0/1 permutation so that scrambled_flat = P @ head_flat, with both
    vectors stacked batch-major / feature-minor (length B*D)."""
    hd = D // H
    perm = np.zeros((B * D, B * D), np.float32)
    for bo in range(B):
        for c in range(D):
            f = bo * H + c // hd
            sb, src = f % B, (f // B) * hd + (c % hd)
            perm[bo * D + c, sb * D + src] = 1.0
    return jnp.asarray(perm)


def _fold_scramble_proj(wp, B, H, *, tall):
    """Fold PyTorch's (1,B,H,1,hd).transpose(1,2).reshape(B,1,D) head/batch
    scramble and the proj Linear weight into one (B*D, B*D) matrix.
       tall=True  : proj_stack (B*D,1) = W @ head_stack (B*D,1)
       tall=False : proj_wide  (1,B*D) = head_wide (1,B*D) @ W
    """
    D = wp.shape[0]
    w = jnp.kron(jnp.eye(B, dtype=wp.dtype), wp) @ _scramble_perm(B, H, D)
    return w if tall else w.T


def _conv_border_masks(Hh, Ww, B):
    """(9, 1, B*HW) zero-padding masks for the 3x3 conv taps, tiled over batch."""
    HW = Hh * Ww
    p = np.arange(HW)
    i, j = p // Ww, p % Ww
    masks = np.zeros((9, 1, B * HW), np.float32)
    for di in range(3):
        for dj in range(3):
            valid = ((i + di - 1 >= 0) & (i + di - 1 < Hh) &
                     (j + dj - 1 >= 0) & (j + dj - 1 < Ww))
            masks[di * 3 + dj, 0, :] = np.tile(valid.astype(np.float32), B)
    return jnp.asarray(masks)


def prepare_params(P, B, Hh, Ww):
    """One-time repack: scramble+proj folds, head masks, conv border masks,
    BN folding, block-diagonal conv1x1 weight.  Batch size B is baked in
    (the PyTorch scramble couples batches), so re-run if B changes."""
    sp, ch, sq = P["spatial"], P["channel"], P["squeeze"]
    C = sp["wq"].shape[0]
    HW = Hh * Ww
    Co = sq["w"].shape[0]
    H = NUM_HEADS
    cm = ch["mca"]

    # fold eval-mode BatchNorm into the 3x3 conv taps / bias
    bn_scale = sq["bn_g"] * lax.rsqrt(sq["bn_rv"] + BN_EPS)              # (Co,)
    w_taps = (jnp.transpose(sq["w"], (2, 3, 0, 1)).reshape(9, Co, C)
              * bn_scale.reshape(1, Co, 1))
    b_fold = ((sq["b"] - sq["bn_rm"]) * bn_scale + sq["bn_b"]).reshape(Co, 1)

    return {
        # spatial MCA (dim = C), column orientation
        "s_g": sp["ln_g"].reshape(C, 1), "s_b": sp["ln_b"].reshape(C, 1),
        "s_wq": sp["wq"], "s_wkv": sp["wkv"],
        "s_hm": _head_mask(H, C), "s_he": _head_mask(H, C).T,
        "s_wt": _fold_scramble_proj(sp["wp"], B, H, tall=True),
        "s_bp": jnp.tile(sp["bp"], B).reshape(B * C, 1),
        # channel MCA (dim = HW), row orientation
        "c1w": jnp.kron(jnp.eye(B, dtype=jnp.float32),
                        ch["conv1_w"].reshape(1, C)),
        "c1b": ch["conv1_b"].reshape(1, 1),
        "c_g": cm["ln_g"].reshape(1, HW), "c_b": cm["ln_b"].reshape(1, HW),
        "c_wqt": cm["wq"].T, "c_wkvt": cm["wkv"].T,
        "c_hr": _head_mask(H, HW).T, "c_he": _head_mask(H, HW),
        "c_wb": _fold_scramble_proj(cm["wp"], B, H, tall=False),
        "c_bp": jnp.tile(cm["bp"], B).reshape(1, B * HW),
        # squeeze
        "sq_w": w_taps, "sq_b": b_fold,
        "masks": _conv_border_masks(Hh, Ww, B),
    }


# --------------------------- pure-JAX reference -------------------------------

def _mca_ref(yq, ykv, p):
    B, N, D = ykv.shape
    H = NUM_HEADS
    hd = D // H
    scale = hd ** (-0.5)

    def ln(x):
        mu = jnp.mean(x, -1, keepdims=True)
        var = jnp.mean((x - mu) ** 2, -1, keepdims=True)
        return (x - mu) / jnp.sqrt(var + LN_EPS) * p["ln_g"] + p["ln_b"]

    q = ln(yq) @ p["wq"].T                                            # (B,1,D)
    kv = ln(ykv) @ p["wkv"].T                                         # (B,N,2D)
    q5 = jnp.transpose(q.reshape(B, 1, 1, H, hd), (2, 0, 3, 1, 4))    # (1,B,H,1,hd)
    kv5 = jnp.transpose(kv.reshape(B, N, 2, H, hd), (2, 0, 3, 1, 4))  # (2,B,H,N,hd)
    k, v = kv5[0], kv5[1]
    attn = jnp.einsum("sbhqd,bhnd->sbhqn", q5, k) * scale
    attn = jax.nn.softmax(attn, axis=-1)
    x5 = jnp.einsum("sbhqn,bhnd->sbhqd", attn, v)                     # (1,B,H,1,hd)
    x = jnp.transpose(x5, (0, 2, 1, 3, 4)).reshape(B, 1, D)           # buggy reshape
    return x @ p["wp"].T + p["bp"]


def ref_forward(x, y, P):
    B, C, H, W = y.shape
    HW = H * W
    pool_q = jnp.mean(y, axis=(2, 3)).reshape(B, 1, C)
    ykv = jnp.transpose(y, (0, 2, 3, 1)).reshape(B, HW, C)
    y1 = _mca_ref(pool_q, ykv, P["spatial"]) * ykv
    y1 = jnp.transpose(y1.reshape(B, H, W, C), (0, 3, 1, 2))

    pq = jnp.einsum("bchw,c->bhw", x, P["channel"]["conv1_w"]) + P["channel"]["conv1_b"][0]
    pq = pq.reshape(B, 1, HW)
    ykv2 = y1.reshape(B, C, HW)
    y2 = (_mca_ref(pq, ykv2, P["channel"]["mca"]) * ykv2).reshape(B, C, H, W)

    sp = P["squeeze"]
    conv = lax.conv_general_dilated(
        y2, sp["w"], (1, 1), ((1, 1), (1, 1)),
        dimension_numbers=("NCHW", "OIHW", "NCHW")) + sp["b"].reshape(1, -1, 1, 1)
    bn = ((conv - sp["bn_rm"].reshape(1, -1, 1, 1))
          / jnp.sqrt(sp["bn_rv"].reshape(1, -1, 1, 1) + BN_EPS)
          * sp["bn_g"].reshape(1, -1, 1, 1) + sp["bn_b"].reshape(1, -1, 1, 1))
    return y2, jnp.maximum(bn, 0.0)


# ------------------------------------ main ------------------------------------

if __name__ == "__main__":
    B, C, Hh, Ww, Co = 2, 32, 8, 8, 4          # channel_num=32, spatial_dim=64
    HW = Hh * Ww
    key = jax.random.PRNGKey(0)
    kx, ky, kp = jax.random.split(key, 3)
    x = jax.random.normal(kx, (B, C, Hh, Ww), jnp.float32)   # fused image
    y = jax.random.normal(ky, (B, C, Hh, Ww), jnp.float32)   # focal plane
    P = init_params(kp, C, HW, Co)
    Pk = prepare_params(P, B, Hh, Ww)                        # one-time repack

    y_out, y_sq = trans_se_block(x, y, Pk)
    jax.block_until_ready((y_out, y_sq))

    y_ref, y_sq_ref = ref_forward(x, y, P)
    assert y_out.shape == (B, C, Hh, Ww) and y_sq.shape == (B, Co, Hh, Ww)
    assert jnp.allclose(y_out, y_ref, atol=5e-3, rtol=5e-3), \
        f"y mismatch, max abs diff = {float(jnp.max(jnp.abs(y_out - y_ref)))}"
    assert jnp.allclose(y_sq, y_sq_ref, atol=5e-3, rtol=5e-3), \
        f"y_squeeze mismatch, max abs diff = {float(jnp.max(jnp.abs(y_sq - y_sq_ref)))}"
    print("KERNEL_OK")
</pallas_src>

<mosaic_0001>
module attributes {stable_mosaic.version = 11 : i64} {
  func.func @_trans_se_kernel(%arg0: i32, %arg1: memref<64x64xf32, #tpu.memory_space<vmem>>, %arg2: memref<64x64xf32, #tpu.memory_space<vmem>>, %arg3: memref<32x1xf32, #tpu.memory_space<vmem>>, %arg4: memref<32x1xf32, #tpu.memory_space<vmem>>, %arg5: memref<32x32xf32, #tpu.memory_space<vmem>>, %arg6: memref<64x32xf32, #tpu.memory_space<vmem>>, %arg7: memref<8x32xf32, #tpu.memory_space<vmem>>, %arg8: memref<32x8xf32, #tpu.memory_space<vmem>>, %arg9: memref<64x64xf32, #tpu.memory_space<vmem>>, %arg10: memref<64x1xf32, #tpu.memory_space<vmem>>, %arg11: memref<2x64xf32, #tpu.memory_space<vmem>>, %arg12: memref<1x1xf32, #tpu.memory_space<smem>>, %arg13: memref<1x64xf32, #tpu.memory_space<vmem>>, %arg14: memref<1x64xf32, #tpu.memory_space<vmem>>, %arg15: memref<64x64xf32, #tpu.memory_space<vmem>>, %arg16: memref<64x128xf32, #tpu.memory_space<vmem>>, %arg17: memref<64x8xf32, #tpu.memory_space<vmem>>, %arg18: memref<8x64xf32, #tpu.memory_space<vmem>>, %arg19: memref<128x128xf32, #tpu.memory_space<vmem>>, %arg20: memref<1x128xf32, #tpu.memory_space<vmem>>, %arg21: memref<9x4x32xf32, #tpu.memory_space<vmem>>, %arg22: memref<4x1xf32, #tpu.memory_space<vmem>>, %arg23: memref<9x1x128xf32, #tpu.memory_space<vmem>>, %arg24: memref<32x128xf32, #tpu.memory_space<vmem>>, %arg25: memref<4x128xf32, #tpu.memory_space<vmem>>) attributes {dimension_semantics = [#tpu.dimension_semantics<arbitrary>], iteration_bounds = array<i64: 1>, scalar_prefetch = 0 : i64, scratch_operands = 0 : i64, tpu.core_type = #tpu.core_type<tc>, window_params = [{pipeline_mode = #tpu.pipeline_mode<synchronous>, transform_indices = @transform_0, window_bounds = array<i64: 64, 64>}, {pipeline_mode = #tpu.pipeline_mode<synchronous>, transform_indices = @transform_1, window_bounds = array<i64: 64, 64>}, {pipeline_mode = #tpu.pipeline_mode<synchronous>, transform_indices = @transform_2, window_bounds = array<i64: 32, 1>}, {pipeline_mode = #tpu.pipeline_mode<synchronous>, transform_indices = @transform_3, window_bounds = array<i64: 32, 1>}, {pipeline_mode = #tpu.pipeline_mode<synchronous>, transform_indices = @transform_4, window_bounds = array<i64: 32, 32>}, {pipeline_mode = #tpu.pipeline_mode<synchronous>, transform_indices = @transform_5, window_bounds = array<i64: 64, 32>}, {pipeline_mode = #tpu.pipeline_mode<synchronous>, transform_indices = @transform_6, window_bounds = array<i64: 8, 32>}, {pipeline_mode = #tpu.pipeline_mode<synchronous>, transform_indices = @transform_7, window_bounds = array<i64: 32, 8>}, {pipeline_mode = #tpu.pipeline_mode<synchronous>, transform_indices = @transform_8, window_bounds = array<i64: 64, 64>}, {pipeline_mode = #tpu.pipeline_mode<synchronous>, transform_indices = @transform_9, window_bounds = array<i64: 64, 1>}, {pipeline_mode = #tpu.pipeline_mode<synchronous>, transform_indices = @transform_10, window_bounds = array<i64: 2, 64>}, {transform_indices = @transform_11, window_bounds = array<i64: 1, 1>}, {pipeline_mode = #tpu.pipeline_mode<synchronous>, transform_indices = @transform_12, window_bounds = array<i64: 1, 64>}, {pipeline_mode = #tpu.pipeline_mode<synchronous>, transform_indices = @transform_13, window_bounds = array<i64: 1, 64>}, {pipeline_mode = #tpu.pipeline_mode<synchronous>, transform_indices = @transform_14, window_bounds = array<i64: 64, 64>}, {pipeline_mode = #tpu.pipeline_mode<synchronous>, transform_indices = @transform_15, window_bounds = array<i64: 64, 128>}, {pipeline_mode = #tpu.pipeline_mode<synchronous>, transform_indices = @transform_16, window_bounds = array<i64: 64, 8>}, {pipeline_mode = #tpu.pipeline_mode<synchronous>, transform_indices = @transform_17, window_bounds = array<i64: 8, 64>}, {pipeline_mode = #tpu.pipeline_mode<synchronous>, transform_indices = @transform_18, window_bounds = array<i64: 128, 128>}, {pipeline_mode = #tpu.pipeline_mode<synchronous>, transform_indices = @transform_19, window_bounds = array<i64: 1, 128>}, {pipeline_mode = #tpu.pipeline_mode<synchronous>, transform_indices = @transform_20, window_bounds = array<i64: 9, 4, 32>}, {pipeline_mode = #tpu.pipeline_mode<synchronous>, transform_indices = @transform_21, window_bounds = array<i64: 4, 1>}, {pipeline_mode = #tpu.pipeline_mode<synchronous>, transform_indices = @transform_22, window_bounds = array<i64: 9, 1, 128>}, {pipeline_mode = #tpu.pipeline_mode<synchronous>, transform_indices = @transform_23, window_bounds = array<i64: 32, 128>}, {pipeline_mode = #tpu.pipeline_mode<synchronous>, transform_indices = @transform_24, window_bounds = array<i64: 4, 128>}]} {
    %c0 = arith.constant 0 : index
    %c0_0 = arith.constant 0 : index
    %0 = vector.load %arg1[%c0, %c0_0] : memref<64x64xf32, #tpu.memory_space<vmem>>, vector<64x64xf32>
    %c0_1 = arith.constant 0 : index
    %c0_2 = arith.constant 0 : index
    %1 = vector.load %arg2[%c0_1, %c0_2] : memref<64x64xf32, #tpu.memory_space<vmem>>, vector<64x64xf32>
    %c0_3 = arith.constant 0 : index
    %c0_4 = arith.constant 0 : index
    %2 = vector.load %arg3[%c0_3, %c0_4] : memref<32x1xf32, #tpu.memory_space<vmem>>, vector<32x1xf32>
    %c0_5 = arith.constant 0 : index
    %c0_6 = arith.constant 0 : index
    %3 = vector.load %arg4[%c0_5, %c0_6] : memref<32x1xf32, #tpu.memory_space<vmem>>, vector<32x1xf32>
    %4 = vector.extract_strided_slice %1 {offsets = [0, 0], sizes = [32, 64], strides = [1, 1]} : vector<64x64xf32> to vector<32x64xf32>
    %cst = arith.constant dense<0.000000e+00> : vector<64xf32>
    %5 = vector.multi_reduction <add>, %4, %cst [0] : vector<32x64xf32> to vector<64xf32>
    %6 = vector.shape_cast %5 : vector<64xf32> to vector<1x64xf32>
    %cst_7 = arith.constant 3.200000e+01 : f32
    %7 = vector.broadcast %cst_7 : f32 to vector<1x64xf32>
    %8 = arith.divf %6, %7 : vector<1x64xf32>
    %9 = vector.broadcast %8 : vector<1x64xf32> to vector<32x64xf32>
    %10 = arith.subf %4, %9 : vector<32x64xf32>
    %11 = arith.mulf %10, %10 : vector<32x64xf32>
    %cst_8 = arith.constant dense<0.000000e+00> : vector<64xf32>
    %12 = vector.multi_reduction <add>, %11, %cst_8 [0] : vector<32x64xf32> to vector<64xf32>
    %13 = vector.shape_cast %12 : vector<64xf32> to vector<1x64xf32>
    %cst_9 = arith.constant 3.200000e+01 : f32
    %14 = vector.broadcast %cst_9 : f32 to vector<1x64xf32>
    %15 = arith.divf %13, %14 : vector<1x64xf32>
    %16 = vector.broadcast %8 : vector<1x64xf32> to vector<32x64xf32>
    %17 = arith.subf %4, %16 : vector<32x64xf32>
    %cst_10 = arith.constant 9.99999974E-6 : f32
    %18 = vector.broadcast %cst_10 : f32 to vector<1x64xf32>
    %19 = arith.addf %15, %18 : vector<1x64xf32>
    %20 = math.rsqrt %19 : vector<1x64xf32>
    %21 = vector.broadcast %20 : vector<1x64xf32> to vector<32x64xf32>
    %22 = arith.mulf %17, %21 : vector<32x64xf32>
    %23 = vector.broadcast %2 : vector<32x1xf32> to vector<32x64xf32>
    %24 = arith.mulf %22, %23 : vector<32x64xf32>
    %25 = vector.broadcast %3 : vector<32x1xf32> to vector<32x64xf32>
    %26 = arith.addf %24, %25 : vector<32x64xf32>
    %cst_11 = arith.constant dense<0.000000e+00> : vector<32xf32>
    %27 = vector.multi_reduction <add>, %4, %cst_11 [1] : vector<32x64xf32> to vector<32xf32>
    %28 = vector.shape_cast %27 : vector<32xf32> to vector<32x1xf32>
    %cst_12 = arith.constant 6.400000e+01 : f32
    %29 = vector.broadcast %cst_12 : f32 to vector<32x1xf32>
    %30 = arith.divf %28, %29 : vector<32x1xf32>
    %cst_13 = arith.constant dense<0.000000e+00> : vector<1xf32>
    %31 = vector.multi_reduction <add>, %30, %cst_13 [0] : vector<32x1xf32> to vector<1xf32>
    %32 = vector.shape_cast %31 : vector<1xf32> to vector<1x1xf32>
    %cst_14 = arith.constant 3.200000e+01 : f32
    %33 = vector.broadcast %cst_14 : f32 to vector<1x1xf32>
    %34 = arith.divf %32, %33 : vector<1x1xf32>
    %35 = vector.broadcast %34 : vector<1x1xf32> to vector<32x1xf32>
    %36 = arith.subf %30, %35 : vector<32x1xf32>
    %37 = arith.mulf %36, %36 : vector<32x1xf32>
    %cst_15 = arith.constant dense<0.000000e+00> : vector<1xf32>
    %38 = vector.multi_reduction <add>, %37, %cst_15 [0] : vector<32x1xf32> to vector<1xf32>
    %39 = vector.shape_cast %38 : vector<1xf32> to vector<1x1xf32>
    %cst_16 = arith.constant 3.200000e+01 : f32
    %40 = vector.broadcast %cst_16 : f32 to vector<1x1xf32>
    %41 = arith.divf %39, %40 : vector<1x1xf32>
    %42 = vector.broadcast %34 : vector<1x1xf32> to vector<32x1xf32>
    %43 = arith.subf %30, %42 : vector<32x1xf32>
    %cst_17 = arith.constant 9.99999974E-6 : f32
    %44 = vector.broadcast %cst_17 : f32 to vector<1x1xf32>
    %45 = arith.addf %41, %44 : vector<1x1xf32>
    %46 = math.rsqrt %45 : vector<1x1xf32>
    %47 = vector.broadcast %46 : vector<1x1xf32> to vector<32x1xf32>
    %48 = arith.mulf %43, %47 : vector<32x1xf32>
    %49 = arith.mulf %48, %2 : vector<32x1xf32>
    %50 = arith.addf %49, %3 : vector<32x1xf32>
    %51 = vector.extract_strided_slice %1 {offsets = [32, 0], sizes = [32, 64], strides = [1, 1]} : vector<64x64xf32> to vector<32x64xf32>
    %cst_18 = arith.constant dense<0.000000e+00> : vector<64xf32>
    %52 = vector.multi_reduction <add>, %51, %cst_18 [0] : vector<32x64xf32> to vector<64xf32>
    %53 = vector.shape_cast %52 : vector<64xf32> to vector<1x64xf32>
    %cst_19 = arith.constant 3.200000e+01 : f32
    %54 = vector.broadcast %cst_19 : f32 to vector<1x64xf32>
    %55 = arith.divf %53, %54 : vector<1x64xf32>
    %56 = vector.broadcast %55 : vector<1x64xf32> to vector<32x64xf32>
    %57 = arith.subf %51, %56 : vector<32x64xf32>
    %58 = arith.mulf %57, %57 : vector<32x64xf32>
    %cst_20 = arith.constant dense<0.000000e+00> : vector<64xf32>
    %59 = vector.multi_reduction <add>, %58, %cst_20 [0] : vector<32x64xf32> to vector<64xf32>
    %60 = vector.shape_cast %59 : vector<64xf32> to vector<1x64xf32>
    %cst_21 = arith.constant 3.200000e+01 : f32
    %61 = vector.broadcast %cst_21 : f32 to vector<1x64xf32>
    %62 = arith.divf %60, %61 : vector<1x64xf32>
    %63 = vector.broadcast %55 : vector<1x64xf32> to vector<32x64xf32>
    %64 = arith.subf %51, %63 : vector<32x64xf32>
    %cst_22 = arith.constant 9.99999974E-6 : f32
    %65 = vector.broadcast %cst_22 : f32 to vector<1x64xf32>
    %66 = arith.addf %62, %65 : vector<1x64xf32>
    %67 = math.rsqrt %66 : vector<1x64xf32>
    %68 = vector.broadcast %67 : vector<1x64xf32> to vector<32x64xf32>
    %69 = arith.mulf %64, %68 : vector<32x64xf32>
    %70 = vector.broadcast %2 : vector<32x1xf32> to vector<32x64xf32>
    %71 = arith.mulf %69, %70 : vector<32x64xf32>
    %72 = vector.broadcast %3 : vector<32x1xf32> to vector<32x64xf32>
    %73 = arith.addf %71, %72 : vector<32x64xf32>
    %cst_23 = arith.constant dense<0.000000e+00> : vector<32xf32>
    %74 = vector.multi_reduction <add>, %51, %cst_23 [1] : vector<32x64xf32> to vector<32xf32>
    %75 = vector.shape_cast %74 : vector<32xf32> to vector<32x1xf32>
    %cst_24 = arith.constant 6.400000e+01 : f32
    %76 = vector.broadcast %cst_24 : f32 to vector<32x1xf32>
    %77 = arith.divf %75, %76 : vector<32x1xf32>
    %cst_25 = arith.constant dense<0.000000e+00> : vector<1xf32>
    %78 = vector.multi_reduction <add>, %77, %cst_25 [0] : vector<32x1xf32> to vector<1xf32>
    %79 = vector.shape_cast %78 : vector<1xf32> to vector<1x1xf32>
    %cst_26 = arith.constant 3.200000e+01 : f32
    %80 = vector.broadcast %cst_26 : f32 to vector<1x1xf32>
    %81 = arith.divf %79, %80 : vector<1x1xf32>
    %82 = vector.broadcast %81 : vector<1x1xf32> to vector<32x1xf32>
    %83 = arith.subf %77, %82 : vector<32x1xf32>
    %84 = arith.mulf %83, %83 : vector<32x1xf32>
    %cst_27 = arith.constant dense<0.000000e+00> : vector<1xf32>
    %85 = vector.multi_reduction <add>, %84, %cst_27 [0] : vector<32x1xf32> to vector<1xf32>
    %86 = vector.shape_cast %85 : vector<1xf32> to vector<1x1xf32>
    %cst_28 = arith.constant 3.200000e+01 : f32
    %87 = vector.broadcast %cst_28 : f32 to vector<1x1xf32>
    %88 = arith.divf %86, %87 : vector<1x1xf32>
    %89 = vector.broadcast %81 : vector<1x1xf32> to vector<32x1xf32>
    %90 = arith.subf %77, %89 : vector<32x1xf32>
    %cst_29 = arith.constant 9.99999974E-6 : f32
    %91 = vector.broadcast %cst_29 : f32 to vector<1x1xf32>
    %92 = arith.addf %88, %91 : vector<1x1xf32>
    %93 = math.rsqrt %92 : vector<1x1xf32>
    %94 = vector.broadcast %93 : vector<1x1xf32> to vector<32x1xf32>
    %95 = arith.mulf %90, %94 : vector<32x1xf32>
    %96 = arith.mulf %95, %2 : vector<32x1xf32>
    %97 = arith.addf %96, %3 : vector<32x1xf32>
    %98 = tpu.concatenate %26, %73 in 1 : vector<32x64xf32>, vector<32x64xf32> -> vector<32x128xf32>
    %99 = tpu.concatenate %50, %97 in 1 : vector<32x1xf32>, vector<32x1xf32> -> vector<32x2xf32>
    %c0_30 = arith.constant 0 : index
    %c0_31 = arith.constant 0 : index
    %100 = vector.load %arg6[%c0_30, %c0_31] : memref<64x32xf32, #tpu.memory_space<vmem>>, vector<64x32xf32>
    %cst_32 = arith.constant dense<0.000000e+00> : vector<64x128xf32>
    %101 = tpu.matmul %100, %98, %cst_32 {dimension_numbers = #tpu.dot_dimension_numbers<[1], [0], [0], [1], [0, 0, 1, 1], [], []>} : vector<64x32xf32>, vector<32x128xf32>, vector<64x128xf32> -> vector<64x128xf32>
    %c0_33 = arith.constant 0 : index
    %c0_34 = arith.constant 0 : index
    %102 = vector.load %arg5[%c0_33, %c0_34] : memref<32x32xf32, #tpu.memory_space<vmem>>, vector<32x32xf32>
    %cst_35 = arith.constant dense<0.000000e+00> : vector<32x2xf32>
    %103 = tpu.matmul %102, %99, %cst_35 {dimension_numbers = #tpu.dot_dimension_numbers<[1], [0], [0], [1], [0, 0, 1, 1], [], []>} : vector<32x32xf32>, vector<32x2xf32>, vector<32x2xf32> -> vector<32x2xf32>
    %c0_36 = arith.constant 0 : index
    %c0_37 = arith.constant 0 : index
    %104 = vector.load %arg7[%c0_36, %c0_37] : memref<8x32xf32, #tpu.memory_space<vmem>>, vector<8x32xf32>
    %c0_38 = arith.constant 0 : index
    %c0_39 = arith.constant 0 : index
    %105 = vector.load %arg8[%c0_38, %c0_39] : memref<32x8xf32, #tpu.memory_space<vmem>>, vector<32x8xf32>
    %106 = vector.extract_strided_slice %101 {offsets = [0, 0], sizes = [32, 64], strides = [1, 1]} : vector<64x128xf32> to vector<32x64xf32>
    %107 = vector.extract_strided_slice %101 {offsets = [32, 0], sizes = [32, 64], strides = [1, 1]} : vector<64x128xf32> to vector<32x64xf32>
    %108 = vector.extract_strided_slice %103 {offsets = [0, 0], sizes = [32, 1], strides = [1, 1]} : vector<32x2xf32> to vector<32x1xf32>
    %109 = vector.broadcast %108 : vector<32x1xf32> to vector<32x64xf32>
    %110 = arith.mulf %106, %109 : vector<32x64xf32>
    %cst_40 = arith.constant dense<0.000000e+00> : vector<8x64xf32>
    %111 = tpu.matmul %104, %110, %cst_40 {dimension_numbers = #tpu.dot_dimension_numbers<[1], [0], [0], [1], [0, 0, 1, 1], [], []>} : vector<8x32xf32>, vector<32x64xf32>, vector<8x64xf32> -> vector<8x64xf32>
    %cst_41 = arith.constant 5.000000e-01 : f32
    %112 = vector.broadcast %cst_41 : f32 to vector<8x64xf32>
    %113 = arith.mulf %111, %112 : vector<8x64xf32>
    %cst_42 = arith.constant dense<0xFF800000> : vector<8xf32>
    %114 = vector.multi_reduction <maximumf>, %113, %cst_42 [1] : vector<8x64xf32> to vector<8xf32>
    %115 = vector.shape_cast %114 : vector<8xf32> to vector<8x1xf32>
    %116 = vector.broadcast %115 : vector<8x1xf32> to vector<8x64xf32>
    %117 = arith.subf %113, %116 : vector<8x64xf32>
    %118 = math.exp %117 : vector<8x64xf32>
    %cst_43 = arith.constant dense<0.000000e+00> : vector<8xf32>
    %119 = vector.multi_reduction <add>, %118, %cst_43 [1] : vector<8x64xf32> to vector<8xf32>
    %120 = vector.shape_cast %119 : vector<8xf32> to vector<8x1xf32>
    %121 = tpu.reciprocal %120 {approx = true} : vector<8x1xf32> -> vector<8x1xf32>
    %122 = vector.broadcast %121 : vector<8x1xf32> to vector<8x64xf32>
    %123 = arith.mulf %118, %122 : vector<8x64xf32>
    %cst_44 = arith.constant dense<0.000000e+00> : vector<32x64xf32>
    %124 = tpu.matmul %105, %123, %cst_44 {dimension_numbers = #tpu.dot_dimension_numbers<[1], [0], [0], [1], [0, 0, 1, 1], [], []>} : vector<32x8xf32>, vector<8x64xf32>, vector<32x64xf32> -> vector<32x64xf32>
    %125 = arith.mulf %124, %107 : vector<32x64xf32>
    %cst_45 = arith.constant dense<0.000000e+00> : vector<32xf32>
    %126 = vector.multi_reduction <add>, %125, %cst_45 [1] : vector<32x64xf32> to vector<32xf32>
    %127 = vector.shape_cast %126 : vector<32xf32> to vector<32x1xf32>
    %128 = vector.extract_strided_slice %101 {offsets = [0, 64], sizes = [32, 64], strides = [1, 1]} : vector<64x128xf32> to vector<32x64xf32>
    %129 = vector.extract_strided_slice %101 {offsets = [32, 64], sizes = [32, 64], strides = [1, 1]} : vector<64x128xf32> to vector<32x64xf32>
    %130 = vector.extract_strided_slice %103 {offsets = [0, 1], sizes = [32, 1], strides = [1, 1]} : vector<32x2xf32> to vector<32x1xf32>
    %131 = vector.broadcast %130 : vector<32x1xf32> to vector<32x64xf32>
    %132 = arith.mulf %128, %131 : vector<32x64xf32>
    %cst_46 = arith.constant dense<0.000000e+00> : vector<8x64xf32>
    %133 = tpu.matmul %104, %132, %cst_46 {dimension_numbers = #tpu.dot_dimension_numbers<[1], [0], [0], [1], [0, 0, 1, 1], [], []>} : vector<8x32xf32>, vector<32x64xf32>, vector<8x64xf32> -> vector<8x64xf32>
    %cst_47 = arith.constant 5.000000e-01 : f32
    %134 = vector.broadcast %cst_47 : f32 to vector<8x64xf32>
    %135 = arith.mulf %133, %134 : vector<8x64xf32>
    %cst_48 = arith.constant dense<0xFF800000> : vector<8xf32>
    %136 = vector.multi_reduction <maximumf>, %135, %cst_48 [1] : vector<8x64xf32> to vector<8xf32>
    %137 = vector.shape_cast %136 : vector<8xf32> to vector<8x1xf32>
    %138 = vector.broadcast %137 : vector<8x1xf32> to vector<8x64xf32>
    %139 = arith.subf %135, %138 : vector<8x64xf32>
    %140 = math.exp %139 : vector<8x64xf32>
    %cst_49 = arith.constant dense<0.000000e+00> : vector<8xf32>
    %141 = vector.multi_reduction <add>, %140, %cst_49 [1] : vector<8x64xf32> to vector<8xf32>
    %142 = vector.shape_cast %141 : vector<8xf32> to vector<8x1xf32>
    %143 = tpu.reciprocal %142 {approx = true} : vector<8x1xf32> -> vector<8x1xf32>
    %144 = vector.broadcast %143 : vector<8x1xf32> to vector<8x64xf32>
    %145 = arith.mulf %140, %144 : vector<8x64xf32>
    %cst_50 = arith.constant dense<0.000000e+00> : vector<32x64xf32>
    %146 = tpu.matmul %105, %145, %cst_50 {dimension_numbers = #tpu.dot_dimension_numbers<[1], [0], [0], [1], [0, 0, 1, 1], [], []>} : vector<32x8xf32>, vector<8x64xf32>, vector<32x64xf32> -> vector<32x64xf32>
    %147 = arith.mulf %146, %129 : vector<32x64xf32>
    %cst_51 = arith.constant dense<0.000000e+00> : vector<32xf32>
    %148 = vector.multi_reduction <add>, %147, %cst_51 [1] : vector<32x64xf32> to vector<32xf32>
    %149 = vector.shape_cast %148 : vector<32xf32> to vector<32x1xf32>
    %150 = tpu.concatenate %127, %149 in 0 : vector<32x1xf32>, vector<32x1xf32> -> vector<64x1xf32>
    %c0_52 = arith.constant 0 : index
    %c0_53 = arith.constant 0 : index
    %151 = vector.load %arg9[%c0_52, %c0_53] : memref<64x64xf32, #tpu.memory_space<vmem>>, vector<64x64xf32>
    %cst_54 = arith.constant dense<0.000000e+00> : vector<64x1xf32>
    %152 = tpu.matmul %151, %150, %cst_54 {dimension_numbers = #tpu.dot_dimension_numbers<[1], [0], [0], [1], [0, 0, 1, 1], [], []>} : vector<64x64xf32>, vector<64x1xf32>, vector<64x1xf32> -> vector<64x1xf32>
    %c0_55 = arith.constant 0 : index
    %c0_56 = arith.constant 0 : index
    %153 = vector.load %arg10[%c0_55, %c0_56] : memref<64x1xf32, #tpu.memory_space<vmem>>, vector<64x1xf32>
    %154 = arith.addf %152, %153 : vector<64x1xf32>
    %155 = vector.broadcast %154 : vector<64x1xf32> to vector<64x64xf32>
    %156 = arith.mulf %1, %155 : vector<64x64xf32>
    %c0_57 = arith.constant 0 : index
    %c0_58 = arith.constant 0 : index
    %157 = vector.load %arg13[%c0_57, %c0_58] : memref<1x64xf32, #tpu.memory_space<vmem>>, vector<1x64xf32>
    %c0_59 = arith.constant 0 : index
    %c0_60 = arith.constant 0 : index
    %158 = vector.load %arg14[%c0_59, %c0_60] : memref<1x64xf32, #tpu.memory_space<vmem>>, vector<1x64xf32>
    %cst_61 = arith.constant dense<0.000000e+00> : vector<64xf32>
    %159 = vector.multi_reduction <add>, %156, %cst_61 [1] : vector<64x64xf32> to vector<64xf32>
    %160 = vector.shape_cast %159 : vector<64xf32> to vector<64x1xf32>
    %cst_62 = arith.constant 6.400000e+01 : f32
    %161 = vector.broadcast %cst_62 : f32 to vector<64x1xf32>
    %162 = arith.divf %160, %161 : vector<64x1xf32>
    %163 = vector.broadcast %162 : vector<64x1xf32> to vector<64x64xf32>
    %164 = arith.subf %156, %163 : vector<64x64xf32>
    %165 = arith.mulf %164, %164 : vector<64x64xf32>
    %cst_63 = arith.constant dense<0.000000e+00> : vector<64xf32>
    %166 = vector.multi_reduction <add>, %165, %cst_63 [1] : vector<64x64xf32> to vector<64xf32>
    %167 = vector.shape_cast %166 : vector<64xf32> to vector<64x1xf32>
    %cst_64 = arith.constant 6.400000e+01 : f32
    %168 = vector.broadcast %cst_64 : f32 to vector<64x1xf32>
    %169 = arith.divf %167, %168 : vector<64x1xf32>
    %170 = vector.broadcast %162 : vector<64x1xf32> to vector<64x64xf32>
    %171 = arith.subf %156, %170 : vector<64x64xf32>
    %cst_65 = arith.constant 9.99999974E-6 : f32
    %172 = vector.broadcast %cst_65 : f32 to vector<64x1xf32>
    %173 = arith.addf %169, %172 : vector<64x1xf32>
    %174 = math.rsqrt %173 : vector<64x1xf32>
    %175 = vector.broadcast %174 : vector<64x1xf32> to vector<64x64xf32>
    %176 = arith.mulf %171, %175 : vector<64x64xf32>
    %177 = vector.broadcast %157 : vector<1x64xf32> to vector<64x64xf32>
    %178 = arith.mulf %176, %177 : vector<64x64xf32>
    %179 = vector.broadcast %158 : vector<1x64xf32> to vector<64x64xf32>
    %180 = arith.addf %178, %179 : vector<64x64xf32>
    %c0_66 = arith.constant 0 : index
    %c0_67 = arith.constant 0 : index
    %181 = vector.load %arg16[%c0_66, %c0_67] : memref<64x128xf32, #tpu.memory_space<vmem>>, vector<64x128xf32>
    %cst_68 = arith.constant dense<0.000000e+00> : vector<64x128xf32>
    %182 = tpu.matmul %180, %181, %cst_68 {dimension_numbers = #tpu.dot_dimension_numbers<[1], [0], [0], [1], [0, 0, 1, 1], [], []>} : vector<64x64xf32>, vector<64x128xf32>, vector<64x128xf32> -> vector<64x128xf32>
    %c0_69 = arith.constant 0 : index
    %c0_70 = arith.constant 0 : index
    %183 = vector.load %arg11[%c0_69, %c0_70] : memref<2x64xf32, #tpu.memory_space<vmem>>, vector<2x64xf32>
    %cst_71 = arith.constant dense<0.000000e+00> : vector<2x64xf32>
    %184 = tpu.matmul %183, %0, %cst_71 {dimension_numbers = #tpu.dot_dimension_numbers<[1], [0], [0], [1], [0, 0, 1, 1], [], []>} : vector<2x64xf32>, vector<64x64xf32>, vector<2x64xf32> -> vector<2x64xf32>
    %c0_72 = arith.constant 0 : index
    %c0_73 = arith.constant 0 : index
    %185 = memref.load %arg12[%c0_72, %c0_73] : memref<1x1xf32, #tpu.memory_space<smem>>
    %186 = vector.broadcast %185 : f32 to vector<2x64xf32>
    %187 = arith.addf %184, %186 : vector<2x64xf32>
    %cst_74 = arith.constant dense<0.000000e+00> : vector<2xf32>
    %188 = vector.multi_reduction <add>, %187, %cst_74 [1] : vector<2x64xf32> to vector<2xf32>
    %189 = vector.shape_cast %188 : vector<2xf32> to vector<2x1xf32>
    %cst_75 = arith.constant 6.400000e+01 : f32
    %190 = vector.broadcast %cst_75 : f32 to vector<2x1xf32>
    %191 = arith.divf %189, %190 : vector<2x1xf32>
    %192 = vector.broadcast %191 : vector<2x1xf32> to vector<2x64xf32>
    %193 = arith.subf %187, %192 : vector<2x64xf32>
    %194 = arith.mulf %193, %193 : vector<2x64xf32>
    %cst_76 = arith.constant dense<0.000000e+00> : vector<2xf32>
    %195 = vector.multi_reduction <add>, %194, %cst_76 [1] : vector<2x64xf32> to vector<2xf32>
    %196 = vector.shape_cast %195 : vector<2xf32> to vector<2x1xf32>
    %cst_77 = arith.constant 6.400000e+01 : f32
    %197 = vector.broadcast %cst_77 : f32 to vector<2x1xf32>
    %198 = arith.divf %196, %197 : vector<2x1xf32>
    %199 = vector.broadcast %191 : vector<2x1xf32> to vector<2x64xf32>
    %200 = arith.subf %187, %199 : vector<2x64xf32>
    %cst_78 = arith.constant 9.99999974E-6 : f32
    %201 = vector.broadcast %cst_78 : f32 to vector<2x1xf32>
    %202 = arith.addf %198, %201 : vector<2x1xf32>
    %203 = math.rsqrt %202 : vector<2x1xf32>
    %204 = vector.broadcast %203 : vector<2x1xf32> to vector<2x64xf32>
    %205 = arith.mulf %200, %204 : vector<2x64xf32>
    %206 = vector.broadcast %157 : vector<1x64xf32> to vector<2x64xf32>
    %207 = arith.mulf %205, %206 : vector<2x64xf32>
    %208 = vector.broadcast %158 : vector<1x64xf32> to vector<2x64xf32>
    %209 = arith.addf %207, %208 : vector<2x64xf32>
    %c0_79 = arith.constant 0 : index
    %c0_80 = arith.constant 0 : index
    %210 = vector.load %arg15[%c0_79, %c0_80] : memref<64x64xf32, #tpu.memory_space<vmem>>, vector<64x64xf32>
    %cst_81 = arith.constant dense<0.000000e+00> : vector<2x64xf32>
    %211 = tpu.matmul %209, %210, %cst_81 {dimension_numbers = #tpu.dot_dimension_numbers<[1], [0], [0], [1], [0, 0, 1, 1], [], []>} : vector<2x64xf32>, vector<64x64xf32>, vector<2x64xf32> -> vector<2x64xf32>
    %c0_82 = arith.constant 0 : index
    %c0_83 = arith.constant 0 : index
    %212 = vector.load %arg17[%c0_82, %c0_83] : memref<64x8xf32, #tpu.memory_space<vmem>>, vector<64x8xf32>
    %c0_84 = arith.constant 0 : index
    %c0_85 = arith.constant 0 : index
    %213 = vector.load %arg18[%c0_84, %c0_85] : memref<8x64xf32, #tpu.memory_space<vmem>>, vector<8x64xf32>
    %214 = vector.extract_strided_slice %182 {offsets = [0, 0], sizes = [32, 64], strides = [1, 1]} : vector<64x128xf32> to vector<32x64xf32>
    %215 = vector.extract_strided_slice %182 {offsets = [0, 64], sizes = [32, 64], strides = [1, 1]} : vector<64x128xf32> to vector<32x64xf32>
    %216 = vector.extract_strided_slice %211 {offsets = [0, 0], sizes = [1, 64], strides = [1, 1]} : vector<2x64xf32> to vector<1x64xf32>
    %217 = vector.broadcast %216 : vector<1x64xf32> to vector<32x64xf32>
    %218 = arith.mulf %214, %217 : vector<32x64xf32>
    %cst_86 = arith.constant dense<0.000000e+00> : vector<32x8xf32>
    %219 = tpu.matmul %218, %212, %cst_86 {dimension_numbers = #tpu.dot_dimension_numbers<[1], [0], [0], [1], [0, 0, 1, 1], [], []>} : vector<32x64xf32>, vector<64x8xf32>, vector<32x8xf32> -> vector<32x8xf32>
    %cst_87 = arith.constant 0.353553385 : f32
    %220 = vector.broadcast %cst_87 : f32 to vector<32x8xf32>
    %221 = arith.mulf %219, %220 : vector<32x8xf32>
    %cst_88 = arith.constant dense<0xFF800000> : vector<8xf32>
    %222 = vector.multi_reduction <maximumf>, %221, %cst_88 [0] : vector<32x8xf32> to vector<8xf32>
    %223 = vector.shape_cast %222 : vector<8xf32> to vector<1x8xf32>
    %224 = vector.broadcast %223 : vector<1x8xf32> to vector<32x8xf32>
    %225 = arith.subf %221, %224 : vector<32x8xf32>
    %226 = math.exp %225 : vector<32x8xf32>
    %cst_89 = arith.constant dense<0.000000e+00> : vector<8xf32>
    %227 = vector.multi_reduction <add>, %226, %cst_89 [0] : vector<32x8xf32> to vector<8xf32>
    %228 = vector.shape_cast %227 : vector<8xf32> to vector<1x8xf32>
    %229 = tpu.reciprocal %228 {approx = true} : vector<1x8xf32> -> vector<1x8xf32>
    %230 = vector.broadcast %229 : vector<1x8xf32> to vector<32x8xf32>
    %231 = arith.mulf %226, %230 : vector<32x8xf32>
    %cst_90 = arith.constant dense<0.000000e+00> : vector<32x64xf32>
    %232 = tpu.matmul %231, %213, %cst_90 {dimension_numbers = #tpu.dot_dimension_numbers<[1], [0], [0], [1], [0, 0, 1, 1], [], []>} : vector<32x8xf32>, vector<8x64xf32>, vector<32x64xf32> -> vector<32x64xf32>
    %233 = arith.mulf %232, %215 : vector<32x64xf32>
    %cst_91 = arith.constant dense<0.000000e+00> : vector<64xf32>
    %234 = vector.multi_reduction <add>, %233, %cst_91 [0] : vector<32x64xf32> to vector<64xf32>
    %235 = vector.shape_cast %234 : vector<64xf32> to vector<1x64xf32>
    %236 = vector.extract_strided_slice %182 {offsets = [32, 0], sizes = [32, 64], strides = [1, 1]} : vector<64x128xf32> to vector<32x64xf32>
    %237 = vector.extract_strided_slice %182 {offsets = [32, 64], sizes = [32, 64], strides = [1, 1]} : vector<64x128xf32> to vector<32x64xf32>
    %238 = vector.extract_strided_slice %211 {offsets = [1, 0], sizes = [1, 64], strides = [1, 1]} : vector<2x64xf32> to vector<1x64xf32>
    %239 = vector.broadcast %238 : vector<1x64xf32> to vector<32x64xf32>
    %240 = arith.mulf %236, %239 : vector<32x64xf32>
    %cst_92 = arith.constant dense<0.000000e+00> : vector<32x8xf32>
    %241 = tpu.matmul %240, %212, %cst_92 {dimension_numbers = #tpu.dot_dimension_numbers<[1], [0], [0], [1], [0, 0, 1, 1], [], []>} : vector<32x64xf32>, vector<64x8xf32>, vector<32x8xf32> -> vector<32x8xf32>
    %cst_93 = arith.constant 0.353553385 : f32
    %242 = vector.broadcast %cst_93 : f32 to vector<32x8xf32>
    %243 = arith.mulf %241, %242 : vector<32x8xf32>
    %cst_94 = arith.constant dense<0xFF800000> : vector<8xf32>
    %244 = vector.multi_reduction <maximumf>, %243, %cst_94 [0] : vector<32x8xf32> to vector<8xf32>
    %245 = vector.shape_cast %244 : vector<8xf32> to vector<1x8xf32>
    %246 = vector.broadcast %245 : vector<1x8xf32> to vector<32x8xf32>
    %247 = arith.subf %243, %246 : vector<32x8xf32>
    %248 = math.exp %247 : vector<32x8xf32>
    %cst_95 = arith.constant dense<0.000000e+00> : vector<8xf32>
    %249 = vector.multi_reduction <add>, %248, %cst_95 [0] : vector<32x8xf32> to vector<8xf32>
    %250 = vector.shape_cast %249 : vector<8xf32> to vector<1x8xf32>
    %251 = tpu.reciprocal %250 {approx = true} : vector<1x8xf32> -> vector<1x8xf32>
    %252 = vector.broadcast %251 : vector<1x8xf32> to vector<32x8xf32>
    %253 = arith.mulf %248, %252 : vector<32x8xf32>
    %cst_96 = arith.constant dense<0.000000e+00> : vector<32x64xf32>
    %254 = tpu.matmul %253, %213, %cst_96 {dimension_numbers = #tpu.dot_dimension_numbers<[1], [0], [0], [1], [0, 0, 1, 1], [], []>} : vector<32x8xf32>, vector<8x64xf32>, vector<32x64xf32> -> vector<32x64xf32>
    %255 = arith.mulf %254, %237 : vector<32x64xf32>
    %cst_97 = arith.constant dense<0.000000e+00> : vector<64xf32>
    %256 = vector.multi_reduction <add>, %255, %cst_97 [0] : vector<32x64xf32> to vector<64xf32>
    %257 = vector.shape_cast %256 : vector<64xf32> to vector<1x64xf32>
    %258 = tpu.concatenate %235, %257 in 1 : vector<1x64xf32>, vector<1x64xf32> -> vector<1x128xf32>
    %c0_98 = arith.constant 0 : index
    %c0_99 = arith.constant 0 : index
    %259 = vector.load %arg19[%c0_98, %c0_99] : memref<128x128xf32, #tpu.memory_space<vmem>>, vector<128x128xf32>
    %cst_100 = arith.constant dense<0.000000e+00> : vector<1x128xf32>
    %260 = tpu.matmul %258, %259, %cst_100 {dimension_numbers = #tpu.dot_dimension_numbers<[1], [0], [0], [1], [0, 0, 1, 1], [], []>} : vector<1x128xf32>, vector<128x128xf32>, vector<1x128xf32> -> vector<1x128xf32>
    %c0_101 = arith.constant 0 : index
    %c0_102 = arith.constant 0 : index
    %261 = vector.load %arg20[%c0_101, %c0_102] : memref<1x128xf32, #tpu.memory_space<vmem>>, vector<1x128xf32>
    %262 = arith.addf %260, %261 : vector<1x128xf32>
    %263 = vector.extract_strided_slice %156 {offsets = [0, 0], sizes = [32, 64], strides = [1, 1]} : vector<64x64xf32> to vector<32x64xf32>
    %264 = vector.extract_strided_slice %262 {offsets = [0, 0], sizes = [1, 64], strides = [1, 1]} : vector<1x128xf32> to vector<1x64xf32>
    %265 = vector.broadcast %264 : vector<1x64xf32> to vector<32x64xf32>
    %266 = arith.mulf %263, %265 : vector<32x64xf32>
    %267 = vector.extract_strided_slice %156 {offsets = [32, 0], sizes = [32, 64], strides = [1, 1]} : vector<64x64xf32> to vector<32x64xf32>
    %268 = vector.extract_strided_slice %262 {offsets = [0, 64], sizes = [1, 64], strides = [1, 1]} : vector<1x128xf32> to vector<1x64xf32>
    %269 = vector.broadcast %268 : vector<1x64xf32> to vector<32x64xf32>
    %270 = arith.mulf %267, %269 : vector<32x64xf32>
    %271 = tpu.concatenate %266, %270 in 1 : vector<32x64xf32>, vector<32x64xf32> -> vector<32x128xf32>
    %c0_103 = arith.constant 0 : index
    %c0_104 = arith.constant 0 : index
    %272 = vector.load %arg24[%c0_103, %c0_104] : memref<32x128xf32, #tpu.memory_space<vmem>>, vector<32x128xf32>
    tpu.vector_store %arg24[%c0_103, %c0_104], %271 {strides = array<i32>} : memref<32x128xf32, #tpu.memory_space<vmem>>, vector<32x128xf32>,
    %cst_105 = arith.constant 0.000000e+00 : f32
    %273 = vector.broadcast %cst_105 : f32 to vector<4x128xf32>
    %c9_i32 = arith.constant 9 : i32
    %274 = tpu.dynamic_rotate %271 by %c9_i32 dim 1 : vector<32x128xf32>, i32 -> vector<32x128xf32>
    %c0_106 = arith.constant 0 : index
    %c0_107 = arith.constant 0 : index
    %c0_108 = arith.constant 0 : index
    %275 = vector.load %arg21[%c0_106, %c0_107, %c0_108] : memref<9x4x32xf32, #tpu.memory_space<vmem>>, vector<1x4x32xf32>
    %276 = vector.shape_cast %275 : vector<1x4x32xf32> to vector<4x32xf32>
    %c0_109 = arith.constant 0 : index
    %c0_110 = arith.constant 0 : index
    %c0_111 = arith.constant 0 : index
    %277 = vector.load %arg23[%c0_109, %c0_110, %c0_111] : memref<9x1x128xf32, #tpu.memory_space<vmem>>, vector<1x1x128xf32>
    %278 = vector.shape_cast %277 : vector<1x1x128xf32> to vector<1x128xf32>
    %279 = vector.broadcast %278 : vector<1x128xf32> to vector<32x128xf32>
    %280 = arith.mulf %274, %279 : vector<32x128xf32>
    %cst_112 = arith.constant dense<0.000000e+00> : vector<4x128xf32>
    %281 = tpu.matmul %276, %280, %cst_112 {dimension_numbers = #tpu.dot_dimension_numbers<[1], [0], [0], [1], [0, 0, 1, 1], [], []>} : vector<4x32xf32>, vector<32x128xf32>, vector<4x128xf32> -> vector<4x128xf32>
    %282 = arith.addf %273, %281 : vector<4x128xf32>
    %c8_i32 = arith.constant 8 : i32
    %283 = tpu.dynamic_rotate %271 by %c8_i32 dim 1 : vector<32x128xf32>, i32 -> vector<32x128xf32>
    %c1 = arith.constant 1 : index
    %c0_113 = arith.constant 0 : index
    %c0_114 = arith.constant 0 : index
    %284 = vector.load %arg21[%c1, %c0_113, %c0_114] : memref<9x4x32xf32, #tpu.memory_space<vmem>>, vector<1x4x32xf32>
    %285 = vector.shape_cast %284 : vector<1x4x32xf32> to vector<4x32xf32>
    %c1_115 = arith.constant 1 : index
    %c0_116 = arith.constant 0 : index
    %c0_117 = arith.constant 0 : index
    %286 = vector.load %arg23[%c1_115, %c0_116, %c0_117] : memref<9x1x128xf32, #tpu.memory_space<vmem>>, vector<1x1x128xf32>
    %287 = vector.shape_cast %286 : vector<1x1x128xf32> to vector<1x128xf32>
    %288 = vector.broadcast %287 : vector<1x128xf32> to vector<32x128xf32>
    %289 = arith.mulf %283, %288 : vector<32x128xf32>
    %cst_118 = arith.constant dense<0.000000e+00> : vector<4x128xf32>
    %290 = tpu.matmul %285, %289, %cst_118 {dimension_numbers = #tpu.dot_dimension_numbers<[1], [0], [0], [1], [0, 0, 1, 1], [], []>} : vector<4x32xf32>, vector<32x128xf32>, vector<4x128xf32> -> vector<4x128xf32>
    %291 = arith.addf %282, %290 : vector<4x128xf32>
    %c7_i32 = arith.constant 7 : i32
    %292 = tpu.dynamic_rotate %271 by %c7_i32 dim 1 : vector<32x128xf32>, i32 -> vector<32x128xf32>
    %c2 = arith.constant 2 : index
    %c0_119 = arith.constant 0 : index
    %c0_120 = arith.constant 0 : index
    %293 = vector.load %arg21[%c2, %c0_119, %c0_120] : memref<9x4x32xf32, #tpu.memory_space<vmem>>, vector<1x4x32xf32>
    %294 = vector.shape_cast %293 : vector<1x4x32xf32> to vector<4x32xf32>
    %c2_121 = arith.constant 2 : index
    %c0_122 = arith.constant 0 : index
    %c0_123 = arith.constant 0 : index
    %295 = vector.load %arg23[%c2_121, %c0_122, %c0_123] : memref<9x1x128xf32, #tpu.memory_space<vmem>>, vector<1x1x128xf32>
    %296 = vector.shape_cast %295 : vector<1x1x128xf32> to vector<1x128xf32>
    %297 = vector.broadcast %296 : vector<1x128xf32> to vector<32x128xf32>
    %298 = arith.mulf %292, %297 : vector<32x128xf32>
    %cst_124 = arith.constant dense<0.000000e+00> : vector<4x128xf32>
    %299 = tpu.matmul %294, %298, %cst_124 {dimension_numbers = #tpu.dot_dimension_numbers<[1], [0], [0], [1], [0, 0, 1, 1], [], []>} : vector<4x32xf32>, vector<32x128xf32>, vector<4x128xf32> -> vector<4x128xf32>
    %300 = arith.addf %291, %299 : vector<4x128xf32>
    %c1_i32 = arith.constant 1 : i32
    %301 = tpu.dynamic_rotate %271 by %c1_i32 dim 1 : vector<32x128xf32>, i32 -> vector<32x128xf32>
    %c3 = arith.constant 3 : index
    %c0_125 = arith.constant 0 : index
    %c0_126 = arith.constant 0 : index
    %302 = vector.load %arg21[%c3, %c0_125, %c0_126] : memref<9x4x32xf32, #tpu.memory_space<vmem>>, vector<1x4x32xf32>
    %303 = vector.shape_cast %302 : vector<1x4x32xf32> to vector<4x32xf32>
    %c3_127 = arith.constant 3 : index
    %c0_128 = arith.constant 0 : index
    %c0_129 = arith.constant 0 : index
    %304 = vector.load %arg23[%c3_127, %c0_128, %c0_129] : memref<9x1x128xf32, #tpu.memory_space<vmem>>, vector<1x1x128xf32>
    %305 = vector.shape_cast %304 : vector<1x1x128xf32> to vector<1x128xf32>
    %306 = vector.broadcast %305 : vector<1x128xf32> to vector<32x128xf32>
    %307 = arith.mulf %301, %306 : vector<32x128xf32>
    %cst_130 = arith.constant dense<0.000000e+00> : vector<4x128xf32>
    %308 = tpu.matmul %303, %307, %cst_130 {dimension_numbers = #tpu.dot_dimension_numbers<[1], [0], [0], [1], [0, 0, 1, 1], [], []>} : vector<4x32xf32>, vector<32x128xf32>, vector<4x128xf32> -> vector<4x128xf32>
    %309 = arith.addf %300, %308 : vector<4x128xf32>
    %c4 = arith.constant 4 : index
    %c0_131 = arith.constant 0 : index
    %c0_132 = arith.constant 0 : index
    %310 = vector.load %arg21[%c4, %c0_131, %c0_132] : memref<9x4x32xf32, #tpu.memory_space<vmem>>, vector<1x4x32xf32>
    %311 = vector.shape_cast %310 : vector<1x4x32xf32> to vector<4x32xf32>
    %c4_133 = arith.constant 4 : index
    %c0_134 = arith.constant 0 : index
    %c0_135 = arith.constant 0 : index
    %312 = vector.load %arg23[%c4_133, %c0_134, %c0_135] : memref<9x1x128xf32, #tpu.memory_space<vmem>>, vector<1x1x128xf32>
    %313 = vector.shape_cast %312 : vector<1x1x128xf32> to vector<1x128xf32>
    %314 = vector.broadcast %313 : vector<1x128xf32> to vector<32x128xf32>
    %315 = arith.mulf %271, %314 : vector<32x128xf32>
    %cst_136 = arith.constant dense<0.000000e+00> : vector<4x128xf32>
    %316 = tpu.matmul %311, %315, %cst_136 {dimension_numbers = #tpu.dot_dimension_numbers<[1], [0], [0], [1], [0, 0, 1, 1], [], []>} : vector<4x32xf32>, vector<32x128xf32>, vector<4x128xf32> -> vector<4x128xf32>
    %317 = arith.addf %309, %316 : vector<4x128xf32>
    %c127_i32 = arith.constant 127 : i32
    %318 = tpu.dynamic_rotate %271 by %c127_i32 dim 1 : vector<32x128xf32>, i32 -> vector<32x128xf32>
    %c5 = arith.constant 5 : index
    %c0_137 = arith.constant 0 : index
    %c0_138 = arith.constant 0 : index
    %319 = vector.load %arg21[%c5, %c0_137, %c0_138] : memref<9x4x32xf32, #tpu.memory_space<vmem>>, vector<1x4x32xf32>
    %320 = vector.shape_cast %319 : vector<1x4x32xf32> to vector<4x32xf32>
    %c5_139 = arith.constant 5 : index
    %c0_140 = arith.constant 0 : index
    %c0_141 = arith.constant 0 : index
    %321 = vector.load %arg23[%c5_139, %c0_140, %c0_141] : memref<9x1x128xf32, #tpu.memory_space<vmem>>, vector<1x1x128xf32>
    %322 = vector.shape_cast %321 : vector<1x1x128xf32> to vector<1x128xf32>
    %323 = vector.broadcast %322 : vector<1x128xf32> to vector<32x128xf32>
    %324 = arith.mulf %318, %323 : vector<32x128xf32>
    %cst_142 = arith.constant dense<0.000000e+00> : vector<4x128xf32>
    %325 = tpu.matmul %320, %324, %cst_142 {dimension_numbers = #tpu.dot_dimension_numbers<[1], [0], [0], [1], [0, 0, 1, 1], [], []>} : vector<4x32xf32>, vector<32x128xf32>, vector<4x128xf32> -> vector<4x128xf32>
    %326 = arith.addf %317, %325 : vector<4x128xf32>
    %c121_i32 = arith.constant 121 : i32
    %327 = tpu.dynamic_rotate %271 by %c121_i32 dim 1 : vector<32x128xf32>, i32 -> vector<32x128xf32>
    %c6 = arith.constant 6 : index
    %c0_143 = arith.constant 0 : index
    %c0_144 = arith.constant 0 : index
    %328 = vector.load %arg21[%c6, %c0_143, %c0_144] : memref<9x4x32xf32, #tpu.memory_space<vmem>>, vector<1x4x32xf32>
    %329 = vector.shape_cast %328 : vector<1x4x32xf32> to vector<4x32xf32>
    %c6_145 = arith.constant 6 : index
    %c0_146 = arith.constant 0 : index
    %c0_147 = arith.constant 0 : index
    %330 = vector.load %arg23[%c6_145, %c0_146, %c0_147] : memref<9x1x128xf32, #tpu.memory_space<vmem>>, vector<1x1x128xf32>
    %331 = vector.shape_cast %330 : vector<1x1x128xf32> to vector<1x128xf32>
    %332 = vector.broadcast %331 : vector<1x128xf32> to vector<32x128xf32>
    %333 = arith.mulf %327, %332 : vector<32x128xf32>
    %cst_148 = arith.constant dense<0.000000e+00> : vector<4x128xf32>
    %334 = tpu.matmul %329, %333, %cst_148 {dimension_numbers = #tpu.dot_dimension_numbers<[1], [0], [0], [1], [0, 0, 1, 1], [], []>} : vector<4x32xf32>, vector<32x128xf32>, vector<4x128xf32> -> vector<4x128xf32>
    %335 = arith.addf %326, %334 : vector<4x128xf32>
    %c120_i32 = arith.constant 120 : i32
    %336 = tpu.dynamic_rotate %271 by %c120_i32 dim 1 : vector<32x128xf32>, i32 -> vector<32x128xf32>
    %c7 = arith.constant 7 : index
    %c0_149 = arith.constant 0 : index
    %c0_150 = arith.constant 0 : index
    %337 = vector.load %arg21[%c7, %c0_149, %c0_150] : memref<9x4x32xf32, #tpu.memory_space<vmem>>, vector<1x4x32xf32>
    %338 = vector.shape_cast %337 : vector<1x4x32xf32> to vector<4x32xf32>
    %c7_151 = arith.constant 7 : index
    %c0_152 = arith.constant 0 : index
    %c0_153 = arith.constant 0 : index
    %339 = vector.load %arg23[%c7_151, %c0_152, %c0_153] : memref<9x1x128xf32, #tpu.memory_space<vmem>>, vector<1x1x128xf32>
    %340 = vector.shape_cast %339 : vector<1x1x128xf32> to vector<1x128xf32>
    %341 = vector.broadcast %340 : vector<1x128xf32> to vector<32x128xf32>
    %342 = arith.mulf %336, %341 : vector<32x128xf32>
    %cst_154 = arith.constant dense<0.000000e+00> : vector<4x128xf32>
    %343 = tpu.matmul %338, %342, %cst_154 {dimension_numbers = #tpu.dot_dimension_numbers<[1], [0], [0], [1], [0, 0, 1, 1], [], []>} : vector<4x32xf32>, vector<32x128xf32>, vector<4x128xf32> -> vector<4x128xf32>
    %344 = arith.addf %335, %343 : vector<4x128xf32>
    %c119_i32 = arith.constant 119 : i32
    %345 = tpu.dynamic_rotate %271 by %c119_i32 dim 1 : vector<32x128xf32>, i32 -> vector<32x128xf32>
    %c8 = arith.constant 8 : index
    %c0_155 = arith.constant 0 : index
    %c0_156 = arith.constant 0 : index
    %346 = vector.load %arg21[%c8, %c0_155, %c0_156] : memref<9x4x32xf32, #tpu.memory_space<vmem>>, vector<1x4x32xf32>
    %347 = vector.shape_cast %346 : vector<1x4x32xf32> to vector<4x32xf32>
    %c8_157 = arith.constant 8 : index
    %c0_158 = arith.constant 0 : index
    %c0_159 = arith.constant 0 : index
    %348 = vector.load %arg23[%c8_157, %c0_158, %c0_159] : memref<9x1x128xf32, #tpu.memory_space<vmem>>, vector<1x1x128xf32>
    %349 = vector.shape_cast %348 : vector<1x1x128xf32> to vector<1x128xf32>
    %350 = vector.broadcast %349 : vector<1x128xf32> to vector<32x128xf32>
    %351 = arith.mulf %345, %350 : vector<32x128xf32>
    %cst_160 = arith.constant dense<0.000000e+00> : vector<4x128xf32>
    %352 = tpu.matmul %347, %351, %cst_160 {dimension_numbers = #tpu.dot_dimension_numbers<[1], [0], [0], [1], [0, 0, 1, 1], [], []>} : vector<4x32xf32>, vector<32x128xf32>, vector<4x128xf32> -> vector<4x128xf32>
    %353 = arith.addf %344, %352 : vector<4x128xf32>
    %c0_161 = arith.constant 0 : index
    %c0_162 = arith.constant 0 : index
    %354 = vector.load %arg22[%c0_161, %c0_162] : memref<4x1xf32, #tpu.memory_space<vmem>>, vector<4x1xf32>
    %355 = vector.broadcast %354 : vector<4x1xf32> to vector<4x128xf32>
    %356 = arith.addf %353, %355 : vector<4x128xf32>
    %cst_163 = arith.constant 0.000000e+00 : f32
    %357 = vector.broadcast %cst_163 : f32 to vector<4x128xf32>
    %358 = arith.maximumf %356, %357 : vector<4x128xf32>
    %c0_164 = arith.constant 0 : index
    %c0_165 = arith.constant 0 : index
    %359 = vector.load %arg25[%c0_164, %c0_165] : memref<4x128xf32, #tpu.memory_space<vmem>>, vector<4x128xf32>
    tpu.vector_store %arg25[%c0_164, %c0_165], %358 {strides = array<i32>} : memref<4x128xf32, #tpu.memory_space<vmem>>, vector<4x128xf32>,
    return
  }
  func.func @transform_0(%arg0: i32) -> (i32, i32) {
    %c0_i32 = arith.constant 0 : i32
    %c0_i32_0 = arith.constant 0 : i32
    %c0_i32_1 = arith.constant 0 : i32
    return %c0_i32, %c0_i32_0 : i32, i32
  }
  func.func @transform_1(%arg0: i32) -> (i32, i32) {
    %c0_i32 = arith.constant 0 : i32
    %c0_i32_0 = arith.constant 0 : i32
    %c0_i32_1 = arith.constant 0 : i32
    return %c0_i32, %c0_i32_0 : i32, i32
  }
  func.func @transform_2(%arg0: i32) -> (i32, i32) {
    %c0_i32 = arith.constant 0 : i32
    %c0_i32_0 = arith.constant 0 : i32
    %c0_i32_1 = arith.constant 0 : i32
    return %c0_i32, %c0_i32_0 : i32, i32
  }
  func.func @transform_3(%arg0: i32) -> (i32, i32) {
    %c0_i32 = arith.constant 0 : i32
    %c0_i32_0 = arith.constant 0 : i32
    %c0_i32_1 = arith.constant 0 : i32
    return %c0_i32, %c0_i32_0 : i32, i32
  }
  func.func @transform_4(%arg0: i32) -> (i32, i32) {
    %c0_i32 = arith.constant 0 : i32
    %c0_i32_0 = arith.constant 0 : i32
    %c0_i32_1 = arith.constant 0 : i32
    return %c0_i32, %c0_i32_0 : i32, i32
  }
  func.func @transform_5(%arg0: i32) -> (i32, i32) {
    %c0_i32 = arith.constant 0 : i32
    %c0_i32_0 = arith.constant 0 : i32
    %c0_i32_1 = arith.constant 0 : i32
    return %c0_i32, %c0_i32_0 : i32, i32
  }
  func.func @transform_6(%arg0: i32) -> (i32, i32) {
    %c0_i32 = arith.constant 0 : i32
    %c0_i32_0 = arith.constant 0 : i32
    %c0_i32_1 = arith.constant 0 : i32
    return %c0_i32, %c0_i32_0 : i32, i32
  }
  func.func @transform_7(%arg0: i32) -> (i32, i32) {
    %c0_i32 = arith.constant 0 : i32
    %c0_i32_0 = arith.constant 0 : i32
    %c0_i32_1 = arith.constant 0 : i32
    return %c0_i32, %c0_i32_0 : i32, i32
  }
  func.func @transform_8(%arg0: i32) -> (i32, i32) {
    %c0_i32 = arith.constant 0 : i32
    %c0_i32_0 = arith.constant 0 : i32
    %c0_i32_1 = arith.constant 0 : i32
    return %c0_i32, %c0_i32_0 : i32, i32
  }
  func.func @transform_9(%arg0: i32) -> (i32, i32) {
    %c0_i32 = arith.constant 0 : i32
    %c0_i32_0 = arith.constant 0 : i32
    %c0_i32_1 = arith.constant 0 : i32
    return %c0_i32, %c0_i32_0 : i32, i32
  }
  func.func @transform_10(%arg0: i32) -> (i32, i32) {
    %c0_i32 = arith.constant 0 : i32
    %c0_i32_0 = arith.constant 0 : i32
    %c0_i32_1 = arith.constant 0 : i32
    return %c0_i32, %c0_i32_0 : i32, i32
  }
  func.func @transform_11(%arg0: i32) -> (i32, i32) {
    %c0_i32 = arith.constant 0 : i32
    %c0_i32_0 = arith.constant 0 : i32
    %c0_i32_1 = arith.constant 0 : i32
    return %c0_i32, %c0_i32_0 : i32, i32
  }
  func.func @transform_12(%arg0: i32) -> (i32, i32) {
    %c0_i32 = arith.constant 0 : i32
    %c0_i32_0 = arith.constant 0 : i32
    %c0_i32_1 = arith.constant 0 : i32
    return %c0_i32, %c0_i32_0 : i32, i32
  }
  func.func @transform_13(%arg0: i32) -> (i32, i32) {
    %c0_i32 = arith.constant 0 : i32
    %c0_i32_0 = arith.constant 0 : i32
    %c0_i32_1 = arith.constant 0 : i32
    return %c0_i32, %c0_i32_0 : i32, i32
  }
  func.func @transform_14(%arg0: i32) -> (i32, i32) {
    %c0_i32 = arith.constant 0 : i32
    %c0_i32_0 = arith.constant 0 : i32
    %c0_i32_1 = arith.constant 0 : i32
    return %c0_i32, %c0_i32_0 : i32, i32
  }
  func.func @transform_15(%arg0: i32) -> (i32, i32) {
    %c0_i32 = arith.constant 0 : i32
    %c0_i32_0 = arith.constant 0 : i32
    %c0_i32_1 = arith.constant 0 : i32
    return %c0_i32, %c0_i32_0 : i32, i32
  }
  func.func @transform_16(%arg0: i32) -> (i32, i32) {
    %c0_i32 = arith.constant 0 : i32
    %c0_i32_0 = arith.constant 0 : i32
    %c0_i32_1 = arith.constant 0 : i32
    return %c0_i32, %c0_i32_0 : i32, i32
  }
  func.func @transform_17(%arg0: i32) -> (i32, i32) {
    %c0_i32 = arith.constant 0 : i32
    %c0_i32_0 = arith.constant 0 : i32
    %c0_i32_1 = arith.constant 0 : i32
    return %c0_i32, %c0_i32_0 : i32, i32
  }
  func.func @transform_18(%arg0: i32) -> (i32, i32) {
    %c0_i32 = arith.constant 0 : i32
    %c0_i32_0 = arith.constant 0 : i32
    %c0_i32_1 = arith.constant 0 : i32
    return %c0_i32, %c0_i32_0 : i32, i32
  }
  func.func @transform_19(%arg0: i32) -> (i32, i32) {
    %c0_i32 = arith.constant 0 : i32
    %c0_i32_0 = arith.constant 0 : i32
    %c0_i32_1 = arith.constant 0 : i32
    return %c0_i32, %c0_i32_0 : i32, i32
  }
  func.func @transform_20(%arg0: i32) -> (i32, i32, i32) {
    %c0_i32 = arith.constant 0 : i32
    %c0_i32_0 = arith.constant 0 : i32
    %c0_i32_1 = arith.constant 0 : i32
    %c0_i32_2 = arith.constant 0 : i32
    return %c0_i32, %c0_i32_0, %c0_i32_1 : i32, i32, i32
  }
  func.func @transform_21(%arg0: i32) -> (i32, i32) {
    %c0_i32 = arith.constant 0 : i32
    %c0_i32_0 = arith.constant 0 : i32
    %c0_i32_1 = arith.constant 0 : i32
    return %c0_i32, %c0_i32_0 : i32, i32
  }
  func.func @transform_22(%arg0: i32) -> (i32, i32, i32) {
    %c0_i32 = arith.constant 0 : i32
    %c0_i32_0 = arith.constant 0 : i32
    %c0_i32_1 = arith.constant 0 : i32
    %c0_i32_2 = arith.constant 0 : i32
    return %c0_i32, %c0_i32_0, %c0_i32_1 : i32, i32, i32
  }
  func.func @transform_23(%arg0: i32) -> (i32, i32) {
    %c0_i32 = arith.constant 0 : i32
    %c0_i32_0 = arith.constant 0 : i32
    %c0_i32_1 = arith.constant 0 : i32
    return %c0_i32, %c0_i32_0 : i32, i32
  }
  func.func @transform_24(%arg0: i32) -> (i32, i32) {
    %c0_i32 = arith.constant 0 : i32
    %c0_i32_0 = arith.constant 0 : i32
    %c0_i32_1 = arith.constant 0 : i32
    return %c0_i32, %c0_i32_0 : i32, i32
  }
}

</mosaic_0001>

<bundles_post_ra>
// kernel: trans_se_block.1
= control target key start
LH: loop header
LB: loop body
LE: loop exit
PB: predicated region body
PF: predicated region fallthrough
CT: control target
= control target key end

     0   :  { %vm101_vm0 = vcmask 523264   ;;  %v4025_v3 = vmov 0   ;;  %vm401_vm1 = vcmask 261120   ;;  %vm388_vm2 = vcmask 7168   ;;  %s4033_s29 = smov 7   ;;  %s5182_s1 = inlined_call_operand.vmem [shape: f32[64,64], index: 1, kind: input, shape index: {}]   ;;  %s5183_s2 = inlined_call_operand.vmem [shape: f32[32,1], index: 2, kind: input, shape index: {}]   ;;  %s5184_s3 = inlined_call_operand.vmem [shape: f32[32,1], index: 3, kind: input, shape index: {}]   ;;  %s5185_s4 = inlined_call_operand.vmem [shape: f32[32,32], index: 4, kind: input, shape index: {}]   ;;  %s5186_s5 = inlined_call_operand.vmem [shape: f32[64,32], index: 5, kind: input, shape index: {}]   ;;  %s5187_s6 = inlined_call_operand.vmem [shape: f32[8,32], index: 6, kind: input, shape index: {}]   ;;  %s5188_s7 = inlined_call_operand.vmem [shape: f32[32,8], index: 7, kind: input, shape index: {}]   ;;  %s5189_s8 = inlined_call_operand.vmem [shape: f32[64,64], index: 8, kind: input, shape index: {}]   ;;  %s5190_s0 = inlined_call_operand.vmem [shape: f32[64,64], index: 0, kind: input, shape index: {}]   ;;  %s5191_s10 = inlined_call_operand.vmem [shape: f32[2,64], index: 10, kind: input, shape index: {}]   ;;  %s5192_s9 = inlined_call_operand.vmem [shape: f32[64,1], index: 9, kind: input, shape index: {}]   ;;  %s5193_s11 = inlined_call_operand.<no memory space> [shape: f32[1,1], index: 11, kind: input, shape index: {}]   ;;  %s5194_s15 = inlined_call_operand.vmem [shape: f32[64,128], index: 15, kind: input, shape index: {}]   ;;  %s5195_s12 = inlined_call_operand.vmem [shape: f32[1,64], index: 12, kind: input, shape index: {}]   ;;  %s5196_s13 = inlined_call_operand.vmem [shape: f32[1,64], index: 13, kind: input, shape index: {}]   ;;  %s5197_s14 = inlined_call_operand.vmem [shape: f32[64,64], index: 14, kind: input, shape index: {}]   ;;  %s5198_s16 = inlined_call_operand.vmem [shape: f32[64,8], index: 16, kind: input, shape index: {}]   ;;  %s5199_s17 = inlined_call_operand.vmem [shape: f32[8,64], index: 17, kind: input, shape index: {}]   ;;  %s5200_s18 = inlined_call_operand.vmem [shape: f32[128,128], index: 18, kind: input, shape index: {}]   ;;  %s5201_s19 = inlined_call_operand.vmem [shape: f32[1,128], index: 19, kind: input, shape index: {}]   ;;  %s5202_s22 = inlined_call_operand.vmem [shape: f32[9,1,128], index: 22, kind: input, shape index: {}]   ;;  %s5203_s23 = inlined_call_operand.vmem [shape: f32[32,128], index: 23, kind: output, shape index: {0}]   ;;  %s5204_s20 = inlined_call_operand.vmem [shape: f32[9,4,32], index: 20, kind: input, shape index: {}]   ;;  %s5205_s21 = inlined_call_operand.vmem [shape: f32[4,1], index: 21, kind: input, shape index: {}]   ;;  %s5206_s24 = inlined_call_operand.vmem [shape: f32[4,128], index: 24, kind: output, shape index: {1}]  }
   0x1   :  { %5215 = sst [smem:[#allocation3_spill]] %s5182_s1  ;;  %3958 = vset.pattern.permute.xlu1 %v4025_v3  ;;  %3957 = vset.pattern.permute.xlu0 %v4025_v3  ;;  %vm4030_vm3 = vmmov 0   ;;  %vm746_vm4 = vcmask 64512   ;;  %vm1635_vm5 = vcmask 517120   ;;  %s4034_s1 = smov 127  }
   0x2   :  { %5216 = sst [smem:[#allocation4_spill]] %s5183_s2 }
   0x3   :  { %5217 = sst [smem:[#allocation5_spill]] %s5184_s3 }
   0x4   :  { %5218 = sst [smem:[#allocation6_spill]] %s5185_s4  ;;  %s4027_s4 = smov 64  }
   0x5   :  { %5219 = sst [smem:[#allocation7_spill]] %s5186_s5 }
   0x6   :  { %5220 = sst [smem:[#allocation8_spill]] %s5187_s6  ;;  %s4031_s6 = smov 8  }
   0x7   :  { %5221 = sst [smem:[#allocation9_spill]] %s5188_s7 }
   0x8   :  { %5222 = sst [smem:[#allocation10_spill]] %s5189_s8 }
   0x9   :  { %5223 = sst [smem:[#allocation11_spill]] %s5190_s0  ;;  %s4026_s0 = smov 1  }
   0xa   :  { %s5224_s27 = sld [smem:[#allocation3_spill]] }
   0xb   :  { %s5225_s3 = sld [smem:[#allocation4_spill]] }
   0xc   :  { %s5226_s8 = sld [smem:[#allocation5_spill]] }
   0xd   :  { %s5227_s30 = sld [smem:[#allocation6_spill]] }
   0xe   :  { %s5228_s2 = sld [smem:[#allocation7_spill]] }
   0xf   :  { %s5229_s5 = sld [smem:[#allocation8_spill]] }
  0x10   :  { %v89_v0 = vld [vmem:[%s5224_s27 + $0x20] sm:$0xff]  ;;  %v91_v1 = vld [vmem:[%s5224_s27 + $0x30] sm:$0xff]  ;;  %v90_v2 = vld [vmem:[%s5224_s27 + $0x28] sm:$0xff]  ;;  %s5230_s28 = sld [smem:[#allocation9_spill]] }
  0x11   :  { %v248_v4 = vsel %vm101_vm0, %v89_v0, 0.0  ;;  %v251_v5 = vsel %vm101_vm0, %v91_v1, 0.0  ;;  %v249_v6 = vsel %vm101_vm0, %v90_v2, 0.0  ;;  %v92_v7 = vld [vmem:[%s5224_s27 + $0x38] sm:$0xff]  ;;  %v4183_v8 = vld [vmem:[%s5224_s27 + $0x8] sm:$0xff]  ;;  %v4188_v10 = vld [vmem:[%s5224_s27] sm:$0xff] }
  0x12   :  { %298 = vadd.xlane.f32.xlu0 %v248_v4  ;;  %302 = vadd.xlane.f32.xlu1 %v251_v5  ;;  %v250_v9 = vadd.f32 %v249_v6, %v248_v4  ;;  %v4193_v11 = vld [vmem:[%s5224_s27 + $0x10] sm:$0xff]  ;;  %v253_v12 = vsel %vm101_vm0, %v92_v7, 0.0  ;;  %v103_v13 = vsel %vm101_vm0, %v4183_v8, 0.0  ;;  %v102_v14 = vsel %vm101_vm0, %v4188_v10, 0.0  ;;  %v4203_v16 = vld [vmem:[%s5224_s27 + $0x18] sm:$0xff]  ;;  %v4231_v26 = vld [vmem:[%s5225_s3 + $0x8] sm:$0xff] }
  0x13   :  { %v104_v17 = vadd.f32 %v103_v13, %v102_v14  ;;  %v105_v18 = vsel %vm101_vm0, %v4193_v11, 0.0  ;;  %v107_v21 = vsel %vm101_vm0, %v4203_v16, 0.0  ;;  %v4214_v23 = vld [vmem:[%s5225_s3 + $0x10] sm:$0xff]  ;;  %v4220_v24 = vld [vmem:[%s5226_s8 + $0x18] sm:$0xff]  ;;  %v4237_v27 = vld [vmem:[%s5226_s8] sm:$0xff] }
  0x14   :  { %v252_v15 = vadd.f32 %v251_v5, %v250_v9  ;;  %v4225_v25 = vld [vmem:[%s5225_s3 + $0x18] sm:$0xff]  ;;  %v4243_v28 = vld [vmem:[%s5226_s8 + $0x10] sm:$0xff]  ;;  %v4250_v29 = vld [vmem:[%s5225_s3] sm:$0xff]  ;;  %s5232_s3 = sld [smem:[#allocation11_spill]] }
  0x15   :  { %v106_v20 = vadd.f32 %v105_v18, %v104_v17  ;;  %v4256_v30 = vld [vmem:[%s5226_s8 + $0x8] sm:$0xff] }
  0x16   :  { %300 = vadd.xlane.f32.xlu0 %v249_v6  ;;  %304 = vadd.xlane.f32.xlu1 %v253_v12  ;;  %v254_v19 = vadd.f32 %v253_v12, %v252_v15 }
  0x17   :  { %v4209_v22 = vadd.f32 %v107_v21, %v106_v20 }
  0x18   :  { %v255_v31 = vrot.slane %v254_v19, 4 }
  0x1a   :  { %195 = vadd.xlane.f32.xlu1 %v103_v13  ;;  %193 = vadd.xlane.f32.xlu0 %v102_v14  ;;  %v256_v32 = vadd.f32 %v255_v31, %v254_v19 }
  0x1c   :  { %v257_v33 = vrot.slane %v256_v32, 2 }
  0x1e   :  { %199 = vadd.xlane.f32.xlu1 %v107_v21  ;;  %197 = vadd.xlane.f32.xlu0 %v105_v18  ;;  %v258_v34 = vadd.f32 %v257_v33, %v256_v32 }
  0x20   :  { %v259_v35 = vrot.slane %v258_v34, 1 }
  0x22   :  { %v260_v36 = vadd.f32 %v259_v35, %v258_v34 }
  0x24   :  { %v261_v37 = vmul.f32 0.03125, %v260_v36 }
  0x26   :  { %v4259_v38 = vsub.f32 %v89_v0, %v261_v37  ;;  %v4261_v39 = vsub.f32 %v90_v2, %v261_v37  ;;  %v4263_v40 = vsub.f32 %v91_v1, %v261_v37  ;;  %v4269_v45 = vsub.f32 %v92_v7, %v261_v37 }
  0x28   :  { %v266_v41 = vmul.f32 %v4259_v38, %v4259_v38  ;;  %v267_v42 = vmul.f32 %v4261_v39, %v4261_v39  ;;  %v268_v46 = vmul.f32 %v4263_v40, %v4263_v40  ;;  %v269_v54 = vmul.f32 %v4269_v45, %v4269_v45 }
  0x2a   :  { %v270_v47 = vsel %vm101_vm0, %v266_v41, 0.0  ;;  %v271_v48 = vsel %vm101_vm0, %v267_v42, 0.0  ;;  %v273_v55 = vsel %vm101_vm0, %v268_v46, 0.0  ;;  %v275_v61 = vsel %vm101_vm0, %v269_v54, 0.0 }
  0x2b   :  { %v272_v53 = vadd.f32 %v271_v48, %v270_v47 }
  0x2d   :  { %v274_v60 = vadd.f32 %v273_v55, %v272_v53 }
  0x2f   :  { %157 = vperm.xlu1 %3958, %v4214_v23   ;;  %v276_v0 = vadd.f32 %v275_v61, %v274_v60 }
  0x31   :  { %v277_v4 = vrot.slane %v276_v0, 4 }
  0x33   :  { %186 = vperm.xlu1 %3958, %v4220_v24   ;;  %v278_v7 = vadd.f32 %v277_v4, %v276_v0 }
  0x34   :  { %162 = vperm.xlu0 %3957, %v4225_v25  }
  0x35   :  { %v279_v13 = vrot.slane %v278_v7, 2 }
  0x37   :  { %152 = vperm.xlu1 %3958, %v4231_v26   ;;  %v280_v21 = vadd.f32 %v279_v13, %v278_v7 }
  0x38   :  { %171 = vperm.xlu0 %3957, %v4237_v27  }
  0x39   :  { %v281_v35 = vrot.slane %v280_v21, 1 }
  0x3b   :  { %181 = vperm.xlu1 %3958, %v4243_v28   ;;  %v282_v42 = vadd.f32 %v281_v35, %v280_v21 }
  0x3d   :  { %v283_v47 = vmul.f32 0.03125, %v282_v42 }
  0x3f   :  { %147 = vperm.xlu1 %3958, %v4250_v29  }
  0x43   :  { %176 = vperm.xlu1 %3958, %v4256_v30  }
  0x9b   :  { %v299_v43 = vpop.xlane.xlu0 %298  ;;  %v303_v44 = vpop.xlane.xlu1 %302 }
  0x9c   :  { %v306_v51 = vmul.f32 0.015625, %v299_v43  ;;  %v308_v56 = vmul.f32 0.015625, %v303_v44 }
  0x9f   :  { %v301_v49 = vpop.xlane.xlu0 %300  ;;  %v305_v50 = vpop.xlane.xlu1 %304 }
  0xa0   :  { %v307_v52 = vmul.f32 0.015625, %v301_v49  ;;  %v309_v58 = vmul.f32 0.015625, %v305_v50  ;;  %v284_v50 = vadd.f32 1e-05, %v283_v47 }
  0xa2   :  { %v310_v57 = vadd.f32 %v307_v52, %v306_v51  ;;  %3963 = vrsqrt.f32 %v284_v50 }
  0xa3   :  { %v196_v36 = vpop.xlane.xlu1 %195 }
  0xa4   :  { %v311_v59 = vadd.f32 %v310_v57, %v308_v56 }
  0xa6   :  { %v312_v62 = vadd.f32 %v311_v59, %v309_v58 }
  0xa7   :  { %v200_v44 = vpop.xlane.xlu1 %199 }
  0xa8   :  { %v313_v63 = vrot.slane %v312_v62, 4  ;;  %v205_v35 = vmul.f32 0.015625, %v200_v44  ;;  %v393_v44 = vld [vmem:[%s5228_s2] sm:$0xff] }
  0xa9   :  { %3592 = vmatprep.mubr.msk.f32.mxu0 %vm401_vm1, %v393_v44 }
  0xaa   :  { %v314_v1 = vadd.f32 %v313_v63, %v312_v62 }
  0xac   :  { %v315_v2 = vrot.slane %v314_v1, 2 }
  0xae   :  { %v316_v5 = vadd.f32 %v315_v2, %v314_v1  ;;  %v203_v2 = vmul.f32 0.015625, %v196_v36 }
  0xb0   :  { %v317_v6 = vrot.slane %v316_v5, 1 }
  0xb2   :  { %v318_v9 = vadd.f32 %v317_v6, %v316_v5 }
  0xb4   :  { %v319_v12 = vmul.f32 0.03125, %v318_v9 }
  0xb6   :  { %v320_v14 = vsub.f32 %v306_v51, %v319_v12  ;;  %v321_v15 = vsub.f32 %v307_v52, %v319_v12  ;;  %v322_v17 = vsub.f32 %v308_v56, %v319_v12  ;;  %v323_v18 = vsub.f32 %v309_v58, %v319_v12  ;;  %v4279_v51 = vpop.permute.xlu1 %157  ;;  %v194_v56 = vpop.xlane.xlu0 %193 }
  0xb7   :  { %v3964_v58 = vpop.eup %3963  ;;  %v202_v4 = vmul.f32 0.015625, %v194_v56 }
  0xb8   :  { %v324_v19 = vmul.f32 %v320_v14, %v320_v14  ;;  %v325_v20 = vmul.f32 %v321_v15, %v321_v15  ;;  %v326_v31 = vmul.f32 %v322_v17, %v322_v17  ;;  %v327_v33 = vmul.f32 %v323_v18, %v323_v18 }
  0xb9   :  { %v288_v61 = vmul.f32 %v3964_v58, %v4263_v40  ;;  %v286_v12 = vmul.f32 %v3964_v58, %v4259_v38  ;;  %v289_v38 = vmul.f32 %v3964_v58, %v4269_v45 }
  0xba   :  { %v328_v32 = vadd.f32 %v325_v20, %v324_v19  ;;  %v4281_v55 = vpop.permute.xlu1 %186  ;;  %v198_v59 = vpop.xlane.xlu0 %197  ;;  %v531_v19 = vld [vmem:[%s5227_s30] sm:$0xff]  ;;  %v206_v20 = vadd.f32 %v203_v2, %v202_v4 }
  0xbb   :  { %v292_v6 = vmul.f32 %v288_v61, %v4279_v51  ;;  %v204_v21 = vmul.f32 0.015625, %v198_v59  ;;  %3612 = vmatprep.mubr.msk.f32.mxu1 %vm401_vm1, %v531_v19 }
  0xbc   :  { %v329_v34 = vadd.f32 %v328_v32, %v326_v31 }
  0xbd   :  { %v207_v36 = vadd.f32 %v206_v20, %v204_v21 }
  0xbe   :  { %v330_v37 = vadd.f32 %v329_v34, %v327_v33  ;;  %v4283_v57 = vpop.permute.xlu1 %152  ;;  %v4288_v5 = vpop.permute.xlu0 %162 }
  0xc0   :  { %v331_v41 = vrot.slane %v330_v37, 4 }
  0xc2   :  { %v332_v43 = vadd.f32 %v331_v41, %v330_v37  ;;  %v4285_v60 = vpop.permute.xlu1 %181  ;;  %v4307_v33 = vpop.permute.xlu0 %171  ;;  %v287_v37 = vmul.f32 %v3964_v58, %v4261_v39  ;;  %v293_v41 = vmul.f32 %v289_v38, %v4288_v5 }
  0xc3   :  { %v296_v31 = vadd.f32 %v292_v6, %v4285_v60 }
  0xc4   :  { %v333_v46 = vrot.slane %v332_v43, 2  ;;  %v297_v39 = vadd.f32 %v293_v41, %v4281_v55 }
  0xc6   :  { %v334_v48 = vadd.f32 %v333_v46, %v332_v43  ;;  %v4294_v13 = vpop.permute.xlu1 %147  ;;  %v208_v43 = vadd.f32 %v207_v36, %v205_v35  ;;  %v291_v46 = vmul.f32 %v287_v37, %v4283_v57 }
  0xc7   :  { %v290_v32 = vmul.f32 %v286_v12, %v4294_v13 }
  0xc8   :  { %v335_v49 = vrot.slane %v334_v48, 1 }
  0xc9   :  { %v294_v45 = vadd.f32 %v290_v32, %v4307_v33 }
  0xca   :  { %v336_v52 = vadd.f32 %v335_v49, %v334_v48  ;;  %v4325_v47 = vpop.permute.xlu1 %176  ;;  %v209_v48 = vrot.slane %v208_v43, 4 }
  0xcb   :  { %v295_v49 = vadd.f32 %v291_v46, %v4325_v47 }
  0xcc   :  { %v337_v53 = vmul.f32 0.03125, %v336_v52  ;;  %v210_v50 = vadd.f32 %v209_v48, %v208_v43  ;;  %v109_v52 = vrot.slane %v4209_v22, 4 }
  0xce   :  { %v338_v54 = vadd.f32 1e-05, %v337_v53  ;;  %v211_v53 = vrot.slane %v210_v50, 2 }
  0xd0   :  { %3965 = vrsqrt.f32 %v338_v54  ;;  %v110_v54 = vadd.f32 %v109_v52, %v4209_v22  ;;  %v212_v56 = vadd.f32 %v211_v53, %v210_v50 }
  0xd2   :  { %v111_v58 = vrot.slane %v110_v54, 2  ;;  %v213_v59 = vrot.slane %v212_v56, 1 }
  0xd4   :  { %v112_v61 = vadd.f32 %v111_v58, %v110_v54 }
  0xdd   :  { %v3966_v62 = vpop.eup %3965 }
  0xde   :  { %v343_v63 = vmul.f32 %v3966_v62, %v323_v18  ;;  %v340_v0 = vmul.f32 %v3966_v62, %v320_v14  ;;  %v342_v1 = vmul.f32 %v3966_v62, %v322_v17  ;;  %v341_v17 = vmul.f32 %v3966_v62, %v321_v15 }
  0xdf   :  { %v214_v62 = vadd.f32 %v213_v59, %v212_v56 }
  0xe0   :  { %v347_v7 = vmul.f32 %v343_v63, %v4225_v25  ;;  %v344_v9 = vmul.f32 %v340_v0, %v4250_v29  ;;  %v346_v14 = vmul.f32 %v342_v1, %v4214_v23  ;;  %v345_v34 = vmul.f32 %v341_v17, %v4231_v26 }
  0xe1   :  { %v113_v63 = vrot.slane %v112_v61, 1  ;;  %v215_v0 = vmul.f32 0.03125, %v214_v62 }
  0xe2   :  { %v351_v40 = vadd.f32 %v347_v7, %v4220_v24  ;;  %v348_v18 = vadd.f32 %v344_v9, %v4237_v27  ;;  %v350_v15 = vadd.f32 %v346_v14, %v4243_v28  ;;  %v349_v42 = vadd.f32 %v345_v34, %v4256_v30 }
  0xe3   :  { %v114_v1 = vadd.f32 %v113_v63, %v112_v61  ;;  %v216_v6 = vsub.f32 %v202_v4, %v215_v0  ;;  %v217_v7 = vsub.f32 %v203_v2, %v215_v0  ;;  %v218_v12 = vsub.f32 %v204_v21, %v215_v0 }
  0xe4   :  { %382 = vrot.lane.b32.xlu1 %v351_v40, %s4026_s0  ;;  %376 = vrot.lane.b32.xlu0 %v348_v18, %s4026_s0  ;;  %v219_v22 = vsub.f32 %v205_v35, %v215_v0 }
  0xe5   :  { %v116_v9 = vmul.f32 0.03125, %v114_v1  ;;  %v220_v40 = vmul.f32 %v216_v6, %v216_v6  ;;  %v221_v18 = vmul.f32 %v217_v7, %v217_v7  ;;  %v222_v19 = vmul.f32 %v218_v12, %v218_v12 }
  0xe6   :  { %v223_v4 = vmul.f32 %v219_v22, %v219_v22 }
  0xe7   :  { %v4334_v14 = vsub.f32 %v4188_v10, %v116_v9  ;;  %v118_v17 = vsub.f32 %v4183_v8, %v116_v9  ;;  %v224_v20 = vadd.f32 %v221_v18, %v220_v40  ;;  %v120_v21 = vsub.f32 %v4203_v16, %v116_v9 }
  0xe8   :  { %380 = vrot.lane.b32.xlu1 %v350_v15, %s4026_s0  ;;  %360 = vrot.lane.b32.xlu0 %v296_v31, %s4027_s4  ;;  %v119_v31 = vsub.f32 %v4193_v11, %v116_v9 }
  0xe9   :  { %v121_v38 = vmul.f32 %v4334_v14, %v4334_v14  ;;  %v122_v32 = vmul.f32 %v118_v17, %v118_v17  ;;  %v225_v2 = vadd.f32 %v224_v20, %v222_v19  ;;  %v124_v35 = vmul.f32 %v120_v21, %v120_v21 }
  0xea   :  { %v123_v15 = vmul.f32 %v119_v31, %v119_v31 }
  0xeb   :  { %v125_v34 = vsel %vm101_vm0, %v121_v38, 0.0  ;;  %v126_v10 = vsel %vm101_vm0, %v122_v32, 0.0  ;;  %v226_v36 = vadd.f32 %v225_v2, %v223_v4 }
  0xec   :  { %378 = vrot.lane.b32.xlu1 %v349_v42, %s4026_s0  ;;  %356 = vrot.lane.b32.xlu0 %v294_v45, %s4027_s4  ;;  %v127_v8 = vadd.f32 %v126_v10, %v125_v34  ;;  %v128_v37 = vsel %vm101_vm0, %v123_v15, 0.0  ;;  %v130_v45 = vsel %vm101_vm0, %v124_v35, 0.0 }
  0xed   :  { %v227_v41 = vrot.slane %v226_v36, 4 }
  0xee   :  { %v129_v11 = vadd.f32 %v128_v37, %v127_v8  ;;  %v534_v37 = vld [vmem:[%s5227_s30 + $0x18] sm:$0xff] }
  0xef   :  { %v228_v42 = vadd.f32 %v227_v41, %v226_v36 }
  0xf0   :  { %362 = vrot.lane.b32.xlu1 %v297_v39, %s4027_s4  ;;  %v131_v43 = vadd.f32 %v130_v45, %v129_v11  ;;  %v394_v45 = vld [vmem:[%s5228_s2 + $0x8] sm:$0xff] }
  0xf1   :  { %v229_v46 = vrot.slane %v228_v42, 2 }
  0xf2   :  { %v132_v39 = vrot.slane %v131_v43, 4 }
  0xf3   :  { %v230_v44 = vadd.f32 %v229_v46, %v228_v42  ;;  %v395_v42 = vld [vmem:[%s5228_s2 + $0x10] sm:$0xff] }
  0xf4   :  { %358 = vrot.lane.b32.xlu1 %v295_v49, %s4027_s4  ;;  %v133_v16 = vadd.f32 %v132_v39, %v131_v43  ;;  %v4028_v43 = vmov 1  }
  0xf5   :  { %v231_v48 = vrot.slane %v230_v44, 1  ;;  %3959 = vset.pattern.permute.xlu1 %v4028_v43  ;;  %3960 = vset.pattern.permute.xlu0 %v4028_v43 }
  0xf6   :  { %v134_v49 = vrot.slane %v133_v16, 2 }
  0xf7   :  { %v232_v50 = vadd.f32 %v231_v48, %v230_v44  ;;  %v4029_v48 = vmov 0.0  }
  0xf8   :  { %v135_v52 = vadd.f32 %v134_v49, %v133_v16  ;;  %v397_v49 = vld [vmem:[%s5228_s2 + $0x20] sm:$0xff] }
  0xf9   :  { %v233_v53 = vmul.f32 0.03125, %v232_v50  ;;  %v398_v50 = vld [vmem:[%s5228_s2 + $0x28] sm:$0xff] }
  0xfa   :  { %v136_v54 = vrot.slane %v135_v52, 1 }
  0xfb   :  { %v234_v56 = vadd.f32 1e-05, %v233_v53 }
  0xfc   :  { %v137_v58 = vadd.f32 %v136_v54, %v135_v52  ;;  %v400_v52 = vld [vmem:[%s5228_s2 + $0x38] sm:$0xff] }
  0xfd   :  { %3967 = vrsqrt.f32 %v234_v56 }
  0xfe   :  { %v138_v59 = vmul.f32 0.03125, %v137_v58 }
 0x100   :  { %v139_v61 = vadd.f32 1e-05, %v138_v59 }
 0x102   :  { %3969 = vrsqrt.f32 %v139_v61 }
 0x10a   :  { %v3968_v62 = vpop.eup %3967 }
 0x10b   :  { %v239_v63 = vmul.f32 %v3968_v62, %v219_v22  ;;  %v238_v0 = vmul.f32 %v3968_v62, %v218_v12  ;;  %v237_v18 = vmul.f32 %v3968_v62, %v217_v7  ;;  %v236_v32 = vmul.f32 %v3968_v62, %v216_v6 }
 0x10d   :  { %v243_v1 = vmul.f32 %v239_v63, %v4225_v25  ;;  %v242_v9 = vmul.f32 %v238_v0, %v4214_v23  ;;  %v241_v12 = vmul.f32 %v237_v18, %v4231_v26 }
 0x10f   :  { %v247_v40 = vadd.f32 %v243_v1, %v4220_v24  ;;  %v3970_v19 = vpop.eup %3969  ;;  %v246_v2 = vadd.f32 %v242_v9, %v4243_v28  ;;  %v240_v24 = vmul.f32 %v236_v32, %v4250_v29  ;;  %v245_v6 = vadd.f32 %v241_v12, %v4256_v30  ;;  %v532_v30 = vld [vmem:[%s5227_s30 + $0x8] sm:$0xff] }
 0x110   :  { %v144_v4 = vmul.f32 %v3970_v19, %v120_v21  ;;  %v143_v15 = vmul.f32 %v3970_v19, %v119_v31  ;;  %v142_v7 = vmul.f32 %v3970_v19, %v118_v17  ;;  %v141_v28 = vmul.f32 %v3970_v19, %v4334_v14  ;;  %v533_v14 = vld [vmem:[%s5227_s30 + $0x10] sm:$0xff] }
 0x111   :  { %v244_v31 = vadd.f32 %v240_v24, %v4237_v27 }
 0x112   :  { %v168_v34 = vmul.f32 %v4288_v5, %v144_v4  ;;  %v167_v10 = vmul.f32 %v4279_v51, %v143_v15  ;;  %v166_v29 = vmul.f32 %v4283_v57, %v142_v7  ;;  %v165_v8 = vmul.f32 %v4294_v13, %v141_v28 }
 0x114   :  { %v192_v5 = vadd.f32 %v4281_v55, %v168_v34  ;;  %v191_v27 = vadd.f32 %v4285_v60, %v167_v10  ;;  %v190_v55 = vadd.f32 %v4325_v47, %v166_v29  ;;  %v189_v13 = vadd.f32 %v4307_v33, %v165_v8  ;;  %v396_v33 = vld [vmem:[%s5228_s2 + $0x18] sm:$0xff] }
 0x156   :  { %v383_v20 = vpop.permute.xlu1 %382  ;;  %v377_v22 = vpop.permute.xlu0 %376 }
 0x157   :  { %v392_v38 = vsel %vm388_vm2, %v247_v40, %v383_v20  ;;  %v389_v17 = vsel %vm388_vm2, %v244_v31, %v377_v22  ;;  %v632_v22 = vld [vmem:[%s5229_s5] sm:$0xff]  ;;  %s5231_s5 = sld [smem:[#allocation10_spill]] }
 0x158   :  { %3604 = vmatprep.subr.mxu1 %v392_v38 }
 0x159   :  { %3605 = vmatpush3.msra.mxu1 %v392_v38 }
 0x15a   :  { %v381_v25 = vpop.permute.xlu1 %380  ;;  %v361_v36 = vpop.permute.xlu0 %360 }
 0x15b   :  { %v391_v23 = vsel %vm388_vm2, %v246_v2, %v381_v25  ;;  %v370_v35 = vsel %vm101_vm0, %v191_v27, %v361_v36 }
 0x15c   :  { %3606 = vmatprep.subr.mxu1 %v391_v23 }
 0x15d   :  { %3607 = vmatpush3.msra.mxu1 %v391_v23 }
 0x15e   :  { %v379_v21 = vpop.permute.xlu1 %378  ;;  %v357_v60 = vpop.permute.xlu0 %356 }
 0x15f   :  { %v390_v26 = vsel %vm388_vm2, %v245_v6, %v379_v21  ;;  %v368_v47 = vsel %vm101_vm0, %v189_v13, %v357_v60 }
 0x160   :  { %3608 = vmatprep.subr.mxu1 %v390_v26 }
 0x161   :  { %3609 = vmatpush3.msra.mxu1 %v390_v26 }
 0x162   :  { %v363_v51 = vpop.permute.xlu1 %362  ;;  %3610 = vmatprep.subr.mxu1 %v389_v17 }
 0x163   :  { %3611 = vmatpush3.msra.mxu1 %v389_v17  ;;  %v371_v57 = vsel %vm101_vm0, %v192_v5, %v363_v51 }
 0x164   :  { %3584 = vmatprep.subr.mxu0 %v371_v57  ;;  %3613 = vmatmul.mubr.msk.f32.vlgmr.msra.gmra.mxu1 %vm401_vm1, %v532_v30 }
 0x165   :  { %3585 = vmatpush3.msra.mxu0 %v371_v57  ;;  %3615 = vmatprep.mubr.msk.f32.mxu1 %vm401_vm1, %v533_v14 }
 0x166   :  { %v359_v41 = vpop.permute.xlu1 %358  ;;  %3586 = vmatprep.subr.mxu0 %v370_v35  ;;  %3618 = vmatprep.subr.mxu1 %v4029_v48 }
 0x167   :  { %3587 = vmatpush3.msra.mxu0 %v370_v35  ;;  %v369_v11 = vsel %vm101_vm0, %v190_v55, %v359_v41  ;;  %v633_v41 = vld [vmem:[%s5230_s28] sm:$0xff] }
 0x168   :  { %3588 = vmatprep.subr.mxu0 %v369_v11  ;;  %3616 = vmatmul.mubr.msk.f32.gmra.mxu1 %vm401_vm1, %v534_v37 }
 0x169   :  { %3589 = vmatpush3.msra.mxu0 %v369_v11  ;;  %3626 = vmatprep.mubr.msk.f32.mxu1 %vm4030_vm3, %v4029_v48 }
 0x16a   :  { %3590 = vmatprep.subr.mxu0 %v368_v47 }
 0x16b   :  { %3591 = vmatpush3.msra.mxu0 %v368_v47 }
 0x16c   :  { %3593 = vmatmul.mubr.msk.f32.vlgmr.msra.gmra.mxu0 %vm401_vm1, %v394_v45  ;;  %3637 = vmatprep.subr.mxu0 %v4029_v48 }
 0x16d   :  { %3595 = vmatprep.mubr.msk.f32.mxu0 %vm401_vm1, %v395_v42  ;;  %v634_v42 = vld [vmem:[%s5230_s28 + $0x8] sm:$0xff] }
 0x170   :  { %3596 = vmatmul.mubr.msk.f32.gmra.mxu0 %vm401_vm1, %v396_v33  ;;  %v635_v33 = vld [vmem:[%s5230_s28 + $0x10] sm:$0xff] }
 0x171   :  { %3598 = vmatprep.mubr.msk.f32.mxu0 %vm401_vm1, %v397_v49 }
 0x174   :  { %3599 = vmatmul.mubr.msk.f32.gmra.mxu0 %vm401_vm1, %v398_v50 }
 0x224   :  { %v3614_v46 = vpop.f32.mrf.mxu1 }
 0x226   :  { %v613_v39 = vpop.f32.mrf.mxu1 }
 0x228   :  { %v3617_v44 = vpop.f32.mrf.mxu1 }
 0x229   :  { %873 = vperm.xlu1 %3959, %v3617_v44  }
 0x22a   :  { %v623_v16 = vpop.f32.mrf.mxu1 }
 0x22b   :  { %869 = vperm.xlu0 %3960, %v623_v16  }
 0x22c   :  { %v3594_v53 = vpop.f32.mrf.mxu0 }
 0x22d   :  { %865 = vperm.xlu1 %3959, %v3614_v46  }
 0x22e   :  { %v492_v56 = vpop.f32.mrf.mxu0 }
 0x22f   :  { %3962 = vset.pattern.permute.xlu0 %v4025_v3 }
 0x230   :  { %v3597_v61 = vpop.f32.mrf.mxu0 }
 0x231   :  { %861 = vperm.xlu1 %3959, %v613_v39  }
 0x232   :  { %v502_v1 = vpop.f32.mrf.mxu0 }
 0x234   :  { %v4434_v10 = vpop.f32.mrf.mxu0 }
 0x235   :  { %3961 = vset.pattern.permute.xlu1 %v4025_v3  ;;  %v399_v3 = vld [vmem:[%s5228_s2 + $0x30] sm:$0xff] }
 0x236   :  { %654 = vperm.xlu1 %3961, %v3617_v44   ;;  %3601 = vmatprep.mubr.msk.f32.mxu0 %vm401_vm1, %v399_v3  ;;  %v4436_v28 = vpop.f32.mrf.mxu0 }
 0x237   :  { %3602 = vmatmul.mubr.msk.f32.gmra.mxu0 %vm401_vm1, %v400_v52 }
 0x238   :  { %3645 = vmatprep.mubr.msk.f32.mxu0 %vm4030_vm3, %v4029_v48 }
 0x23a   :  { %644 = vperm.xlu1 %3961, %v3614_v46  }
 0x23e   :  { %649 = vperm.xlu1 %3961, %v623_v16  }
 0x242   :  { %639 = vperm.xlu1 %3961, %v613_v39   ;;  %v636_v39 = vld [vmem:[%s5230_s28 + $0x18] sm:$0xff] }
 0x2a4   :  { %v874_v54 = vpop.permute.xlu1 %873 }
 0x2a5   :  { %v879_v63 = vmul.f32 %v3597_v61, %v874_v54 }
 0x2a6   :  { %v870_v0 = vpop.permute.xlu0 %869 }
 0x2a7   :  { %v878_v9 = vmul.f32 %v870_v0, %v502_v1 }
 0x2a8   :  { %v866_v58 = vpop.permute.xlu1 %865 }
 0x2a9   :  { %v877_v59 = vmul.f32 %v3594_v53, %v866_v58 }
 0x2ab   :  { %886 = vrot.lane.b32.xlu0 %v877_v59, %s4027_s4 }
 0x2ac   :  { %v862_v62 = vpop.permute.xlu1 %861 }
 0x2ad   :  { %v876_v19 = vmul.f32 %v862_v62, %v492_v56 }
 0x2af   :  { %890 = vrot.lane.b32.xlu0 %v879_v63, %s4027_s4 }
 0x2b1   :  { %v655_v40 = vpop.permute.xlu1 %654 }
 0x2b2   :  { %v660_v18 = vmul.f32 %v3597_v61, %v655_v40 }
 0x2b3   :  { %888 = vrot.lane.b32.xlu0 %v878_v9, %s4027_s4 }
 0x2b4   :  { %3619 = vmatpush3.msra.mxu1 %v660_v18 }
 0x2b5   :  { %v645_v20 = vpop.permute.xlu1 %644  ;;  %3620 = vmatprep.subr.mxu1 %v4029_v48 }
 0x2b6   :  { %v658_v4 = vmul.f32 %v3594_v53, %v645_v20 }
 0x2b7   :  { %884 = vrot.lane.b32.xlu0 %v876_v19, %s4027_s4 }
 0x2b9   :  { %v650_v38 = vpop.permute.xlu1 %649 }
 0x2ba   :  { %v659_v32 = vmul.f32 %v650_v38, %v502_v1 }
 0x2bc   :  { %3621 = vmatpush3.msra.mxu1 %v659_v32 }
 0x2bd   :  { %v640_v2 = vpop.permute.xlu1 %639  ;;  %3622 = vmatprep.subr.mxu1 %v4029_v48 }
 0x2be   :  { %v657_v12 = vmul.f32 %v640_v2, %v492_v56  ;;  %3623 = vmatpush3.msra.mxu1 %v658_v4 }
 0x2bf   :  { %3624 = vmatprep.subr.mxu1 %v4029_v48 }
 0x2c0   :  { %3625 = vmatpush3.msra.mxu1 %v657_v12 }
 0x2c1   :  { %3627 = vmatmul.mubr.msk.f32.vlgmr.msra.gmra.mxu1 %vm401_vm1, %v632_v22 }
 0x2c2   :  { %3631 = vmatprep.mubr.msk.f32.mxu1 %vm746_vm4, %v633_v41 }
 0x2f7   :  { %v4438_v26 = vpop.f32.mrf.mxu0 }
 0x2f9   :  { %v4446_v31 = vpop.f32.mrf.mxu0 }
 0x31d   :  { %v887_v25 = vpop.permute.xlu0 %886 }
 0x321   :  { %v891_v15 = vpop.permute.xlu0 %890 }
 0x322   :  { %3638 = vmatpush3.msra.mxu0 %v891_v15  ;;  %v1095_v15 = vld [vmem:[%s5231_s5] sm:$0xff] }
 0x323   :  { %3639 = vmatprep.subr.mxu0 %v4029_v48 }
 0x325   :  { %v889_v23 = vpop.permute.xlu0 %888 }
 0x326   :  { %3640 = vmatpush3.msra.mxu0 %v889_v23 }
 0x327   :  { %3641 = vmatprep.subr.mxu0 %v4029_v48 }
 0x328   :  { %3642 = vmatpush3.msra.mxu0 %v887_v25 }
 0x329   :  { %3643 = vmatprep.subr.mxu0 %v4029_v48  ;;  %v885_v24 = vpop.permute.xlu0 %884 }
 0x32a   :  { %3644 = vmatpush3.msra.mxu0 %v885_v24 }
 0x32b   :  { %3646 = vmatmul.mubr.msk.f32.vlgmr.msra.gmra.mxu0 %vm401_vm1, %v632_v22 }
 0x32c   :  { %3650 = vmatprep.mubr.msk.f32.mxu0 %vm746_vm4, %v633_v41  ;;  %v1104_v41 = vld [vmem:[%s5192_s9 + $0x8] sm:$0xff] }
 0x381   :  { %v730_v7 = vpop.f32.mrf.mxu1 }
 0x382   :  { %v734_v34 = vmul.f32 0.5, %v730_v7 }
 0x383   :  { %v3628_v6 = vpop.f32.mrf.mxu1 }
 0x384   :  { %v735_v21 = vsel %vm101_vm0, %v734_v34, -inf }
 0x385   :  { %736 = vmax.xlane.f32.xlu1 %v735_v21 }
 0x396   :  { %1073 = vrot.lane.b32.xlu1 %v4438_v26, %s4027_s4 }
 0x39a   :  { %1069 = vrot.lane.b32.xlu1 %v4434_v10, %s4027_s4 }
 0x39e   :  { %1067 = vrot.lane.b32.xlu1 %v4436_v28, %s4027_s4 }
 0x3eb   :  { %v962_v36 = vpop.f32.mrf.mxu0 }
 0x3ec   :  { %v966_v29 = vmul.f32 0.5, %v962_v36  ;;  %v84_v36 = vld [vmem:[%s5232_s3 + $0x38] sm:$0xff] }
 0x3ed   :  { %v3647_v17 = vpop.f32.mrf.mxu0 }
 0x3ee   :  { %v967_v5 = vsel %vm101_vm0, %v966_v29, -inf  ;;  %v1098_v17 = vld [vmem:[%s5231_s5 + $0x18] sm:$0xff] }
 0x3ef   :  { %968 = vmax.xlane.f32.xlu0 %v967_v5  ;;  %v1099_v5 = vld [vmem:[%s5231_s5 + $0x20] sm:$0xff] }
 0x40e   :  { %v737_v30 = vpop.xlane.xlu1 %736 }
 0x40f   :  { %v738_v51 = vsub.f32 %v734_v34, %v737_v30  ;;  %v82_v30 = vld [vmem:[%s5232_s3 + $0x28] sm:$0xff] }
 0x411   :  { %v739_v8 = vmul.f32 1.442695, %v738_v51  ;;  %v81_v51 = vld [vmem:[%s5232_s3 + $0x20] sm:$0xff] }
 0x412   :  { %v1074_v44 = vpop.permute.xlu1 %1073 }
 0x416   :  { %v1070_v50 = vpop.permute.xlu1 %1069 }
 0x41a   :  { %v1068_v9 = vpop.permute.xlu1 %1067 }
 0x478   :  { %v969_v14 = vpop.xlane.xlu0 %968 }
 0x479   :  { %v970_v27 = vsub.f32 %v966_v29, %v969_v14  ;;  %v83_v29 = vld [vmem:[%s5232_s3 + $0x30] sm:$0xff]  ;;  %v1100_v14 = vld [vmem:[%s5231_s5 + $0x28] sm:$0xff] }
 0x47b   :  { %v971_v57 = vmul.f32 1.442695, %v970_v27  ;;  %v1101_v27 = vld [vmem:[%s5231_s5 + $0x30] sm:$0xff] }
 0x47d   :  { %3971 = vpow2.f32 %v971_v57  ;;  %v79_v57 = vld [vmem:[%s5232_s3 + $0x10] sm:$0xff] }
 0x47e   :  { %3973 = vpow2.f32 %v739_v8  ;;  %v80_v8 = vld [vmem:[%s5232_s3 + $0x18] sm:$0xff] }
 0x48a   :  { %v3972_v55 = vpop.eup %3971 }
 0x48b   :  { %v973_v35 = vsel %vm101_vm0, %v3972_v55, 0.0  ;;  %v3974_v37 = vpop.eup %3973 }
 0x48c   :  { %974 = vadd.xlane.f32.xlu0 %v973_v35  ;;  %v741_v60 = vsel %vm101_vm0, %v3974_v37, 0.0  ;;  %v78_v35 = vld [vmem:[%s5232_s3 + $0x8] sm:$0xff] }
 0x490   :  { %742 = vadd.xlane.f32.xlu0 %v741_v60  ;;  %v1559_v60 = vld [vmem:[%s5191_s10] sm:$0x3] }
 0x4a6   :  { %1071 = vrot.lane.b32.xlu0 %v4446_v31, %s4027_s4 }
 0x515   :  { %v975_v13 = vpop.xlane.xlu0 %974 }
 0x516   :  { %3975 = vrcp.f32 %v975_v13 }
 0x519   :  { %v743_v11 = vpop.xlane.xlu0 %742 }
 0x51a   :  { %3977 = vrcp.f32 %v743_v11  ;;  %v1103_v11 = vld [vmem:[%s5192_s9] sm:$0xff] }
 0x51d   :  { %v1072_v53 = vpop.permute.xlu0 %1071 }
 0x523   :  { %v3976_v47 = vpop.eup %3975 }
 0x524   :  { %v977_v45 = vmul.f32 %v3976_v47, %v3972_v55  ;;  %v1102_v55 = vld [vmem:[%s5231_s5 + $0x38] sm:$0xff] }
 0x526   :  { %3648 = vmatprep.subr.mxu0 %v977_v45 }
 0x527   :  { %v3978_v43 = vpop.eup %3977  ;;  %3649 = vmatpush3.msra.mxu0 %v977_v45 }
 0x528   :  { %3651 = vmatmul.mubr.msk.f32.vlgmr.msra.gmra.mxu0 %vm746_vm4, %v634_v42  ;;  %v745_v46 = vmul.f32 %v3978_v43, %v3974_v37  ;;  %v77_v37 = vld [vmem:[%s5232_s3] sm:$0xff] }
 0x529   :  { %3653 = vmatprep.mubr.msk.f32.mxu0 %vm746_vm4, %v635_v33 }
 0x52a   :  { %3629 = vmatprep.subr.mxu1 %v745_v46 }
 0x52b   :  { %3630 = vmatpush3.msra.mxu1 %v745_v46 }
 0x52c   :  { %3632 = vmatmul.mubr.msk.f32.vlgmr.msra.gmra.mxu1 %vm746_vm4, %v634_v42  ;;  %3654 = vmatmul.mubr.msk.f32.gmra.mxu0 %vm746_vm4, %v636_v39  ;;  %v1106_v42 = vld [vmem:[%s5192_s9 + $0x18] sm:$0xff] }
 0x52d   :  { %3634 = vmatprep.mubr.msk.f32.mxu1 %vm746_vm4, %v635_v33 }
 0x530   :  { %3635 = vmatmul.mubr.msk.f32.gmra.mxu1 %vm746_vm4, %v636_v39 }
 0x531   :  { %3672 = vmatprep.mubr.msk.f32.mxu1 %vm101_vm0, %v1095_v15 }
 0x5e8   :  { %v3652_v16 = vpop.f32.mrf.mxu0 }
 0x5e9   :  { %v1080_v59 = vmul.f32 %v3652_v16, %v1070_v50  ;;  %v1108_v16 = vld [vmem:[%s5192_s9 + $0x28] sm:$0xff] }
 0x5ea   :  { %v1044_v49 = vpop.f32.mrf.mxu0 }
 0x5eb   :  { %v1079_v40 = vmul.f32 %v1068_v9, %v1044_v49  ;;  %v1086_v18 = vsel %vm101_vm0, %v1080_v59, 0.0  ;;  %v1109_v59 = vld [vmem:[%s5192_s9 + $0x30] sm:$0xff] }
 0x5ec   :  { %v3633_v3 = vpop.f32.mrf.mxu1  ;;  %v3655_v52 = vpop.f32.mrf.mxu0 }
 0x5ed   :  { %v1082_v54 = vmul.f32 %v3655_v52, %v1074_v44  ;;  %v845_v20 = vmul.f32 %v3633_v3, %v4434_v10  ;;  %v1083_v4 = vsel %vm101_vm0, %v1079_v40, 0.0  ;;  %v1105_v44 = vld [vmem:[%s5192_s9 + $0x10] sm:$0xff]  ;;  %v4017_v40 = vld [vmem:[%s5224_s27 + $0x8] sm:$0xff] }
 0x5ee   :  { %v825_v56 = vpop.f32.mrf.mxu1  ;;  %v1054_v58 = vpop.f32.mrf.mxu0 }
 0x5ef   :  { %v1081_v61 = vmul.f32 %v1072_v53, %v1054_v58  ;;  %v1092_v62 = vsel %vm101_vm0, %v1082_v54, 0.0  ;;  %v851_v2 = vsel %vm101_vm0, %v845_v20, 0.0  ;;  %v844_v12 = vmul.f32 %v825_v56, %v4436_v28  ;;  %v1107_v53 = vld [vmem:[%s5192_s9 + $0x20] sm:$0xff] }
 0x5f0   :  { %v3636_v63 = vpop.f32.mrf.mxu1  ;;  %1093 = vadd.xlane.f32.xlu0 %v1092_v62  ;;  %v1110_v62 = vld [vmem:[%s5192_s9 + $0x38] sm:$0xff]  ;;  %v4018_v20 = vld [vmem:[%s5224_s27] sm:$0xff] }
 0x5f1   :  { %v847_v0 = vmul.f32 %v3636_v63, %v4438_v26  ;;  %v1089_v1 = vsel %vm101_vm0, %v1081_v61, 0.0  ;;  %v848_v25 = vsel %vm101_vm0, %v844_v12, 0.0  ;;  %v1096_v26 = vld [vmem:[%s5231_s5 + $0x8] sm:$0xff]  ;;  %v4019_v12 = vld [vmem:[%s5224_s27 + $0x18] sm:$0xff] }
 0x5f2   :  { %1090 = vadd.xlane.f32.xlu1 %v1089_v1  ;;  %v835_v19 = vpop.f32.mrf.mxu1 }
 0x5f3   :  { %v857_v38 = vsel %vm101_vm0, %v847_v0, 0.0  ;;  %v846_v32 = vmul.f32 %v835_v19, %v4446_v31  ;;  %v1097_v31 = vld [vmem:[%s5231_s5 + $0x10] sm:$0xff] }
 0x5f4   :  { %1087 = vadd.xlane.f32.xlu0 %v1086_v18 }
 0x5f5   :  { %v854_v22 = vsel %vm101_vm0, %v846_v32, 0.0 }
 0x5f6   :  { %858 = vadd.xlane.f32.xlu1 %v857_v38 }
 0x5f8   :  { %1084 = vadd.xlane.f32.xlu0 %v1083_v4 }
 0x5fa   :  { %852 = vadd.xlane.f32.xlu1 %v851_v2 }
 0x5fc   :  { %855 = vadd.xlane.f32.xlu0 %v854_v22 }
 0x600   :  { %849 = vadd.xlane.f32.xlu0 %v848_v25 }
 0x679   :  { %v1094_v23 = vpop.xlane.xlu0 %1093 }
 0x67a   :  { %3656 = vmatprep.subr.mxu1 %v1094_v23 }
 0x67b   :  { %3657 = vmatpush3.msra.mxu1 %v1094_v23  ;;  %v1091_v24 = vpop.xlane.xlu1 %1090  ;;  %v4020_v23 = vld [vmem:[%s5224_s27 + $0x10] sm:$0xff] }
 0x67c   :  { %3658 = vmatprep.subr.mxu1 %v1091_v24 }
 0x67d   :  { %v1088_v7 = vpop.xlane.xlu0 %1087  ;;  %3659 = vmatpush3.msra.mxu1 %v1091_v24 }
 0x67e   :  { %3660 = vmatprep.subr.mxu1 %v1088_v7 }
 0x67f   :  { %3661 = vmatpush3.msra.mxu1 %v1088_v7  ;;  %v859_v34 = vpop.xlane.xlu1 %858 }
 0x681   :  { %v1085_v6 = vpop.xlane.xlu0 %1084 }
 0x682   :  { %3662 = vmatprep.subr.mxu1 %v1085_v6 }
 0x683   :  { %3663 = vmatpush3.msra.mxu1 %v1085_v6  ;;  %v853_v10 = vpop.xlane.xlu1 %852  ;;  %v4021_v6 = vld [vmem:[%s5224_s27 + $0x28] sm:$0xff] }
 0x684   :  { %3664 = vmatprep.subr.mxu1 %v859_v34 }
 0x685   :  { %v856_v21 = vpop.xlane.xlu0 %855  ;;  %3665 = vmatpush3.msra.mxu1 %v859_v34 }
 0x686   :  { %3666 = vmatprep.subr.mxu1 %v856_v21 }
 0x687   :  { %3667 = vmatpush3.msra.mxu1 %v856_v21 }
 0x688   :  { %3668 = vmatprep.subr.mxu1 %v853_v10 }
 0x689   :  { %v850_v28 = vpop.xlane.xlu0 %849  ;;  %3669 = vmatpush3.msra.mxu1 %v853_v10 }
 0x68a   :  { %3670 = vmatprep.subr.mxu1 %v850_v28 }
 0x68b   :  { %3671 = vmatpush3.msra.mxu1 %v850_v28 }
 0x68c   :  { %3673 = vmatmul.mubr.msk.f32.vlgmr.msra.gmra.mxu1 %vm101_vm0, %v1096_v26  ;;  %3712 = vmatprep.subr.mxu1 %v4029_v48  ;;  %v4022_v26 = vld [vmem:[%s5224_s27 + $0x20] sm:$0xff] }
 0x68d   :  { %3675 = vmatprep.mubr.msk.f32.mxu1 %vm101_vm0, %v1097_v31  ;;  %3713 = vmatpush3.msra.mxu1 %v84_v36  ;;  %v1561_v36 = vstv %s5193_s11  ;;  %s4035_s11 = smov 121  }
 0x68e   :  { %3714 = vmatprep.subr.mxu1 %v4029_v48 }
 0x68f   :  { %3715 = vmatpush3.msra.mxu1 %v83_v29 }
 0x690   :  { %3676 = vmatmul.mubr.msk.f32.gmra.mxu1 %vm101_vm0, %v1098_v17  ;;  %3716 = vmatprep.subr.mxu1 %v4029_v48 }
 0x691   :  { %3678 = vmatprep.mubr.msk.f32.mxu1 %vm101_vm0, %v1099_v5  ;;  %3717 = vmatpush3.msra.mxu1 %v82_v30  ;;  %v4023_v5 = vld [vmem:[%s5224_s27 + $0x30] sm:$0xff] }
 0x692   :  { %3718 = vmatprep.subr.mxu1 %v4029_v48 }
 0x693   :  { %3719 = vmatpush3.msra.mxu1 %v81_v51 }
 0x694   :  { %3679 = vmatmul.mubr.msk.f32.gmra.mxu1 %vm101_vm0, %v1100_v14  ;;  %3720 = vmatprep.subr.mxu1 %v4029_v48 }
 0x695   :  { %3681 = vmatprep.mubr.msk.f32.mxu1 %vm101_vm0, %v1101_v27  ;;  %3721 = vmatpush3.msra.mxu1 %v80_v8  ;;  %v4024_v8 = vld [vmem:[%s5224_s27 + $0x38] sm:$0xff] }
 0x696   :  { %3722 = vmatprep.subr.mxu1 %v4029_v48 }
 0x697   :  { %3723 = vmatpush3.msra.mxu1 %v79_v57 }
 0x698   :  { %3682 = vmatmul.mubr.msk.f32.gmra.mxu1 %vm101_vm0, %v1102_v55  ;;  %3724 = vmatprep.subr.mxu1 %v4029_v48 }
 0x699   :  { %3725 = vmatpush3.msra.mxu1 %v78_v35  ;;  %3728 = vmatprep.mubr.msk.f32.mxu1 %vm4030_vm3, %v4029_v48 }
 0x69a   :  { %3726 = vmatprep.subr.mxu1 %v4029_v48 }
 0x69b   :  { %3727 = vmatpush3.msra.mxu1 %v77_v37 }
 0x69c   :  { %3729 = vmatmul.mubr.msk.f32.vlgmr.msra.gmra.mxu1 %vm101_vm0, %v1559_v60 }
 0x74c   :  { %v3674_v13 = vpop.f32.mrf.mxu1 }
 0x74d   :  { %v1207_v47 = vadd.f32 %v3674_v13, %v1104_v41 }
 0x74e   :  { %v1201_v45 = vpop.f32.mrf.mxu1 }
 0x74f   :  { %v1202_v33 = vadd.f32 %v1201_v45, %v1103_v11  ;;  %1247 = vperm.xlu0 %3962, %v1207_v47  }
 0x750   :  { %v3677_v43 = vpop.f32.mrf.mxu1 }
 0x751   :  { %1242 = vperm.xlu1 %3961, %v1202_v33   ;;  %v1217_v46 = vadd.f32 %v3677_v43, %v1106_v42 }
 0x752   :  { %v1211_v39 = vpop.f32.mrf.mxu1 }
 0x753   :  { %v1212_v50 = vadd.f32 %v1211_v39, %v1105_v44 }
 0x754   :  { %v3680_v49 = vpop.f32.mrf.mxu1 }
 0x755   :  { %1257 = vperm.xlu1 %3961, %v1217_v46   ;;  %v1227_v3 = vadd.f32 %v3680_v49, %v1108_v16 }
 0x756   :  { %v1221_v52 = vpop.f32.mrf.mxu1 }
 0x757   :  { %v1222_v56 = vadd.f32 %v1221_v52, %v1107_v53 }
 0x758   :  { %v3683_v54 = vpop.f32.mrf.mxu1 }
 0x759   :  { %1252 = vperm.xlu1 %3961, %v1212_v50   ;;  %v1237_v1 = vadd.f32 %v3683_v54, %v1110_v62 }
 0x75a   :  { %v1231_v58 = vpop.f32.mrf.mxu1 }
 0x75b   :  { %v1232_v61 = vadd.f32 %v1231_v58, %v1109_v59 }
 0x75c   :  { %v1631_v63 = vpop.f32.mrf.mxu1 }
 0x75d   :  { %1267 = vperm.xlu1 %3961, %v1227_v3   ;;  %v1632_v51 = vadd.f32 %v1631_v63, %v1561_v36  ;;  %v1427_v36 = vld [vmem:[%s5194_s15 + $0x28] sm:$0xff] }
 0x75e   :  { %v3730_v0 = vpop.f32.mrf.mxu1 }
 0x75f   :  { %v1636_v55 = vsel %vm1635_vm5, %v1632_v51, 0.0 }
 0x761   :  { %1262 = vperm.xlu1 %3961, %v1222_v56  }
 0x765   :  { %1272 = vperm.xlu1 %3961, %v1232_v61  }
 0x769   :  { %1277 = vperm.xlu1 %3961, %v1237_v1  }
 0x7ca   :  { %v1248_v9 = vpop.permute.xlu0 %1247 }
 0x7cb   :  { %v4582_v18 = vmul.f32 %v4017_v40, %v1248_v9 }
 0x7cc   :  { %v1243_v19 = vpop.permute.xlu1 %1242 }
 0x7cd   :  { %v4587_v38 = vmul.f32 %v4018_v20, %v1243_v19  ;;  %v1293_v32 = vsel %vm101_vm0, %v4582_v18, 0.0 }
 0x7ce   :  { %1294 = vadd.xlane.f32.xlu0 %v1293_v32 }
 0x7cf   :  { %v1290_v4 = vsel %vm101_vm0, %v4587_v38, 0.0 }
 0x7d0   :  { %1291 = vadd.xlane.f32.xlu1 %v1290_v4  ;;  %v1258_v2 = vpop.permute.xlu1 %1257 }
 0x7d1   :  { %v4596_v22 = vmul.f32 %v4019_v12, %v1258_v2 }
 0x7d3   :  { %v1299_v25 = vsel %vm101_vm0, %v4596_v22, 0.0 }
 0x7d4   :  { %1300 = vadd.xlane.f32.xlu1 %v1299_v25  ;;  %v1253_v15 = vpop.permute.xlu1 %1252 }
 0x7d5   :  { %v4603_v24 = vmul.f32 %v4020_v23, %v1253_v15  ;;  %v1429_v23 = vld [vmem:[%s5194_s15 + $0x38] sm:$0xff] }
 0x7d6   :  { %3684 = vmatprep.subr.mxu0 %v1429_v23 }
 0x7d7   :  { %v1296_v7 = vsel %vm101_vm0, %v4603_v24, 0.0  ;;  %3685 = vmatpush3.msra.mxu0 %v1429_v23  ;;  %v1658_v23 = vld [vmem:[%s5197_s14 + $0x38] sm:$0xff] }
 0x7d8   :  { %1297 = vadd.xlane.f32.xlu0 %v1296_v7  ;;  %v1268_v34 = vpop.permute.xlu1 %1267 }
 0x7d9   :  { %v4610_v21 = vmul.f32 %v4021_v6, %v1268_v34 }
 0x7db   :  { %v1305_v10 = vsel %vm101_vm0, %v4610_v21, 0.0 }
 0x7dc   :  { %1306 = vadd.xlane.f32.xlu1 %v1305_v10  ;;  %v1263_v28 = vpop.permute.xlu1 %1262  ;;  %v1428_v10 = vld [vmem:[%s5194_s15 + $0x30] sm:$0xff] }
 0x7dd   :  { %v4617_v31 = vmul.f32 %v4022_v26, %v1263_v28  ;;  %3686 = vmatprep.subr.mxu0 %v1428_v10 }
 0x7de   :  { %3687 = vmatpush3.msra.mxu0 %v1428_v10 }
 0x7df   :  { %v1302_v29 = vsel %vm101_vm0, %v4617_v31, 0.0  ;;  %3688 = vmatprep.subr.mxu0 %v1427_v36 }
 0x7e0   :  { %1303 = vadd.xlane.f32.xlu0 %v1302_v29  ;;  %v1273_v17 = vpop.permute.xlu1 %1272  ;;  %3689 = vmatpush3.msra.mxu0 %v1427_v36 }
 0x7e1   :  { %v4627_v30 = vmul.f32 %v4023_v5, %v1273_v17  ;;  %v1426_v5 = vld [vmem:[%s5194_s15 + $0x20] sm:$0xff] }
 0x7e2   :  { %3690 = vmatprep.subr.mxu0 %v1426_v5 }
 0x7e3   :  { %v1308_v14 = vsel %vm101_vm0, %v4627_v30, 0.0  ;;  %3691 = vmatpush3.msra.mxu0 %v1426_v5  ;;  %v1656_v5 = vld [vmem:[%s5197_s14 + $0x28] sm:$0xff] }
 0x7e4   :  { %1309 = vadd.xlane.f32.xlu0 %v1308_v14  ;;  %v1278_v27 = vpop.permute.xlu1 %1277  ;;  %v1424_v14 = vld [vmem:[%s5194_s15 + $0x10] sm:$0xff] }
 0x7e5   :  { %v4634_v57 = vmul.f32 %v4024_v8, %v1278_v27  ;;  %v1423_v27 = vld [vmem:[%s5194_s15 + $0x8] sm:$0xff]  ;;  %v1422_v8 = vld [vmem:[%s5194_s15] sm:$0xff] }
 0x7e7   :  { %v1311_v35 = vsel %vm101_vm0, %v4634_v57, 0.0 }
 0x7e8   :  { %1312 = vadd.xlane.f32.xlu1 %v1311_v35  ;;  %1637 = vadd.xlane.f32.xlu0 %v1636_v55 }
 0x857   :  { %v1295_v37 = vpop.xlane.xlu0 %1294 }
 0x858   :  { %v1315_v60 = vmul.f32 0.015625, %v1295_v37 }
 0x859   :  { %v1292_v41 = vpop.xlane.xlu1 %1291 }
 0x85a   :  { %v4640_v13 = vsub.f32 %v4582_v18, %v1315_v60  ;;  %v1314_v11 = vmul.f32 0.015625, %v1292_v41 }
 0x85c   :  { %v4643_v47 = vsub.f32 %v4587_v38, %v1314_v11  ;;  %v1331_v45 = vmul.f32 %v4640_v13, %v4640_v13 }
 0x85d   :  { %v1301_v42 = vpop.xlane.xlu1 %1300 }
 0x85e   :  { %v1317_v33 = vmul.f32 0.015625, %v1301_v42  ;;  %v1341_v43 = vsel %vm101_vm0, %v1331_v45, 0.0  ;;  %v1330_v46 = vmul.f32 %v4643_v47, %v4643_v47 }
 0x85f   :  { %1342 = vadd.xlane.f32.xlu0 %v1341_v43 }
 0x860   :  { %v4651_v39 = vsub.f32 %v4596_v22, %v1317_v33  ;;  %v1338_v44 = vsel %vm101_vm0, %v1330_v46, 0.0 }
 0x861   :  { %v1298_v16 = vpop.xlane.xlu0 %1297  ;;  %1339 = vadd.xlane.f32.xlu1 %v1338_v44 }
 0x862   :  { %v1316_v49 = vmul.f32 0.015625, %v1298_v16  ;;  %v1333_v50 = vmul.f32 %v4651_v39, %v4651_v39 }
 0x864   :  { %v4657_v3 = vsub.f32 %v4603_v24, %v1316_v49  ;;  %v1347_v52 = vsel %vm101_vm0, %v1333_v50, 0.0 }
 0x865   :  { %v1307_v53 = vpop.xlane.xlu1 %1306  ;;  %1348 = vadd.xlane.f32.xlu0 %v1347_v52 }
 0x866   :  { %v1319_v54 = vmul.f32 0.015625, %v1307_v53  ;;  %v1332_v56 = vmul.f32 %v4657_v3, %v4657_v3 }
 0x868   :  { %v4663_v58 = vsub.f32 %v4610_v21, %v1319_v54  ;;  %v1344_v59 = vsel %vm101_vm0, %v1332_v56, 0.0  ;;  %v4720_v54 = vld [vmem:[%s5195_s12] ss:$0 sm:$0xff] }
 0x869   :  { %v1304_v61 = vpop.xlane.xlu0 %1303  ;;  %1345 = vadd.xlane.f32.xlu1 %v1344_v59 }
 0x86a   :  { %v1318_v62 = vmul.f32 0.015625, %v1304_v61  ;;  %v1335_v63 = vmul.f32 %v4663_v58, %v4663_v58 }
 0x86c   :  { %v4669_v0 = vsub.f32 %v4617_v31, %v1318_v62  ;;  %v1353_v1 = vsel %vm101_vm0, %v1335_v63, 0.0 }
 0x86d   :  { %v1310_v9 = vpop.xlane.xlu0 %1309  ;;  %1354 = vadd.xlane.f32.xlu0 %v1353_v1 }
 0x86e   :  { %v1320_v40 = vmul.f32 0.015625, %v1310_v9  ;;  %v1334_v19 = vmul.f32 %v4669_v0, %v4669_v0 }
 0x870   :  { %v4675_v20 = vsub.f32 %v4627_v30, %v1320_v40  ;;  %v1350_v32 = vsel %vm101_vm0, %v1334_v19, 0.0  ;;  %v4728_v19 = vld [vmem:[%s5196_s13] ss:$0 sm:$0xff] }
 0x871   :  { %1351 = vadd.xlane.f32.xlu1 %v1350_v32  ;;  %v1313_v4 = vpop.xlane.xlu1 %1312  ;;  %v1638_v2 = vpop.xlane.xlu0 %1637 }
 0x872   :  { %v1321_v12 = vmul.f32 0.015625, %v1313_v4  ;;  %v1639_v25 = vmul.f32 0.015625, %v1638_v2  ;;  %v1336_v15 = vmul.f32 %v4675_v20, %v4675_v20 }
 0x874   :  { %v4684_v7 = vsub.f32 %v4634_v57, %v1321_v12  ;;  %v4686_v34 = vsub.f32 %v1632_v51, %v1639_v25  ;;  %v1356_v6 = vsel %vm101_vm0, %v1336_v15, 0.0  ;;  %v1425_v51 = vld [vmem:[%s5194_s15 + $0x18] sm:$0xff]  ;;  %s4036_s15 = smov 120  }
 0x875   :  { %1357 = vadd.xlane.f32.xlu1 %v1356_v6  ;;  %3692 = vmatprep.subr.mxu0 %v1425_v51 }
 0x876   :  { %v1337_v28 = vmul.f32 %v4684_v7, %v4684_v7  ;;  %v1641_v26 = vmul.f32 %v4686_v34, %v4686_v34  ;;  %3693 = vmatpush3.msra.mxu0 %v1425_v51 }
 0x877   :  { %3694 = vmatprep.subr.mxu0 %v1424_v14 }
 0x878   :  { %v1359_v29 = vsel %vm101_vm0, %v1337_v28, 0.0  ;;  %v1642_v17 = vsel %vm1635_vm5, %v1641_v26, 0.0  ;;  %3695 = vmatpush3.msra.mxu0 %v1424_v14  ;;  %v1657_v26 = vld [vmem:[%s5197_s14 + $0x30] sm:$0xff] }
 0x879   :  { %1360 = vadd.xlane.f32.xlu0 %v1359_v29  ;;  %1643 = vadd.xlane.f32.xlu1 %v1642_v17 }
 0x87a   :  { %3696 = vmatprep.subr.mxu0 %v1423_v27 }
 0x87b   :  { %3697 = vmatpush3.msra.mxu0 %v1423_v27 }
 0x87c   :  { %3698 = vmatprep.subr.mxu0 %v1422_v8 }
 0x87d   :  { %3699 = vmatpush3.msra.mxu0 %v1422_v8 }
 0x87e   :  { %3731 = vmatprep.subr.mxu0 %v4029_v48 }
 0x8e8   :  { %v1343_v55 = vpop.xlane.xlu0 %1342 }
 0x8e9   :  { %v1363_v35 = vmul.f32 0.015625, %v1343_v55 }
 0x8ea   :  { %v1340_v37 = vpop.xlane.xlu1 %1339 }
 0x8eb   :  { %v1371_v60 = vadd.f32 1e-05, %v1363_v35  ;;  %v1362_v41 = vmul.f32 0.015625, %v1340_v37  ;;  %v1654_v35 = vld [vmem:[%s5197_s14 + $0x18] sm:$0xff] }
 0x8ed   :  { %3979 = vrsqrt.f32 %v1371_v60  ;;  %v1370_v11 = vadd.f32 1e-05, %v1362_v41  ;;  %v1653_v60 = vld [vmem:[%s5197_s14 + $0x10] sm:$0xff] }
 0x8ee   :  { %v1349_v45 = vpop.xlane.xlu0 %1348 }
 0x8ef   :  { %3981 = vrsqrt.f32 %v1370_v11  ;;  %v1365_v42 = vmul.f32 0.015625, %v1349_v45  ;;  %v1652_v11 = vld [vmem:[%s5197_s14 + $0x8] sm:$0xff] }
 0x8f1   :  { %v1373_v33 = vadd.f32 1e-05, %v1365_v42 }
 0x8f2   :  { %v1346_v43 = vpop.xlane.xlu1 %1345 }
 0x8f3   :  { %3983 = vrsqrt.f32 %v1373_v33  ;;  %v1364_v46 = vmul.f32 0.015625, %v1346_v43  ;;  %v1651_v33 = vld [vmem:[%s5197_s14] sm:$0xff] }
 0x8f5   :  { %v1372_v44 = vadd.f32 1e-05, %v1364_v46 }
 0x8f6   :  { %v1355_v16 = vpop.xlane.xlu0 %1354 }
 0x8f7   :  { %3985 = vrsqrt.f32 %v1372_v44  ;;  %v1367_v49 = vmul.f32 0.015625, %v1355_v16 }
 0x8f9   :  { %v1375_v50 = vadd.f32 1e-05, %v1367_v49 }
 0x8fa   :  { %v3980_v52 = vpop.eup %3979  ;;  %v1352_v53 = vpop.xlane.xlu1 %1351 }
 0x8fb   :  { %v1387_v56 = vmul.f32 %v3980_v52, %v4640_v13  ;;  %3987 = vrsqrt.f32 %v1375_v50  ;;  %v1366_v59 = vmul.f32 0.015625, %v1352_v53 }
 0x8fc   :  { %v3982_v61 = vpop.eup %3981 }
 0x8fd   :  { %v1374_v62 = vadd.f32 1e-05, %v1366_v59  ;;  %v1386_v63 = vmul.f32 %v3982_v61, %v4643_v47  ;;  %v1401_v1 = vmul.f32 %v4720_v54, %v1387_v56 }
 0x8fe   :  { %v1358_v9 = vpop.xlane.xlu1 %1357 }
 0x8ff   :  { %3989 = vrsqrt.f32 %v1374_v62  ;;  %v1368_v40 = vmul.f32 0.015625, %v1358_v9  ;;  %v1400_v32 = vmul.f32 %v4720_v54, %v1386_v63  ;;  %v1415_v47 = vadd.f32 %v4728_v19, %v1401_v1  ;;  %v4818_v62 = vld [vmem:[%s5198_s16 + $0x20] sm:$0xff]  ;;  %v4827_v63 = vld [vmem:[%s5198_s16 + $0x18] sm:$0xff]  ;;  %v4834_v1 = vld [vmem:[%s5198_s16 + $0x10] sm:$0xff] }
 0x900   :  { %v3984_v4 = vpop.eup %3983  ;;  %v4841_v9 = vld [vmem:[%s5198_s16 + $0x8] sm:$0xff] }
 0x901   :  { %v1376_v13 = vadd.f32 1e-05, %v1368_v40  ;;  %v1414_v2 = vadd.f32 %v4728_v19, %v1400_v32  ;;  %v1389_v15 = vmul.f32 %v3984_v4, %v4651_v39  ;;  %v4848_v40 = vld [vmem:[%s5198_s16] sm:$0xff] }
 0x902   :  { %v1644_v12 = vpop.xlane.xlu1 %1643  ;;  %v1361_v25 = vpop.xlane.xlu0 %1360 }
 0x903   :  { %3991 = vrsqrt.f32 %v1376_v13  ;;  %v1645_v6 = vmul.f32 0.015625, %v1644_v12  ;;  %v1369_v10 = vmul.f32 0.015625, %v1361_v25  ;;  %3700 = vmatprep.mubr.msk.f32.mxu0 %vm101_vm0, %v1414_v2  ;;  %v1403_v17 = vmul.f32 %v4720_v54, %v1389_v15 }
 0x904   :  { %v3986_v28 = vpop.eup %3985  ;;  %3701 = vmatmul.mubr.msk.f32.vlgmr.msra.gmra.mxu0 %vm101_vm0, %v1415_v47  ;;  %v1741_v12 = vlaneseq }
 0x905   :  { %v1646_v36 = vadd.f32 1e-05, %v1645_v6  ;;  %v1377_v29 = vadd.f32 1e-05, %v1369_v10  ;;  %v1388_v39 = vmul.f32 %v3986_v28, %v4657_v3  ;;  %3732 = vmatpush3.msra.mxu0 %v1658_v23  ;;  %v1655_v3 = vld [vmem:[%s5197_s14 + $0x20] sm:$0xff]  ;;  %v1417_v8 = vadd.f32 %v4728_v19, %v1403_v17  ;;  %s4037_s14 = smov 119  }
 0x906   :  { %3733 = vmatprep.subr.mxu0 %v4029_v48  ;;  %v4854_v47 = vshrl.u32 %v1741_v12, 7 }
 0x907   :  { %3993 = vrsqrt.f32 %v1646_v36  ;;  %v1402_v51 = vmul.f32 %v4720_v54, %v1388_v39  ;;  %3734 = vmatpush3.msra.mxu0 %v1657_v26 }
 0x908   :  { %v3988_v14 = vpop.eup %3987  ;;  %3995 = vrsqrt.f32 %v1377_v29  ;;  %3735 = vmatprep.subr.mxu0 %v4029_v48  ;;  %v1743_v23 = vsub.s32 0, %v4854_v47  ;;  %v2025_v6 = vsub.s32 1, %v4854_v47 }
 0x909   :  { %v1416_v27 = vadd.f32 %v4728_v19, %v1402_v51  ;;  %3736 = vmatpush3.msra.mxu0 %v1656_v5  ;;  %v1391_v55 = vmul.f32 %v3988_v14, %v4663_v58 }
 0x90a   :  { %3737 = vmatprep.subr.mxu0 %v4029_v48 }
 0x90b   :  { %3703 = vmatprep.mubr.msk.f32.mxu0 %vm101_vm0, %v1416_v27  ;;  %3738 = vmatpush3.msra.mxu0 %v1655_v3  ;;  %v1405_v41 = vmul.f32 %v4720_v54, %v1391_v55  ;;  %v1740_v55 = vld [vmem:[%s5199_s17] sm:$0xff] }
 0x90c   :  { %v3990_v37 = vpop.eup %3989  ;;  %3704 = vmatmul.mubr.msk.f32.gmra.mxu0 %vm101_vm0, %v1417_v8  ;;  %3739 = vmatprep.subr.mxu0 %v4029_v48 }
 0x90d   :  { %v1390_v58 = vmul.f32 %v3990_v37, %v4669_v0  ;;  %3740 = vmatpush3.msra.mxu0 %v1654_v35  ;;  %v1419_v46 = vadd.f32 %v4728_v19, %v1405_v41 }
 0x90e   :  { %3741 = vmatprep.subr.mxu0 %v4029_v48 }
 0x90f   :  { %v1404_v45 = vmul.f32 %v4720_v54, %v1390_v58  ;;  %3742 = vmatpush3.msra.mxu0 %v1653_v60 }
 0x910   :  { %v3992_v42 = vpop.eup %3991  ;;  %3743 = vmatprep.subr.mxu0 %v4029_v48 }
 0x911   :  { %v1418_v0 = vadd.f32 %v4728_v19, %v1404_v45  ;;  %v1392_v43 = vmul.f32 %v3992_v42, %v4675_v20  ;;  %3744 = vmatpush3.msra.mxu0 %v1652_v11 }
 0x912   :  { %3745 = vmatprep.subr.mxu0 %v4029_v48 }
 0x913   :  { %3706 = vmatprep.mubr.msk.f32.mxu0 %vm101_vm0, %v1418_v0  ;;  %v1406_v44 = vmul.f32 %v4720_v54, %v1392_v43  ;;  %3746 = vmatpush3.msra.mxu0 %v1651_v33 }
 0x914   :  { %v3994_v16 = vpop.eup %3993  ;;  %3707 = vmatmul.mubr.msk.f32.gmra.mxu0 %vm101_vm0, %v1419_v46  ;;  %3772 = vmatprep.subr.mxu0 %v1740_v55 }
 0x915   :  { %v3996_v49 = vpop.eup %3995  ;;  %v1420_v50 = vadd.f32 %v4728_v19, %v1406_v44  ;;  %v1648_v52 = vmul.f32 %v3994_v16, %v4686_v34  ;;  %v4805_v34 = vld [vmem:[%s5198_s16 + $0x30] sm:$0xff] }
 0x916   :  { %v1393_v20 = vmul.f32 %v3996_v49, %v4684_v7  ;;  %v4799_v7 = vld [vmem:[%s5198_s16 + $0x38] sm:$0xff] }
 0x917   :  { %3709 = vmatprep.mubr.msk.f32.mxu0 %vm101_vm0, %v1420_v50  ;;  %v1649_v56 = vmul.f32 %v4720_v54, %v1648_v52  ;;  %3750 = vmatprep.subr.mxu1 %v4799_v7 }
 0x918   :  { %v1407_v53 = vmul.f32 %v4720_v54, %v1393_v20  ;;  %3751 = vmatpush3.msra.mxu1 %v4799_v7  ;;  %v4811_v54 = vld [vmem:[%s5198_s16 + $0x28] sm:$0xff]  ;;  %s4032_s16 = smov 9  }
 0x919   :  { %v1650_v61 = vadd.f32 %v4728_v19, %v1649_v56  ;;  %3752 = vmatprep.subr.mxu1 %v4805_v34 }
 0x91a   :  { %v1421_v59 = vadd.f32 %v4728_v19, %v1407_v53  ;;  %3753 = vmatpush3.msra.mxu1 %v4805_v34 }
 0x91b   :  { %3754 = vmatprep.subr.mxu1 %v4811_v54 }
 0x91c   :  { %3710 = vmatmul.mubr.msk.f32.gmra.mxu0 %vm101_vm0, %v1421_v59  ;;  %3755 = vmatpush3.msra.mxu1 %v4811_v54 }
 0x91d   :  { %3747 = vmatprep.mubr.msk.f32.mxu0 %vm4030_vm3, %v4029_v48  ;;  %3756 = vmatprep.subr.mxu1 %v4818_v62 }
 0x91e   :  { %3757 = vmatpush3.msra.mxu1 %v4818_v62 }
 0x91f   :  { %3758 = vmatprep.subr.mxu1 %v4827_v63 }
 0x920   :  { %3748 = vmatmul.mubr.msk.f32.vlgmr.msra.gmra.mxu0 %vm101_vm0, %v1650_v61  ;;  %3759 = vmatpush3.msra.mxu1 %v4827_v63 }
 0x921   :  { %3760 = vmatprep.subr.mxu1 %v4834_v1  ;;  %3773 = vmatpush3.msra.mxu0 %v1740_v55 }
 0x922   :  { %3761 = vmatpush3.msra.mxu1 %v4834_v1  ;;  %3780 = vmatprep.subr.mxu0 %v4799_v7 }
 0x923   :  { %3762 = vmatprep.subr.mxu1 %v4841_v9 }
 0x924   :  { %3763 = vmatpush3.msra.mxu1 %v4841_v9 }
 0x925   :  { %3764 = vmatprep.subr.mxu1 %v4848_v40 }
 0x926   :  { %3765 = vmatpush3.msra.mxu1 %v4848_v40 }
 0x927   :  { %3802 = vmatprep.subr.mxu1 %v1740_v55 }
 0x9c4   :  { %v3702_v19 = vpop.f32.mrf.mxu0 }
 0x9c6   :  { %v1520_v32 = vpop.f32.mrf.mxu0 }
 0x9cc   :  { %v3705_v4 = vpop.f32.mrf.mxu0 }
 0x9ce   :  { %v1530_v13 = vpop.f32.mrf.mxu0 }
 0x9d4   :  { %v3708_v2 = vpop.f32.mrf.mxu0 }
 0x9d5   :  { %2278 = vrot.lane.b32.xlu1 %v3708_v2, %s4027_s4 }
 0x9d6   :  { %v1540_v25 = vpop.f32.mrf.mxu0 }
 0x9d7   :  { %2276 = vrot.lane.b32.xlu0 %v1540_v25, %s4027_s4 }
 0x9db   :  { %1994 = vrot.lane.b32.xlu0 %v1520_v32, %s4027_s4 }
 0x9dc   :  { %v3711_v15 = vpop.f32.mrf.mxu0 }
 0x9de   :  { %v1550_v10 = vpop.f32.mrf.mxu0 }
 0x9df   :  { %2280 = vrot.lane.b32.xlu1 %v1550_v10, %s4027_s4  ;;  %1998 = vrot.lane.b32.xlu0 %v1530_v13, %s4027_s4 }
 0x9e0   :  { %v1728_v28 = vpop.f32.mrf.mxu0 }
 0x9e1   :  { %v1744_v26 = vrot.slane %v1728_v28, %v1743_v23  ;;  %v2026_v36 = vrot.slane %v1728_v28, %v2025_v6 }
 0x9e2   :  { %v3749_v29 = vpop.f32.mrf.mxu0 }
 0x9e3   :  { %v1746_v39 = vmul.f32 %v3702_v19, %v1744_v26  ;;  %v4863_v17 = vmul.f32 %v3708_v2, %v2026_v36  ;;  %2282 = vrot.lane.b32.xlu1 %v3711_v15, %s4027_s4  ;;  %v1745_v5 = vmul.f32 %v1744_v26, %v1520_v32  ;;  %v4866_v51 = vmul.f32 %v2026_v36, %v1540_v25 }
 0x9e4   :  { %v4868_v14 = vmul.f32 %v2026_v36, %v1550_v10  ;;  %v4870_v3 = vmul.f32 %v3711_v15, %v2026_v36  ;;  %v1747_v27 = vmul.f32 %v1744_v26, %v1530_v13  ;;  %v1748_v8 = vmul.f32 %v3705_v4, %v1744_v26 }
 0x9e5   :  { %3766 = vmatprep.mubr.msk.f32.mxu1 %vm101_vm0, %v1745_v5 }
 0x9e6   :  { %3767 = vmatmul.mubr.msk.f32.vlgmr.msra.gmra.mxu1 %vm101_vm0, %v1746_v39 }
 0x9e7   :  { %1996 = vrot.lane.b32.xlu1 %v3702_v19, %s4027_s4  ;;  %3769 = vmatprep.mubr.msk.f32.mxu1 %vm101_vm0, %v1747_v27 }
 0x9e8   :  { %3803 = vmatpush3.msra.mxu1 %v1740_v55 }
 0x9e9   :  { %3810 = vmatprep.subr.mxu1 %v4029_v48 }
 0x9ea   :  { %3770 = vmatmul.mubr.msk.f32.gmra.mxu1 %vm101_vm0, %v1748_v8 }
 0x9eb   :  { %2000 = vrot.lane.b32.xlu1 %v3705_v4, %s4027_s4 }
 0xaa6   :  { %v3768_v35 = vpop.f32.mrf.mxu1 }
 0xaa7   :  { %v1847_v41 = vmul.f32 0.35355338, %v3768_v35 }
 0xaa8   :  { %v1827_v37 = vpop.f32.mrf.mxu1 }
 0xaa9   :  { %v1846_v60 = vmul.f32 0.35355338, %v1827_v37  ;;  %v1851_v0 = vsel %vm746_vm4, %v1847_v41, -inf }
 0xaaa   :  { %v3771_v58 = vpop.f32.mrf.mxu1 }
 0xaab   :  { %v1849_v11 = vmul.f32 0.35355338, %v3771_v58  ;;  %v1850_v42 = vsel %vm746_vm4, %v1846_v60, -inf }
 0xaac   :  { %v1837_v45 = vpop.f32.mrf.mxu1  ;;  %v1854_v44 = vmax.f32 %v1850_v42, %v1851_v0 }
 0xaad   :  { %v1848_v33 = vmul.f32 0.35355338, %v1837_v45  ;;  %v1853_v43 = vsel %vm746_vm4, %v1849_v11, -inf }
 0xaaf   :  { %v1852_v46 = vsel %vm746_vm4, %v1848_v33, -inf }
 0xab0   :  { %v1855_v16 = vmax.f32 %v1852_v46, %v1853_v43 }
 0xab2   :  { %v1856_v49 = vmax.f32 %v1854_v44, %v1855_v16 }
 0xab4   :  { %v1857_v50 = vrot.slane %v1856_v49, 4 }
 0xab6   :  { %v1858_v52 = vmax.f32 %v1856_v49, %v1857_v50 }
 0xab8   :  { %v1859_v20 = vrot.slane %v1858_v52, 2 }
 0xaba   :  { %v1860_v53 = vmax.f32 %v1858_v52, %v1859_v20 }
 0xabc   :  { %v1861_v56 = vrot.slane %v1860_v53, 1 }
 0xabe   :  { %v1862_v59 = vmax.f32 %v1860_v53, %v1861_v56 }
 0xac0   :  { %v1863_v61 = vsub.f32 %v1846_v60, %v1862_v59  ;;  %v1864_v19 = vsub.f32 %v1847_v41, %v1862_v59  ;;  %v1865_v32 = vsub.f32 %v1848_v33, %v1862_v59  ;;  %v1866_v4 = vsub.f32 %v1849_v11, %v1862_v59 }
 0xac2   :  { %v1867_v13 = vmul.f32 1.442695, %v1863_v61  ;;  %v1869_v2 = vmul.f32 1.442695, %v1864_v19  ;;  %v1871_v12 = vmul.f32 1.442695, %v1865_v32 }
 0xac3   :  { %v1873_v25 = vmul.f32 1.442695, %v1866_v4 }
 0xac4   :  { %3997 = vpow2.f32 %v1867_v13 }
 0xac5   :  { %3999 = vpow2.f32 %v1869_v2 }
 0xac6   :  { %4001 = vpow2.f32 %v1871_v12 }
 0xac7   :  { %4003 = vpow2.f32 %v1873_v25 }
 0xad1   :  { %v3998_v15 = vpop.eup %3997 }
 0xad2   :  { %v4000_v6 = vpop.eup %3999  ;;  %v1875_v10 = vsel %vm746_vm4, %v3998_v15, 0.0 }
 0xad3   :  { %v4002_v28 = vpop.eup %4001  ;;  %v1876_v26 = vsel %vm746_vm4, %v4000_v6, 0.0 }
 0xad4   :  { %v4004_v36 = vpop.eup %4003  ;;  %v1877_v29 = vadd.f32 %v1876_v26, %v1875_v10  ;;  %v1878_v39 = vsel %vm746_vm4, %v4002_v28, 0.0 }
 0xad5   :  { %v1880_v27 = vsel %vm746_vm4, %v4004_v36, 0.0 }
 0xad6   :  { %v1879_v5 = vadd.f32 %v1878_v39, %v1877_v29 }
 0xad8   :  { %v1881_v8 = vadd.f32 %v1880_v27, %v1879_v5 }
 0xada   :  { %v1882_v55 = vrot.slane %v1881_v8, 4 }
 0xadc   :  { %v1883_v35 = vadd.f32 %v1882_v55, %v1881_v8 }
 0xade   :  { %v1884_v37 = vrot.slane %v1883_v35, 2 }
 0xae0   :  { %v1885_v60 = vadd.f32 %v1884_v37, %v1883_v35 }
 0xae2   :  { %v1886_v58 = vrot.slane %v1885_v60, 1 }
 0xae4   :  { %v1887_v41 = vadd.f32 %v1886_v58, %v1885_v60 }
 0xae6   :  { %4005 = vrcp.f32 %v1887_v41 }
 0xaf3   :  { %v4006_v11 = vpop.eup %4005 }
 0xaf4   :  { %v1889_v45 = vmul.f32 %v4006_v11, %v3998_v15  ;;  %v1890_v42 = vmul.f32 %v4006_v11, %v4000_v6  ;;  %v1891_v33 = vmul.f32 %v4006_v11, %v4002_v28  ;;  %v1892_v0 = vmul.f32 %v4006_v11, %v4004_v36 }
 0xaf6   :  { %3774 = vmatprep.mubr.msk.f32.mxu0 %vm746_vm4, %v1889_v45 }
 0xaf7   :  { %3775 = vmatmul.mubr.msk.f32.vlgmr.msra.gmra.mxu0 %vm746_vm4, %v1890_v42 }
 0xaf8   :  { %3781 = vmatpush3.msra.mxu0 %v4799_v7  ;;  %3777 = vmatprep.mubr.msk.f32.mxu0 %vm746_vm4, %v1891_v33  ;;  %v4921_v7 = vpop.permute.xlu1 %2278 }
 0xaf9   :  { %3782 = vmatprep.subr.mxu0 %v4805_v34 }
 0xafa   :  { %3783 = vmatpush3.msra.mxu0 %v4805_v34 }
 0xafb   :  { %3784 = vmatprep.subr.mxu0 %v4811_v54  ;;  %3778 = vmatmul.mubr.msk.f32.gmra.mxu0 %vm746_vm4, %v1892_v0 }
 0xafc   :  { %3785 = vmatpush3.msra.mxu0 %v4811_v54  ;;  %3796 = vmatprep.mubr.msk.f32.mxu0 %vm101_vm0, %v4866_v51  ;;  %v4923_v34 = vpop.permute.xlu1 %2280  ;;  %v4925_v54 = vpop.permute.xlu0 %2276 }
 0xafd   :  { %3786 = vmatprep.subr.mxu0 %v4818_v62 }
 0xafe   :  { %3787 = vmatpush3.msra.mxu0 %v4818_v62 }
 0xaff   :  { %3788 = vmatprep.subr.mxu0 %v4827_v63 }
 0xb00   :  { %3789 = vmatpush3.msra.mxu0 %v4827_v63  ;;  %v4927_v62 = vpop.permute.xlu1 %2282  ;;  %v1995_v63 = vpop.permute.xlu0 %1994 }
 0xb01   :  { %3790 = vmatprep.subr.mxu0 %v4834_v1 }
 0xb02   :  { %3791 = vmatpush3.msra.mxu0 %v4834_v1 }
 0xb03   :  { %3792 = vmatprep.subr.mxu0 %v4841_v9 }
 0xb04   :  { %3793 = vmatpush3.msra.mxu0 %v4841_v9  ;;  %v1997_v1 = vpop.permute.xlu1 %1996  ;;  %v1999_v43 = vpop.permute.xlu0 %1998 }
 0xb05   :  { %3794 = vmatprep.subr.mxu0 %v4848_v40 }
 0xb06   :  { %3795 = vmatpush3.msra.mxu0 %v4848_v40 }
 0xb07   :  { %3797 = vmatmul.mubr.msk.f32.vlgmr.msra.gmra.mxu0 %vm101_vm0, %v4863_v17  ;;  %3845 = vmatprep.subr.mxu0 %v4029_v48 }
 0xb08   :  { %3799 = vmatprep.mubr.msk.f32.mxu0 %vm101_vm0, %v4868_v14  ;;  %v2001_v44 = vpop.permute.xlu1 %2000 }
 0xb0b   :  { %3800 = vmatmul.mubr.msk.f32.gmra.mxu0 %vm101_vm0, %v4870_v3 }
 0xb0c   :  { %3853 = vmatprep.mubr.msk.f32.mxu0 %vm4030_vm3, %v4029_v48 }
 0xbb7   :  { %v3776_v9 = vpop.f32.mrf.mxu0 }
 0xbb8   :  { %v2007_v40 = vmul.f32 %v3776_v9, %v1997_v1 }
 0xbb9   :  { %v1971_v17 = vpop.f32.mrf.mxu0 }
 0xbba   :  { %v2006_v51 = vmul.f32 %v1995_v63, %v1971_v17  ;;  %v2011_v3 = vsel %vm101_vm0, %v2007_v40, 0.0 }
 0xbbb   :  { %v3779_v14 = vpop.f32.mrf.mxu0 }
 0xbbc   :  { %v2010_v46 = vsel %vm101_vm0, %v2006_v51, 0.0  ;;  %v2009_v50 = vmul.f32 %v3779_v14, %v2001_v44 }
 0xbbd   :  { %v2012_v16 = vadd.f32 %v2011_v3, %v2010_v46  ;;  %v1981_v49 = vpop.f32.mrf.mxu0 }
 0xbbe   :  { %v2008_v52 = vmul.f32 %v1999_v43, %v1981_v49  ;;  %v2015_v56 = vsel %vm101_vm0, %v2009_v50, 0.0 }
 0xbc0   :  { %v2013_v20 = vsel %vm101_vm0, %v2008_v52, 0.0 }
 0xbc1   :  { %v2014_v53 = vadd.f32 %v2013_v20, %v2012_v16 }
 0xbc3   :  { %v4933_v59 = vadd.f32 %v2015_v56, %v2014_v53 }
 0xbc7   :  { %v3798_v61 = vpop.f32.mrf.mxu0 }
 0xbc8   :  { %v2129_v13 = vmul.f32 0.35355338, %v3798_v61 }
 0xbc9   :  { %v2109_v19 = vpop.f32.mrf.mxu0 }
 0xbca   :  { %v2128_v32 = vmul.f32 0.35355338, %v2109_v19  ;;  %v2133_v6 = vsel %vm746_vm4, %v2129_v13, -inf }
 0xbcb   :  { %v3801_v4 = vpop.f32.mrf.mxu0 }
 0xbcc   :  { %v2131_v2 = vmul.f32 0.35355338, %v3801_v4  ;;  %v2132_v25 = vsel %vm746_vm4, %v2128_v32, -inf  ;;  %v2325_v4 = vld [vmem:[%s5200_s18 + $0x78] sm:$0xff] }
 0xbcd   :  { %v2119_v12 = vpop.f32.mrf.mxu0  ;;  %v2136_v26 = vmax.f32 %v2132_v25, %v2133_v6  ;;  %v2321_v25 = vld [vmem:[%s5200_s18 + $0x58] sm:$0xff]  ;;  %v2319_v6 = vld [vmem:[%s5200_s18 + $0x48] sm:$0xff] }
 0xbce   :  { %v2130_v15 = vmul.f32 0.35355338, %v2119_v12  ;;  %v2135_v10 = vsel %vm746_vm4, %v2131_v2, -inf  ;;  %v2322_v12 = vld [vmem:[%s5200_s18 + $0x60] sm:$0xff] }
 0xbd0   :  { %v2134_v28 = vsel %vm746_vm4, %v2130_v15, -inf }
 0xbd1   :  { %v2137_v36 = vmax.f32 %v2134_v28, %v2135_v10  ;;  %v2318_v10 = vld [vmem:[%s5200_s18 + $0x40] sm:$0xff]  ;;  %v2317_v28 = vld [vmem:[%s5200_s18 + $0x38] sm:$0xff] }
 0xbd3   :  { %v2138_v29 = vmax.f32 %v2136_v26, %v2137_v36  ;;  %v2316_v26 = vld [vmem:[%s5200_s18 + $0x30] sm:$0xff]  ;;  %v2315_v36 = vld [vmem:[%s5200_s18 + $0x28] sm:$0xff] }
 0xbd5   :  { %v2139_v39 = vrot.slane %v2138_v29, 4 }
 0xbd7   :  { %v2140_v5 = vmax.f32 %v2138_v29, %v2139_v39  ;;  %v2314_v29 = vld [vmem:[%s5200_s18 + $0x20] sm:$0xff]  ;;  %v2313_v39 = vld [vmem:[%s5200_s18 + $0x18] sm:$0xff] }
 0xbd9   :  { %v2141_v27 = vrot.slane %v2140_v5, 2 }
 0xbdb   :  { %v2142_v8 = vmax.f32 %v2140_v5, %v2141_v27  ;;  %v2312_v5 = vld [vmem:[%s5200_s18 + $0x10] sm:$0xff]  ;;  %v2311_v27 = vld [vmem:[%s5200_s18 + $0x8] sm:$0xff] }
 0xbdd   :  { %v2143_v55 = vrot.slane %v2142_v8, 1 }
 0xbdf   :  { %v2144_v35 = vmax.f32 %v2142_v8, %v2143_v55 }
 0xbe1   :  { %v2145_v37 = vsub.f32 %v2128_v32, %v2144_v35  ;;  %v2146_v60 = vsub.f32 %v2129_v13, %v2144_v35  ;;  %v2147_v58 = vsub.f32 %v2130_v15, %v2144_v35  ;;  %v2148_v41 = vsub.f32 %v2131_v2, %v2144_v35  ;;  %v2324_v13 = vld [vmem:[%s5200_s18 + $0x70] sm:$0xff]  ;;  %v2323_v2 = vld [vmem:[%s5200_s18 + $0x68] sm:$0xff] }
 0xbe2   :  { %v2320_v15 = vld [vmem:[%s5200_s18 + $0x50] sm:$0xff] }
 0xbe3   :  { %v2149_v11 = vmul.f32 1.442695, %v2145_v37  ;;  %v2151_v45 = vmul.f32 1.442695, %v2146_v60  ;;  %v2153_v42 = vmul.f32 1.442695, %v2147_v58 }
 0xbe4   :  { %v2155_v33 = vmul.f32 1.442695, %v2148_v41 }
 0xbe5   :  { %4007 = vpow2.f32 %v2149_v11 }
 0xbe6   :  { %4009 = vpow2.f32 %v2151_v45 }
 0xbe7   :  { %4011 = vpow2.f32 %v2153_v42 }
 0xbe8   :  { %4013 = vpow2.f32 %v2155_v33 }
 0xbf2   :  { %v4008_v0 = vpop.eup %4007 }
 0xbf3   :  { %v4010_v63 = vpop.eup %4009  ;;  %v2157_v1 = vsel %vm746_vm4, %v4008_v0, 0.0 }
 0xbf4   :  { %v4012_v9 = vpop.eup %4011  ;;  %v2158_v40 = vsel %vm746_vm4, %v4010_v63, 0.0 }
 0xbf5   :  { %v4014_v17 = vpop.eup %4013  ;;  %v2159_v51 = vadd.f32 %v2158_v40, %v2157_v1  ;;  %v2160_v14 = vsel %vm746_vm4, %v4012_v9, 0.0 }
 0xbf6   :  { %v2162_v3 = vsel %vm746_vm4, %v4014_v17, 0.0 }
 0xbf7   :  { %v2161_v43 = vadd.f32 %v2160_v14, %v2159_v51  ;;  %v2017_v14 = vrot.slane %v4933_v59, 4 }
 0xbf9   :  { %v2163_v46 = vadd.f32 %v2162_v3, %v2161_v43  ;;  %v2018_v43 = vadd.f32 %v2017_v14, %v4933_v59 }
 0xbfb   :  { %v2164_v44 = vrot.slane %v2163_v46, 4  ;;  %v2019_v3 = vrot.slane %v2018_v43, 2 }
 0xbfd   :  { %v2165_v16 = vadd.f32 %v2164_v44, %v2163_v46  ;;  %v2020_v46 = vadd.f32 %v2019_v3, %v2018_v43  ;;  %v3376_v3 = vld [vmem:[%s5202_s22 + $0x3] ss:$0 sm:$0xff] }
 0xbff   :  { %v2166_v49 = vrot.slane %v2165_v16, 2  ;;  %v2021_v44 = vrot.slane %v2020_v46, 1 }
 0xc01   :  { %v2167_v50 = vadd.f32 %v2166_v49, %v2165_v16  ;;  %v2022_v16 = vadd.f32 %v2021_v44, %v2020_v46  ;;  %v3370_v44 = vld [vmem:[%s5204_s20 + $0x8] sm:$0xf] }
 0xc03   :  { %v2168_v52 = vrot.slane %v2167_v50, 1 }
 0xc05   :  { %v2169_v20 = vadd.f32 %v2168_v52, %v2167_v50  ;;  %v2326_v52 = vld [vmem:[%s5201_s19] sm:$0x1] }
 0xc07   :  { %4015 = vrcp.f32 %v2169_v20 }
 0xc14   :  { %v4016_v53 = vpop.eup %4015 }
 0xc15   :  { %v2171_v56 = vmul.f32 %v4016_v53, %v4008_v0  ;;  %v2172_v61 = vmul.f32 %v4016_v53, %v4010_v63  ;;  %v2173_v19 = vmul.f32 %v4016_v53, %v4012_v9  ;;  %v2174_v32 = vmul.f32 %v4016_v53, %v4014_v17 }
 0xc17   :  { %3804 = vmatprep.mubr.msk.f32.mxu1 %vm746_vm4, %v2171_v56 }
 0xc18   :  { %3805 = vmatmul.mubr.msk.f32.vlgmr.msra.gmra.mxu1 %vm746_vm4, %v2172_v61 }
 0xc19   :  { %3807 = vmatprep.mubr.msk.f32.mxu1 %vm746_vm4, %v2173_v19  ;;  %3811 = vmatpush3.msra.mxu1 %v2325_v4 }
 0xc1a   :  { %3812 = vmatprep.subr.mxu1 %v4029_v48 }
 0xc1b   :  { %3813 = vmatpush3.msra.mxu1 %v2324_v13 }
 0xc1c   :  { %3808 = vmatmul.mubr.msk.f32.gmra.mxu1 %vm746_vm4, %v2174_v32  ;;  %3814 = vmatprep.subr.mxu1 %v4029_v48 }
 0xc1d   :  { %3842 = vmatprep.mubr.msk.f32.mxu1 %vm4030_vm3, %v4029_v48  ;;  %3815 = vmatpush3.msra.mxu1 %v2323_v2 }
 0xc1e   :  { %3816 = vmatprep.subr.mxu1 %v4029_v48 }
 0xc1f   :  { %3817 = vmatpush3.msra.mxu1 %v2322_v12 }
 0xc20   :  { %3818 = vmatprep.subr.mxu1 %v4029_v48 }
 0xc21   :  { %3819 = vmatpush3.msra.mxu1 %v2321_v25 }
 0xc22   :  { %3820 = vmatprep.subr.mxu1 %v4029_v48 }
 0xc23   :  { %3821 = vmatpush3.msra.mxu1 %v2320_v15 }
 0xc24   :  { %3822 = vmatprep.subr.mxu1 %v4029_v48 }
 0xc25   :  { %3823 = vmatpush3.msra.mxu1 %v2319_v6 }
 0xc26   :  { %3824 = vmatprep.subr.mxu1 %v4029_v48 }
 0xc27   :  { %3825 = vmatpush3.msra.mxu1 %v2318_v10 }
 0xc28   :  { %3826 = vmatprep.subr.mxu1 %v4029_v48 }
 0xc29   :  { %3827 = vmatpush3.msra.mxu1 %v2317_v28 }
 0xc2a   :  { %3828 = vmatprep.subr.mxu1 %v4029_v48 }
 0xc2b   :  { %3829 = vmatpush3.msra.mxu1 %v2316_v26  ;;  %v3378_v26 = vld [vmem:[%s5204_s20 + $0x10] sm:$0xf] }
 0xc2c   :  { %3830 = vmatprep.subr.mxu1 %v4029_v48 }
 0xc2d   :  { %3831 = vmatpush3.msra.mxu1 %v2315_v36  ;;  %v3289_v36 = vld [vmem:[%s5205_s21] sm:$0xf] }
 0xc2e   :  { %3832 = vmatprep.subr.mxu1 %v4029_v48 }
 0xc2f   :  { %3833 = vmatpush3.msra.mxu1 %v2314_v29  ;;  %v3367_v29 = vld [vmem:[%s5202_s22 + $0x1] ss:$0 sm:$0xff] }
 0xc30   :  { %3834 = vmatprep.subr.mxu1 %v4029_v48 }
 0xc31   :  { %3835 = vmatpush3.msra.mxu1 %v2313_v39 }
 0xc32   :  { %3836 = vmatprep.subr.mxu1 %v4029_v48 }
 0xc33   :  { %3837 = vmatpush3.msra.mxu1 %v2312_v5 }
 0xc34   :  { %3838 = vmatprep.subr.mxu1 %v4029_v48 }
 0xc35   :  { %3839 = vmatpush3.msra.mxu1 %v2311_v27 }
 0xc36   :  { %3840 = vmatprep.subr.mxu1 %v4029_v48 }
 0xcd8   :  { %v3806_v8 = vpop.f32.mrf.mxu1 }
 0xcd9   :  { %v2289_v35 = vmul.f32 %v3806_v8, %v4921_v7  ;;  %v2310_v7 = vld [vmem:[%s5200_s18] sm:$0xff] }
 0xcda   :  { %v2253_v55 = vpop.f32.mrf.mxu1  ;;  %3841 = vmatpush3.msra.mxu1 %v2310_v7 }
 0xcdb   :  { %v2288_v37 = vmul.f32 %v4925_v54, %v2253_v55  ;;  %v2293_v11 = vsel %vm101_vm0, %v2289_v35, 0.0  ;;  %3889 = vmatprep.subr.mxu1 %v4029_v48 }
 0xcdc   :  { %v3809_v60 = vpop.f32.mrf.mxu1 }
 0xcdd   :  { %v2292_v58 = vsel %vm101_vm0, %v2288_v37, 0.0  ;;  %v2291_v45 = vmul.f32 %v3809_v60, %v4927_v62  ;;  %v3364_v60 = vld [vmem:[%s5202_s22] ss:$0 sm:$0xff] }
 0xcde   :  { %v2263_v41 = vpop.f32.mrf.mxu1  ;;  %v2294_v33 = vadd.f32 %v2293_v11, %v2292_v58 }
 0xcdf   :  { %v2290_v42 = vmul.f32 %v4923_v34, %v2263_v41  ;;  %v2297_v1 = vsel %vm101_vm0, %v2291_v45, 0.0  ;;  %v3365_v41 = vld [vmem:[%s5204_s20 + $0x4] sm:$0xf] }
 0xce1   :  { %v2295_v0 = vsel %vm101_vm0, %v2290_v42, 0.0 }
 0xce2   :  { %v2296_v63 = vadd.f32 %v2295_v0, %v2294_v33 }
 0xce4   :  { %v2298_v9 = vadd.f32 %v2297_v1, %v2296_v63 }
 0xce6   :  { %v2299_v54 = vrot.slane %v2298_v9, 4 }
 0xce8   :  { %v2300_v40 = vadd.f32 %v2299_v54, %v2298_v9  ;;  %v3372_v9 = vld [vmem:[%s5202_s22 + $0x2] ss:$0 sm:$0xff] }
 0xce9   :  { %v2445_v54 = vld [vmem:[%s5204_s20] sm:$0xf] }
 0xcea   :  { %v2301_v17 = vrot.slane %v2300_v40, 2 }
 0xcec   :  { %v2302_v62 = vadd.f32 %v2301_v17, %v2300_v40 }
 0xcee   :  { %v2303_v51 = vrot.slane %v2302_v62, 1 }
 0xcf0   :  { %v2304_v34 = vadd.f32 %v2303_v51, %v2302_v62 }
 0xcf2   :  { %2306 = vrot.lane.b32.xlu0 %v2304_v34, %s4027_s4 }
 0xd64   :  { %v2307_v49 = vpop.permute.xlu0 %2306 }
 0xd65   :  { %v2309_v50 = vsel %vm101_vm0, %v2022_v16, %v2307_v49 }
 0xd66   :  { %3843 = vmatmul.mubr.f32.vlgmr.msra.gmra.mxu1 %v2309_v50 }
 0xd67   :  { %3897 = vmatprep.mubr.msk.f32.mxu1 %vm4030_vm3, %v4029_v48 }
 0xe26   :  { %v2393_v20 = vpop.f32.mrf.mxu1 }
 0xe27   :  { %v2394_v53 = vadd.f32 %v2393_v20, %v2326_v52 }
 0xe28   :  { %v3844_v56 = vpop.f32.mrf.mxu1 }
 0xe29   :  { %v2400_v59 = vrot.slane %v2394_v53, %v1743_v23 }
 0xe2b   :  { %2406 = vrot.lane.b32.xlu1 %v2400_v59, %s4027_s4  ;;  %v2404_v47 = vmul.f32 %v2400_v59, %v4596_v22  ;;  %v2403_v23 = vmul.f32 %v2400_v59, %v4603_v24  ;;  %v2402_v24 = vmul.f32 %v2400_v59, %v4582_v18 }
 0xe9d   :  { %v2407_v61 = vpop.permute.xlu1 %2406 }
 0xe9e   :  { %v2411_v19 = vmul.f32 %v2407_v61, %v4627_v30  ;;  %v2412_v32 = vmul.f32 %v2407_v61, %v4634_v57  ;;  %v2409_v4 = vmul.f32 %v2407_v61, %v4617_v31  ;;  %v2410_v13 = vmul.f32 %v2407_v61, %v4610_v21  ;;  %v3380_v30 = vld [vmem:[%s5202_s22 + $0x4] ss:$0 sm:$0xff] }
 0xe9f   :  { %v2401_v21 = vmul.f32 %v2400_v59, %v4587_v38  ;;  %v3384_v59 = vld [vmem:[%s5202_s22 + $0x5] ss:$0 sm:$0xff] }
 0xea0   :  { %2423 = vrot.lane.b32.xlu0 %v2412_v32, %s4027_s4  ;;  %2421 = vrot.lane.b32.xlu1 %v2411_v19, %s4027_s4  ;;  %v3374_v19 = vld [vmem:[%s5204_s20 + $0xc] sm:$0xf] }
 0xea4   :  { %2419 = vrot.lane.b32.xlu0 %v2410_v13, %s4027_s4  ;;  %2417 = vrot.lane.b32.xlu1 %v2409_v4, %s4027_s4 }
 0xf12   :  { %v2424_v57 = vpop.permute.xlu0 %2423  ;;  %v2422_v2 = vpop.permute.xlu1 %2421 }
 0xf13   :  { %v2432_v12 = vsel %vm101_vm0, %v2404_v47, %v2424_v57  ;;  %v2431_v31 = vsel %vm101_vm0, %v2403_v23, %v2422_v2  ;;  %v3388_v47 = vld [vmem:[%s5202_s22 + $0x6] ss:$0 sm:$0xff] }
 0xf14   :  { %2436 = vst [vmem:[%s5203_s23 + $0x18] sm:$0xff] %v2432_v12  ;;  %2435 = vst [vmem:[%s5203_s23 + $0x10] sm:$0xff] %v2431_v31  ;;  %2463 = vrot.lane.b32.xlu0 %v2432_v12, %s4031_s6  ;;  %2461 = vrot.lane.b32.xlu1 %v2431_v31, %s4031_s6  ;;  %v2830_v22 = vmul.f32 %v3380_v30, %v2432_v12  ;;  %v2829_v6 = vmul.f32 %v3380_v30, %v2431_v31 }
 0xf16   :  { %v2420_v25 = vpop.permute.xlu0 %2419  ;;  %v2418_v15 = vpop.permute.xlu1 %2417  ;;  %3890 = vmatpush3.msra.mxu1 %v2830_v22 }
 0xf17   :  { %v2430_v10 = vsel %vm101_vm0, %v2402_v24, %v2420_v25  ;;  %v2429_v28 = vsel %vm101_vm0, %v2401_v21, %v2418_v15  ;;  %3891 = vmatprep.subr.mxu1 %v4029_v48  ;;  %v3382_v25 = vld [vmem:[%s5204_s20 + $0x14] sm:$0xf] }
 0xf18   :  { %2434 = vst [vmem:[%s5203_s23 + $0x8] sm:$0xff] %v2430_v10  ;;  %2433 = vst [vmem:[%s5203_s23] sm:$0xff] %v2429_v28  ;;  %3892 = vmatpush3.msra.mxu1 %v2829_v6  ;;  %2459 = vrot.lane.b32.xlu0 %v2430_v10, %s4031_s6  ;;  %v2828_v18 = vmul.f32 %v3380_v30, %v2430_v10  ;;  %v2827_v38 = vmul.f32 %v3380_v30, %v2429_v28 }
 0xf19   :  { %2457 = vrot.lane.b32.xlu1 %v2429_v28, %s4031_s6  ;;  %3893 = vmatprep.subr.mxu1 %v4029_v48 }
 0xf1a   :  { %3894 = vmatpush3.msra.mxu1 %v2828_v18 }
 0xf1b   :  { %3895 = vmatprep.subr.mxu1 %v4029_v48 }
 0xf1c   :  { %2443 = vrot.lane.b32.xlu0 %v2432_v12, %s4032_s16  ;;  %3896 = vmatpush3.msra.mxu1 %v2827_v38  ;;  %v3386_v38 = vld [vmem:[%s5204_s20 + $0x18] sm:$0xf] }
 0xf1d   :  { %2441 = vrot.lane.b32.xlu1 %v2431_v31, %s4032_s16  ;;  %3911 = vmatprep.subr.mxu1 %v4029_v48 }
 0xf1e   :  { %3898 = vmatmul.mubr.msk.f32.vlgmr.msra.gmra.mxu1 %vm401_vm1, %v3378_v26 }
 0xf1f   :  { %3919 = vmatprep.mubr.msk.f32.mxu1 %vm4030_vm3, %v4029_v48 }
 0xf20   :  { %2439 = vrot.lane.b32.xlu0 %v2430_v10, %s4032_s16 }
 0xf21   :  { %2437 = vrot.lane.b32.xlu1 %v2429_v28, %s4032_s16 }
 0xf24   :  { %2631 = vrot.lane.b32.xlu0 %v2432_v12, %s4033_s29 }
 0xf25   :  { %2629 = vrot.lane.b32.xlu1 %v2431_v31, %s4033_s29 }
 0xf28   :  { %2627 = vrot.lane.b32.xlu0 %v2430_v10, %s4033_s29 }
 0xf29   :  { %2625 = vrot.lane.b32.xlu1 %v2429_v28, %s4033_s29 }
 0xf2c   :  { %2727 = vrot.lane.b32.xlu0 %v2432_v12, %s4026_s0 }
 0xf2d   :  { %2725 = vrot.lane.b32.xlu1 %v2431_v31, %s4026_s0 }
 0xf30   :  { %2723 = vrot.lane.b32.xlu0 %v2430_v10, %s4026_s0 }
 0xf31   :  { %2721 = vrot.lane.b32.xlu1 %v2429_v28, %s4026_s0 }
 0xf34   :  { %2911 = vrot.lane.b32.xlu0 %v2432_v12, %s4034_s1 }
 0xf35   :  { %2909 = vrot.lane.b32.xlu1 %v2431_v31, %s4034_s1 }
 0xf38   :  { %3007 = vrot.lane.b32.xlu0 %v2432_v12, %s4035_s11 }
 0xf39   :  { %2907 = vrot.lane.b32.xlu1 %v2430_v10, %s4034_s1 }
 0xf3c   :  { %3005 = vrot.lane.b32.xlu0 %v2431_v31, %s4035_s11 }
 0xf3d   :  { %2905 = vrot.lane.b32.xlu1 %v2429_v28, %s4034_s1 }
 0xf40   :  { %3003 = vrot.lane.b32.xlu0 %v2430_v10, %s4035_s11 }
 0xf41   :  { %3001 = vrot.lane.b32.xlu1 %v2429_v28, %s4035_s11 }
 0xf44   :  { %3103 = vrot.lane.b32.xlu0 %v2432_v12, %s4036_s15 }
 0xf45   :  { %3101 = vrot.lane.b32.xlu1 %v2431_v31, %s4036_s15 }
 0xf48   :  { %3199 = vrot.lane.b32.xlu0 %v2432_v12, %s4037_s14 }
 0xf49   :  { %3099 = vrot.lane.b32.xlu1 %v2430_v10, %s4036_s15 }
 0xf4c   :  { %3197 = vrot.lane.b32.xlu0 %v2431_v31, %s4037_s14 }
 0xf4d   :  { %3097 = vrot.lane.b32.xlu1 %v2429_v28, %s4036_s15 }
 0xf50   :  { %3195 = vrot.lane.b32.xlu0 %v2430_v10, %s4037_s14 }
 0xf51   :  { %3193 = vrot.lane.b32.xlu1 %v2429_v28, %s4037_s14  ;;  %v3392_v28 = vld [vmem:[%s5202_s22 + $0x7] ss:$0 sm:$0xff] }
 0xf54   :  { %3292 = vperm.xlu0 %3962, %v3289_v36  }
 0xf86   :  { %v2464_v39 = vpop.permute.xlu0 %2463  ;;  %v2462_v5 = vpop.permute.xlu1 %2461 }
 0xf87   :  { %v2478_v27 = vmul.f32 %v3367_v29, %v2464_v39  ;;  %v2477_v8 = vmul.f32 %v3367_v29, %v2462_v5  ;;  %v3396_v39 = vld [vmem:[%s5202_s22 + $0x8] ss:$0 sm:$0xff] }
 0xf89   :  { %3846 = vmatpush3.msra.mxu0 %v2478_v27 }
 0xf8a   :  { %3847 = vmatprep.subr.mxu0 %v4029_v48  ;;  %v2460_v55 = vpop.permute.xlu0 %2459 }
 0xf8b   :  { %v2476_v35 = vmul.f32 %v3367_v29, %v2460_v55  ;;  %v2458_v37 = vpop.permute.xlu1 %2457  ;;  %3848 = vmatpush3.msra.mxu0 %v2477_v8 }
 0xf8c   :  { %3849 = vmatprep.subr.mxu0 %v4029_v48  ;;  %v2475_v58 = vmul.f32 %v3367_v29, %v2458_v37 }
 0xf8d   :  { %3850 = vmatpush3.msra.mxu0 %v2476_v35 }
 0xf8e   :  { %3851 = vmatprep.subr.mxu0 %v4029_v48  ;;  %v2444_v11 = vpop.permute.xlu0 %2443 }
 0xf8f   :  { %v2456_v45 = vmul.f32 %v3364_v60, %v2444_v11  ;;  %v2442_v42 = vpop.permute.xlu1 %2441  ;;  %3852 = vmatpush3.msra.mxu0 %v2475_v58  ;;  %v3390_v11 = vld [vmem:[%s5204_s20 + $0x1c] sm:$0xf] }
 0xf90   :  { %3856 = vmatprep.subr.mxu0 %v4029_v48  ;;  %3854 = vmatmul.mubr.msk.f32.vlgmr.msra.gmra.mxu0 %vm401_vm1, %v3365_v41  ;;  %v2455_v33 = vmul.f32 %v3364_v60, %v2442_v42 }
 0xf91   :  { %3857 = vmatpush3.msra.mxu0 %v2456_v45  ;;  %3864 = vmatprep.mubr.msk.f32.mxu0 %vm4030_vm3, %v4029_v48 }
 0xf92   :  { %v2440_v0 = vpop.permute.xlu0 %2439  ;;  %3858 = vmatprep.subr.mxu0 %v4029_v48 }
 0xf93   :  { %v2454_v63 = vmul.f32 %v3364_v60, %v2440_v0  ;;  %v2438_v1 = vpop.permute.xlu1 %2437  ;;  %3859 = vmatpush3.msra.mxu0 %v2455_v33 }
 0xf94   :  { %3860 = vmatprep.subr.mxu0 %v4029_v48  ;;  %v2453_v7 = vmul.f32 %v3364_v60, %v2438_v1 }
 0xf95   :  { %3861 = vmatpush3.msra.mxu0 %v2454_v63  ;;  %v3394_v63 = vld [vmem:[%s5204_s20 + $0x20] sm:$0xf] }
 0xf96   :  { %v2632_v40 = vpop.permute.xlu0 %2631  ;;  %3862 = vmatprep.subr.mxu0 %v4029_v48 }
 0xf97   :  { %v2646_v17 = vmul.f32 %v3372_v9, %v2632_v40  ;;  %v2630_v62 = vpop.permute.xlu1 %2629  ;;  %3863 = vmatpush3.msra.mxu0 %v2453_v7 }
 0xf98   :  { %3867 = vmatprep.subr.mxu0 %v4029_v48  ;;  %3865 = vmatmul.mubr.msk.f32.vlgmr.msra.gmra.mxu0 %vm401_vm1, %v2445_v54  ;;  %v2645_v51 = vmul.f32 %v3372_v9, %v2630_v62 }
 0xf99   :  { %3868 = vmatpush3.msra.mxu0 %v2646_v17  ;;  %3875 = vmatprep.mubr.msk.f32.mxu0 %vm4030_vm3, %v4029_v48 }
 0xf9a   :  { %v2628_v34 = vpop.permute.xlu0 %2627  ;;  %3869 = vmatprep.subr.mxu0 %v4029_v48 }
 0xf9b   :  { %v2644_v14 = vmul.f32 %v3372_v9, %v2628_v34  ;;  %v2626_v43 = vpop.permute.xlu1 %2625  ;;  %3870 = vmatpush3.msra.mxu0 %v2645_v51 }
 0xf9c   :  { %3871 = vmatprep.subr.mxu0 %v4029_v48  ;;  %v2643_v46 = vmul.f32 %v3372_v9, %v2626_v43 }
 0xf9d   :  { %3872 = vmatpush3.msra.mxu0 %v2644_v14 }
 0xf9e   :  { %v2728_v16 = vpop.permute.xlu0 %2727  ;;  %3873 = vmatprep.subr.mxu0 %v4029_v48 }
 0xf9f   :  { %v2742_v49 = vmul.f32 %v3376_v3, %v2728_v16  ;;  %v2726_v50 = vpop.permute.xlu1 %2725  ;;  %3874 = vmatpush3.msra.mxu0 %v2643_v46 }
 0xfa0   :  { %3878 = vmatprep.subr.mxu0 %v4029_v48  ;;  %3876 = vmatmul.mubr.msk.f32.vlgmr.msra.gmra.mxu0 %vm401_vm1, %v3370_v44  ;;  %v2741_v52 = vmul.f32 %v3376_v3, %v2726_v50 }
 0xfa1   :  { %3879 = vmatpush3.msra.mxu0 %v2742_v49  ;;  %3886 = vmatprep.mubr.msk.f32.mxu0 %vm4030_vm3, %v4029_v48 }
 0xfa2   :  { %v2724_v20 = vpop.permute.xlu0 %2723  ;;  %3880 = vmatprep.subr.mxu0 %v4029_v48 }
 0xfa3   :  { %v2740_v53 = vmul.f32 %v3376_v3, %v2724_v20  ;;  %v2722_v56 = vpop.permute.xlu1 %2721  ;;  %3881 = vmatpush3.msra.mxu0 %v2741_v52 }
 0xfa4   :  { %3882 = vmatprep.subr.mxu0 %v4029_v48  ;;  %v2739_v61 = vmul.f32 %v3376_v3, %v2722_v56 }
 0xfa5   :  { %3883 = vmatpush3.msra.mxu0 %v2740_v53 }
 0xfa6   :  { %v2912_v32 = vpop.permute.xlu0 %2911  ;;  %3884 = vmatprep.subr.mxu0 %v4029_v48 }
 0xfa7   :  { %v2926_v4 = vmul.f32 %v3384_v59, %v2912_v32  ;;  %v2910_v13 = vpop.permute.xlu1 %2909  ;;  %3885 = vmatpush3.msra.mxu0 %v2739_v61 }
 0xfa8   :  { %3900 = vmatprep.subr.mxu0 %v4029_v48  ;;  %3887 = vmatmul.mubr.msk.f32.vlgmr.msra.gmra.mxu0 %vm401_vm1, %v3374_v19  ;;  %v2925_v23 = vmul.f32 %v3384_v59, %v2910_v13 }
 0xfa9   :  { %3901 = vmatpush3.msra.mxu0 %v2926_v4  ;;  %3908 = vmatprep.mubr.msk.f32.mxu0 %vm4030_vm3, %v4029_v48 }
 0xfaa   :  { %v3008_v30 = vpop.permute.xlu0 %3007  ;;  %3902 = vmatprep.subr.mxu0 %v4029_v48 }
 0xfab   :  { %v3022_v57 = vmul.f32 %v3388_v47, %v3008_v30  ;;  %v2908_v2 = vpop.permute.xlu1 %2907  ;;  %3903 = vmatpush3.msra.mxu0 %v2925_v23 }
 0xfac   :  { %v2924_v12 = vmul.f32 %v3384_v59, %v2908_v2  ;;  %3904 = vmatprep.subr.mxu0 %v4029_v48 }
 0xfad   :  { %3912 = vmatpush3.msra.mxu1 %v3022_v57 }
 0xfae   :  { %3905 = vmatpush3.msra.mxu0 %v2924_v12  ;;  %v3006_v31 = vpop.permute.xlu0 %3005  ;;  %3913 = vmatprep.subr.mxu1 %v4029_v48 }
 0xfaf   :  { %v3021_v22 = vmul.f32 %v3388_v47, %v3006_v31  ;;  %v2906_v24 = vpop.permute.xlu1 %2905  ;;  %3906 = vmatprep.subr.mxu0 %v4029_v48 }
 0xfb0   :  { %v2923_v21 = vmul.f32 %v3384_v59, %v2906_v24 }
 0xfb1   :  { %3914 = vmatpush3.msra.mxu1 %v3021_v22 }
 0xfb2   :  { %3907 = vmatpush3.msra.mxu0 %v2923_v21  ;;  %v3004_v15 = vpop.permute.xlu0 %3003  ;;  %3915 = vmatprep.subr.mxu1 %v4029_v48 }
 0xfb3   :  { %v3020_v6 = vmul.f32 %v3388_v47, %v3004_v15  ;;  %3909 = vmatmul.mubr.msk.f32.vlgmr.msra.gmra.mxu0 %vm401_vm1, %v3382_v25  ;;  %v3002_v10 = vpop.permute.xlu1 %3001  ;;  %3922 = vmatprep.subr.mxu0 %v4029_v48 }
 0xfb4   :  { %3930 = vmatprep.mubr.msk.f32.mxu0 %vm4030_vm3, %v4029_v48  ;;  %v3019_v18 = vmul.f32 %v3388_v47, %v3002_v10 }
 0xfb5   :  { %3916 = vmatpush3.msra.mxu1 %v3020_v6 }
 0xfb6   :  { %v3104_v26 = vpop.permute.xlu0 %3103  ;;  %3917 = vmatprep.subr.mxu1 %v4029_v48 }
 0xfb7   :  { %v3118_v36 = vmul.f32 %v3392_v28, %v3104_v26  ;;  %v3102_v29 = vpop.permute.xlu1 %3101  ;;  %3918 = vmatpush3.msra.mxu1 %v3019_v18 }
 0xfb8   :  { %3920 = vmatmul.mubr.msk.f32.vlgmr.msra.gmra.mxu1 %vm401_vm1, %v3386_v38  ;;  %3933 = vmatprep.subr.mxu1 %v4029_v48  ;;  %v3117_v5 = vmul.f32 %v3392_v28, %v3102_v29 }
 0xfb9   :  { %3923 = vmatpush3.msra.mxu0 %v3118_v36  ;;  %3941 = vmatprep.mubr.msk.f32.mxu1 %vm4030_vm3, %v4029_v48 }
 0xfba   :  { %v3200_v27 = vpop.permute.xlu0 %3199  ;;  %3924 = vmatprep.subr.mxu0 %v4029_v48 }
 0xfbb   :  { %v3214_v8 = vmul.f32 %v3396_v39, %v3200_v27  ;;  %v3100_v55 = vpop.permute.xlu1 %3099  ;;  %3925 = vmatpush3.msra.mxu0 %v3117_v5 }
 0xfbc   :  { %v3116_v35 = vmul.f32 %v3392_v28, %v3100_v55  ;;  %3926 = vmatprep.subr.mxu0 %v4029_v48 }
 0xfbd   :  { %3934 = vmatpush3.msra.mxu1 %v3214_v8 }
 0xfbe   :  { %3927 = vmatpush3.msra.mxu0 %v3116_v35  ;;  %v3198_v37 = vpop.permute.xlu0 %3197  ;;  %3935 = vmatprep.subr.mxu1 %v4029_v48 }
 0xfbf   :  { %v3213_v60 = vmul.f32 %v3396_v39, %v3198_v37  ;;  %v3098_v58 = vpop.permute.xlu1 %3097  ;;  %3928 = vmatprep.subr.mxu0 %v4029_v48 }
 0xfc0   :  { %v3115_v41 = vmul.f32 %v3392_v28, %v3098_v58 }
 0xfc1   :  { %3936 = vmatpush3.msra.mxu1 %v3213_v60 }
 0xfc2   :  { %3929 = vmatpush3.msra.mxu0 %v3115_v41  ;;  %v3196_v45 = vpop.permute.xlu0 %3195  ;;  %3937 = vmatprep.subr.mxu1 %v4029_v48 }
 0xfc3   :  { %v3212_v42 = vmul.f32 %v3396_v39, %v3196_v45  ;;  %3931 = vmatmul.mubr.msk.f32.vlgmr.msra.gmra.mxu0 %vm401_vm1, %v3390_v11  ;;  %v3194_v33 = vpop.permute.xlu1 %3193 }
 0xfc4   :  { %v3211_v0 = vmul.f32 %v3396_v39, %v3194_v33 }
 0xfc5   :  { %3938 = vmatpush3.msra.mxu1 %v3212_v42 }
 0xfc6   :  { %3939 = vmatprep.subr.mxu1 %v4029_v48 }
 0xfc7   :  { %3940 = vmatpush3.msra.mxu1 %v3211_v0 }
 0xfc8   :  { %3942 = vmatmul.mubr.msk.f32.vlgmr.msra.gmra.mxu1 %vm401_vm1, %v3394_v63 }
 0xfcf   :  { %v3293_v32 = vpop.permute.xlu0 %3292 }
 0xfde   :  { %v2900_v1 = vpop.f32.mrf.mxu1 }
 0xfe0   :  { %v3899_v9 = vpop.f32.mrf.mxu1 }
0x1050   :  { %v2548_v7 = vpop.f32.mrf.mxu0 }
0x1052   :  { %v3855_v54 = vpop.f32.mrf.mxu0 }
0x1058   :  { %v2621_v40 = vpop.f32.mrf.mxu0 }
0x1059   :  { %v2622_v46 = vadd.f32 %v2621_v40, %v2548_v7 }
0x105a   :  { %v3866_v17 = vpop.f32.mrf.mxu0 }
0x1060   :  { %v2716_v62 = vpop.f32.mrf.mxu0 }
0x1061   :  { %v2720_v49 = vadd.f32 %v2716_v62, %v2622_v46 }
0x1062   :  { %v3877_v51 = vpop.f32.mrf.mxu0 }
0x1068   :  { %v2812_v34 = vpop.f32.mrf.mxu0 }
0x1069   :  { %v2816_v48 = vadd.f32 %v2812_v34, %v2720_v49 }
0x106a   :  { %v3888_v14 = vpop.f32.mrf.mxu0 }
0x106b   :  { %v2904_v50 = vadd.f32 %v2900_v1, %v2816_v48 }
0x1073   :  { %v2996_v43 = vpop.f32.mrf.mxu0 }
0x1074   :  { %v3000_v52 = vadd.f32 %v2996_v43, %v2904_v50 }
0x1075   :  { %v3910_v3 = vpop.f32.mrf.mxu0 }
0x1078   :  { %v3092_v44 = vpop.f32.mrf.mxu1 }
0x1079   :  { %v3096_v53 = vadd.f32 %v3092_v44, %v3000_v52 }
0x107a   :  { %v3921_v16 = vpop.f32.mrf.mxu1 }
0x1083   :  { %v3188_v20 = vpop.f32.mrf.mxu0 }
0x1084   :  { %v3192_v59 = vadd.f32 %v3188_v20, %v3096_v53 }
0x1085   :  { %v3932_v56 = vpop.f32.mrf.mxu0 }
0x1088   :  { %v3284_v61 = vpop.f32.mrf.mxu1 }
0x1089   :  { %v3288_v19 = vadd.f32 %v3284_v61, %v3192_v59 }
0x108a   :  { %v3943_v4 = vpop.f32.mrf.mxu1 }
0x108b   :  { %v3295_v13 = vadd.f32 %v3293_v32, %v3288_v19 }
0x108d   :  { %v3296_v47 = vmax.f32 %v3295_v13, 0.0 }
0x108f   :  { %3297 = vst [vmem:[%s5206_s24] sm:$0xf] %v3296_v47 }

</bundles_post_ra>
